<compile_context>
chip_gen: v7x
topology: tpu7x:2x2x1
jax: 0.10.0
libtpu: 0.0.40
codegen_flags: <defaults>
</compile_context>

<pallas_src>
import functools

import jax
import jax.numpy as jnp
from jax import lax
from jax.experimental import pallas as pl
from jax.experimental.pallas import tpu as pltpu


def genre_attn_kernel(idx_ref, emb_ref, attn_w_ref, attn_b_ref,
                      w1_ref, b1_ref, w2_ref, b2_ref,
                      w3_ref, b3_ref, wo_ref, bo_ref, out_ref):
    B, TS, _ = idx_ref.shape
    Vp, Ep = emb_ref.shape
    R = B * TS                      # batch folded into the sublane (row) dim
    n_out_p = out_ref.shape[2]
    hp = lax.Precision.HIGHEST

    # --- embedding lookup: exact one-hot matmul over padded vocab lanes ---
    onehot = (lax.broadcasted_iota(jnp.int32, (B, TS, Vp), 2) == idx_ref[...]
              ).astype(jnp.float32).reshape(R, Vp)              # sublane fold
    embeds = jnp.dot(onehot, emb_ref[...], precision=hp,
                     preferred_element_type=jnp.float32)        # (R, Ep) f32

    # --- attention projection: one matmul over all folded rows ---
    scores = jnp.dot(embeds, attn_w_ref[...], precision=hp,
                     preferred_element_type=jnp.float32) + attn_b_ref[...]

    # --- nn.Softmax() on 3-D input => legacy implicit dim = 0 (batch axis) ---
    s3 = scores.reshape(B, TS, Ep)
    m = jnp.max(s3, axis=0, keepdims=True)
    e = jnp.exp(s3 - m)
    inv = pl.reciprocal(jnp.sum(e, axis=0, keepdims=True), approx=True)
    attn = (e * inv).reshape(R, Ep)

    h = attn * embeds                                           # f32 elementwise

    # --- MLP head: bf16 operands on the MXU, f32 accumulation + f32 ReLU ---
    def layer(x, w_ref, b_ref, relu=True):
        y = jnp.dot(x.astype(jnp.bfloat16), w_ref[...],
                    preferred_element_type=jnp.float32) + b_ref[...]
        return jnp.maximum(y, 0.0) if relu else y

    h = layer(h, w1_ref, b1_ref)          # linear1
    h = layer(h, w2_ref, b2_ref)          # linear2 (applied 3x, as in forward)
    h = layer(h, w2_ref, b2_ref)
    h = layer(h, w2_ref, b2_ref)
    h = layer(h, w3_ref, b3_ref)          # linear3
    logits = layer(h, wo_ref, bo_ref, relu=False)               # (R, n_out_p)

    # single unmasked, lane-dense block store
    out_ref[...] = logits.reshape(B, TS, n_out_p)


def _round_up(x, m):
    return ((x + m - 1) // m) * m


def _pick_ts(B, S, target_rows=512):
    """Largest TS that divides S, is a multiple of 8 (free sublane folds) and
    keeps B*TS <= target_rows so intermediates stay comfortably in VMEM while
    still feeding the MXU with hundreds of rows per grid step."""
    if S % 8 != 0:
        return S            # small / ragged sequences: single tile
    best = 8
    ts = 8
    while ts <= S:
        if S % ts == 0 and B * ts <= target_rows:
            best = ts
        ts += 8
    return best


def prepare_params(params):
    """One-time conversion of PyTorch-style params into kernel layout:
    transpose to (in, out), zero-pad V/E/hidden/out feature dims to multiples
    of 128 and cast the big MLP weights to bf16 (embedding table, attention
    weights and all biases stay f32)."""
    def pad2(x, rows, cols):
        r, c = x.shape
        return jnp.pad(x, ((0, rows - r), (0, cols - c)))

    V, E = params["emb"].shape
    h1 = params["W1"].shape[0]            # 500
    h2 = params["W2"].shape[0]            # 500
    h3 = params["W3"].shape[0]            # 250
    n_out = params["Wo"].shape[0]
    Vp, Ep = _round_up(V, 128), _round_up(E, 128)
    h1p, h2p = _round_up(h1, 128), _round_up(h2, 128)
    h3p, nop = _round_up(h3, 128), _round_up(n_out, 128)

    kp = {
        "emb": pad2(params["emb"], Vp, Ep).astype(jnp.float32),          # (128,128)
        "attn_W": pad2(params["attn_W"].T, Ep, Ep).astype(jnp.float32),  # (128,128)
        "attn_b": pad2(params["attn_b"].reshape(1, -1), 1, Ep).astype(jnp.float32),
        "W1": pad2(params["W1"].T, Ep, h1p).astype(jnp.bfloat16),        # (128,512)
        "b1": pad2(params["b1"].reshape(1, -1), 1, h1p).astype(jnp.float32),
        "W2": pad2(params["W2"].T, h1p, h2p).astype(jnp.bfloat16),       # (512,512)
        "b2": pad2(params["b2"].reshape(1, -1), 1, h2p).astype(jnp.float32),
        "W3": pad2(params["W3"].T, h2p, h3p).astype(jnp.bfloat16),       # (512,256)
        "b3": pad2(params["b3"].reshape(1, -1), 1, h3p).astype(jnp.float32),
        "Wo": pad2(params["Wo"].T, h3p, nop).astype(jnp.bfloat16),       # (256,128)
        "bo": pad2(params["bo"].reshape(1, -1), 1, nop).astype(jnp.float32),
    }
    return kp, n_out


@jax.jit
def genre_attn_forward(inp, kp):
    """inp: (B, S) integer token ids. Returns (B, S, n_out_pad) f32 logits
    (lane-padded to 128; the consumer slices / fuses the real n_out cols)."""
    B, S = inp.shape
    TS = _pick_ts(B, S)
    assert S % TS == 0
    idx = inp.astype(jnp.int32).reshape(B, S, 1)
    n_out_p = kp["bo"].shape[1]

    weights = (kp["emb"], kp["attn_W"], kp["attn_b"],
               kp["W1"], kp["b1"], kp["W2"], kp["b2"],
               kp["W3"], kp["b3"], kp["Wo"], kp["bo"])

    def full_spec(a):
        return pl.BlockSpec(a.shape, lambda i: (0, 0))    # same block every step

    out = pl.pallas_call(
        genre_attn_kernel,
        out_shape=jax.ShapeDtypeStruct((B, S, n_out_p), jnp.float32),
        grid=(S // TS,),
        in_specs=[pl.BlockSpec((B, TS, 1), lambda i: (0, i, 0))]
                 + [full_spec(w) for w in weights],
        out_specs=pl.BlockSpec((B, TS, n_out_p), lambda i: (0, i, 0)),
        compiler_params=pltpu.CompilerParams(
            dimension_semantics=("parallel",),
            vmem_limit_bytes=48 * 1024 * 1024),
    )(idx, *weights)
    return out


def genre_attn_reference(inp, params):
    """Pure-JAX f32 reference matching the PyTorch forward."""
    hp = jax.lax.Precision.HIGHEST
    embeds = params["emb"][inp]                                        # (B, S, E)
    attn = jnp.dot(embeds, params["attn_W"].T, precision=hp) + params["attn_b"]
    attn = jax.nn.softmax(attn, axis=0)      # nn.Softmax() legacy dim=0 for 3-D input
    h = attn * embeds
    h = jax.nn.relu(jnp.dot(h, params["W1"].T, precision=hp) + params["b1"])
    for _ in range(3):
        h = jax.nn.relu(jnp.dot(h, params["W2"].T, precision=hp) + params["b2"])
    h = jax.nn.relu(jnp.dot(h, params["W3"].T, precision=hp) + params["b3"])
    return jnp.dot(h, params["Wo"].T, precision=hp) + params["bo"]


def init_params(key, vocab_size, emb_dim, n_out):
    """Deterministic synthetic parameters with PyTorch-style shapes (out, in)."""
    ks = jax.random.split(key, 11)

    def linear(kw, kb, in_f, out_f):
        bound = 1.0 / jnp.sqrt(jnp.float32(in_f))
        W = jax.random.uniform(kw, (out_f, in_f), jnp.float32, -bound, bound)
        b = jax.random.uniform(kb, (out_f,), jnp.float32, -bound, bound)
        return W, b

    params = {}
    params["emb"] = jax.random.normal(ks[0], (vocab_size, emb_dim), jnp.float32)
    params["attn_W"], params["attn_b"] = linear(ks[1], ks[2], emb_dim, emb_dim)
    params["W1"], params["b1"] = linear(ks[3], ks[4], emb_dim, 500)
    params["W2"], params["b2"] = linear(ks[5], ks[6], 500, 500)
    params["W3"], params["b3"] = linear(ks[7], ks[8], 500, 250)
    params["Wo"], params["bo"] = linear(ks[9], ks[10], 250, n_out)
    return params


if __name__ == "__main__":
    vocab_size, emb_dim, n_out = 50, 32, 10
    B, S = 2, 8

    key = jax.random.PRNGKey(0)
    k_inp, k_params = jax.random.split(key)
    params = init_params(k_params, vocab_size, emb_dim, n_out)
    inp = jax.random.randint(k_inp, (B, S), 0, vocab_size, dtype=jnp.int32)

    kparams, n_real = prepare_params(params)      # one-time layout/dtype prep
    out_padded = genre_attn_forward(inp, kparams)
    out_padded = jax.block_until_ready(out_padded)
    out = out_padded[..., :n_real]                # consumer-side slice (demo only)

    ref = genre_attn_reference(inp, params)
    assert out.shape == (B, S, n_out), out.shape
    assert bool(jnp.all(jnp.isfinite(out)))
    max_err = float(jnp.max(jnp.abs(out - ref)))
    assert jnp.allclose(out, ref, rtol=5e-2, atol=5e-2), f"max_err={max_err}"
    print("KERNEL_OK")
</pallas_src>

<mosaic_0001>
module attributes {stable_mosaic.version = 11 : i64} {
  func.func @genre_attn_kernel(%arg0: i32, %arg1: memref<2x8x1xi32, #tpu.memory_space<vmem>>, %arg2: memref<128x128xf32, #tpu.memory_space<vmem>>, %arg3: memref<128x128xf32, #tpu.memory_space<vmem>>, %arg4: memref<1x128xf32, #tpu.memory_space<vmem>>, %arg5: memref<128x512xbf16, #tpu.memory_space<vmem>>, %arg6: memref<1x512xf32, #tpu.memory_space<vmem>>, %arg7: memref<512x512xbf16, #tpu.memory_space<vmem>>, %arg8: memref<1x512xf32, #tpu.memory_space<vmem>>, %arg9: memref<512x256xbf16, #tpu.memory_space<vmem>>, %arg10: memref<1x256xf32, #tpu.memory_space<vmem>>, %arg11: memref<256x128xbf16, #tpu.memory_space<vmem>>, %arg12: memref<1x128xf32, #tpu.memory_space<vmem>>, %arg13: memref<2x8x128xf32, #tpu.memory_space<vmem>>) attributes {dimension_semantics = [#tpu.dimension_semantics<parallel>], iteration_bounds = array<i64: 1>, scalar_prefetch = 0 : i64, scratch_operands = 0 : i64, tpu.core_type = #tpu.core_type<tc>, window_params = [{transform_indices = @transform_0, window_bounds = array<i64: 2, 8, 1>}, {pipeline_mode = #tpu.pipeline_mode<synchronous>, transform_indices = @transform_1, window_bounds = array<i64: 128, 128>}, {pipeline_mode = #tpu.pipeline_mode<synchronous>, transform_indices = @transform_2, window_bounds = array<i64: 128, 128>}, {pipeline_mode = #tpu.pipeline_mode<synchronous>, transform_indices = @transform_3, window_bounds = array<i64: 1, 128>}, {pipeline_mode = #tpu.pipeline_mode<synchronous>, transform_indices = @transform_4, window_bounds = array<i64: 128, 512>}, {pipeline_mode = #tpu.pipeline_mode<synchronous>, transform_indices = @transform_5, window_bounds = array<i64: 1, 512>}, {pipeline_mode = #tpu.pipeline_mode<synchronous>, transform_indices = @transform_6, window_bounds = array<i64: 512, 512>}, {pipeline_mode = #tpu.pipeline_mode<synchronous>, transform_indices = @transform_7, window_bounds = array<i64: 1, 512>}, {pipeline_mode = #tpu.pipeline_mode<synchronous>, transform_indices = @transform_8, window_bounds = array<i64: 512, 256>}, {pipeline_mode = #tpu.pipeline_mode<synchronous>, transform_indices = @transform_9, window_bounds = array<i64: 1, 256>}, {pipeline_mode = #tpu.pipeline_mode<synchronous>, transform_indices = @transform_10, window_bounds = array<i64: 256, 128>}, {pipeline_mode = #tpu.pipeline_mode<synchronous>, transform_indices = @transform_11, window_bounds = array<i64: 1, 128>}, {transform_indices = @transform_12, window_bounds = array<i64: 2, 8, 128>}]} {
    %0 = tpu.iota {dimensions = array<i32: 2>} : vector<2x8x128xi32>
    %c0 = arith.constant 0 : index
    %c0_0 = arith.constant 0 : index
    %c0_1 = arith.constant 0 : index
    %1 = vector.load %arg1[%c0, %c0_0, %c0_1] : memref<2x8x1xi32, #tpu.memory_space<vmem>>, vector<2x8x1xi32>
    %2 = vector.broadcast %1 : vector<2x8x1xi32> to vector<2x8x128xi32>
    %3 = arith.cmpi eq, %0, %2 : vector<2x8x128xi32>
    %4 = arith.extui %3 : vector<2x8x128xi1> to vector<2x8x128xi32>
    %5 = arith.sitofp %4 : vector<2x8x128xi32> to vector<2x8x128xf32>
    %6 = vector.shape_cast %5 : vector<2x8x128xf32> to vector<16x128xf32>
    %c0_2 = arith.constant 0 : index
    %c0_3 = arith.constant 0 : index
    %7 = vector.load %arg2[%c0_2, %c0_3] : memref<128x128xf32, #tpu.memory_space<vmem>>, vector<128x128xf32>
    %cst = arith.constant dense<0.000000e+00> : vector<16x128xf32>
    %8 = tpu.matmul %6, %7, %cst {dimension_numbers = #tpu.dot_dimension_numbers<[1], [0], [0], [1], [0, 0, 1, 1], [], []>, precision = #tpu.contract_precision<fp32>} : vector<16x128xf32>, vector<128x128xf32>, vector<16x128xf32> -> vector<16x128xf32>
    %c0_4 = arith.constant 0 : index
    %c0_5 = arith.constant 0 : index
    %9 = vector.load %arg3[%c0_4, %c0_5] : memref<128x128xf32, #tpu.memory_space<vmem>>, vector<128x128xf32>
    %cst_6 = arith.constant dense<0.000000e+00> : vector<16x128xf32>
    %10 = tpu.matmul %8, %9, %cst_6 {dimension_numbers = #tpu.dot_dimension_numbers<[1], [0], [0], [1], [0, 0, 1, 1], [], []>, precision = #tpu.contract_precision<fp32>} : vector<16x128xf32>, vector<128x128xf32>, vector<16x128xf32> -> vector<16x128xf32>
    %c0_7 = arith.constant 0 : index
    %c0_8 = arith.constant 0 : index
    %11 = vector.load %arg4[%c0_7, %c0_8] : memref<1x128xf32, #tpu.memory_space<vmem>>, vector<1x128xf32>
    %12 = vector.broadcast %11 : vector<1x128xf32> to vector<16x128xf32>
    %13 = arith.addf %10, %12 : vector<16x128xf32>
    %14 = vector.shape_cast %13 : vector<16x128xf32> to vector<2x8x128xf32>
    %cst_9 = arith.constant dense<0xFF800000> : vector<8x128xf32>
    %15 = vector.multi_reduction <maximumf>, %14, %cst_9 [0] : vector<2x8x128xf32> to vector<8x128xf32>
    %16 = vector.shape_cast %15 : vector<8x128xf32> to vector<1x8x128xf32>
    %17 = vector.broadcast %16 : vector<1x8x128xf32> to vector<2x8x128xf32>
    %18 = arith.subf %14, %17 : vector<2x8x128xf32>
    %19 = math.exp %18 : vector<2x8x128xf32>
    %cst_10 = arith.constant dense<0.000000e+00> : vector<8x128xf32>
    %20 = vector.multi_reduction <add>, %19, %cst_10 [0] : vector<2x8x128xf32> to vector<8x128xf32>
    %21 = vector.shape_cast %20 : vector<8x128xf32> to vector<1x8x128xf32>
    %22 = tpu.reciprocal %21 {approx = true} : vector<1x8x128xf32> -> vector<1x8x128xf32>
    %23 = vector.broadcast %22 : vector<1x8x128xf32> to vector<2x8x128xf32>
    %24 = arith.mulf %19, %23 : vector<2x8x128xf32>
    %25 = vector.shape_cast %24 : vector<2x8x128xf32> to vector<16x128xf32>
    %26 = arith.mulf %25, %8 : vector<16x128xf32>
    %27 = arith.truncf %26 : vector<16x128xf32> to vector<16x128xbf16>
    %c0_11 = arith.constant 0 : index
    %c0_12 = arith.constant 0 : index
    %28 = vector.load %arg5[%c0_11, %c0_12] : memref<128x512xbf16, #tpu.memory_space<vmem>>, vector<128x512xbf16>
    %cst_13 = arith.constant dense<0.000000e+00> : vector<16x512xf32>
    %29 = tpu.matmul %27, %28, %cst_13 {dimension_numbers = #tpu.dot_dimension_numbers<[1], [0], [0], [1], [0, 0, 1, 1], [], []>} : vector<16x128xbf16>, vector<128x512xbf16>, vector<16x512xf32> -> vector<16x512xf32>
    %c0_14 = arith.constant 0 : index
    %c0_15 = arith.constant 0 : index
    %30 = vector.load %arg6[%c0_14, %c0_15] : memref<1x512xf32, #tpu.memory_space<vmem>>, vector<1x512xf32>
    %31 = vector.broadcast %30 : vector<1x512xf32> to vector<16x512xf32>
    %32 = arith.addf %29, %31 : vector<16x512xf32>
    %cst_16 = arith.constant 0.000000e+00 : f32
    %33 = vector.broadcast %cst_16 : f32 to vector<16x512xf32>
    %34 = arith.maximumf %32, %33 : vector<16x512xf32>
    %35 = arith.truncf %34 : vector<16x512xf32> to vector<16x512xbf16>
    %c0_17 = arith.constant 0 : index
    %c0_18 = arith.constant 0 : index
    %36 = vector.load %arg7[%c0_17, %c0_18] : memref<512x512xbf16, #tpu.memory_space<vmem>>, vector<512x512xbf16>
    %cst_19 = arith.constant dense<0.000000e+00> : vector<16x512xf32>
    %37 = tpu.matmul %35, %36, %cst_19 {dimension_numbers = #tpu.dot_dimension_numbers<[1], [0], [0], [1], [0, 0, 1, 1], [], []>} : vector<16x512xbf16>, vector<512x512xbf16>, vector<16x512xf32> -> vector<16x512xf32>
    %c0_20 = arith.constant 0 : index
    %c0_21 = arith.constant 0 : index
    %38 = vector.load %arg8[%c0_20, %c0_21] : memref<1x512xf32, #tpu.memory_space<vmem>>, vector<1x512xf32>
    %39 = vector.broadcast %38 : vector<1x512xf32> to vector<16x512xf32>
    %40 = arith.addf %37, %39 : vector<16x512xf32>
    %cst_22 = arith.constant 0.000000e+00 : f32
    %41 = vector.broadcast %cst_22 : f32 to vector<16x512xf32>
    %42 = arith.maximumf %40, %41 : vector<16x512xf32>
    %43 = arith.truncf %42 : vector<16x512xf32> to vector<16x512xbf16>
    %c0_23 = arith.constant 0 : index
    %c0_24 = arith.constant 0 : index
    %44 = vector.load %arg7[%c0_23, %c0_24] : memref<512x512xbf16, #tpu.memory_space<vmem>>, vector<512x512xbf16>
    %cst_25 = arith.constant dense<0.000000e+00> : vector<16x512xf32>
    %45 = tpu.matmul %43, %44, %cst_25 {dimension_numbers = #tpu.dot_dimension_numbers<[1], [0], [0], [1], [0, 0, 1, 1], [], []>} : vector<16x512xbf16>, vector<512x512xbf16>, vector<16x512xf32> -> vector<16x512xf32>
    %c0_26 = arith.constant 0 : index
    %c0_27 = arith.constant 0 : index
    %46 = vector.load %arg8[%c0_26, %c0_27] : memref<1x512xf32, #tpu.memory_space<vmem>>, vector<1x512xf32>
    %47 = vector.broadcast %46 : vector<1x512xf32> to vector<16x512xf32>
    %48 = arith.addf %45, %47 : vector<16x512xf32>
    %cst_28 = arith.constant 0.000000e+00 : f32
    %49 = vector.broadcast %cst_28 : f32 to vector<16x512xf32>
    %50 = arith.maximumf %48, %49 : vector<16x512xf32>
    %51 = arith.truncf %50 : vector<16x512xf32> to vector<16x512xbf16>
    %c0_29 = arith.constant 0 : index
    %c0_30 = arith.constant 0 : index
    %52 = vector.load %arg7[%c0_29, %c0_30] : memref<512x512xbf16, #tpu.memory_space<vmem>>, vector<512x512xbf16>
    %cst_31 = arith.constant dense<0.000000e+00> : vector<16x512xf32>
    %53 = tpu.matmul %51, %52, %cst_31 {dimension_numbers = #tpu.dot_dimension_numbers<[1], [0], [0], [1], [0, 0, 1, 1], [], []>} : vector<16x512xbf16>, vector<512x512xbf16>, vector<16x512xf32> -> vector<16x512xf32>
    %c0_32 = arith.constant 0 : index
    %c0_33 = arith.constant 0 : index
    %54 = vector.load %arg8[%c0_32, %c0_33] : memref<1x512xf32, #tpu.memory_space<vmem>>, vector<1x512xf32>
    %55 = vector.broadcast %54 : vector<1x512xf32> to vector<16x512xf32>
    %56 = arith.addf %53, %55 : vector<16x512xf32>
    %cst_34 = arith.constant 0.000000e+00 : f32
    %57 = vector.broadcast %cst_34 : f32 to vector<16x512xf32>
    %58 = arith.maximumf %56, %57 : vector<16x512xf32>
    %59 = arith.truncf %58 : vector<16x512xf32> to vector<16x512xbf16>
    %c0_35 = arith.constant 0 : index
    %c0_36 = arith.constant 0 : index
    %60 = vector.load %arg9[%c0_35, %c0_36] : memref<512x256xbf16, #tpu.memory_space<vmem>>, vector<512x256xbf16>
    %cst_37 = arith.constant dense<0.000000e+00> : vector<16x256xf32>
    %61 = tpu.matmul %59, %60, %cst_37 {dimension_numbers = #tpu.dot_dimension_numbers<[1], [0], [0], [1], [0, 0, 1, 1], [], []>} : vector<16x512xbf16>, vector<512x256xbf16>, vector<16x256xf32> -> vector<16x256xf32>
    %c0_38 = arith.constant 0 : index
    %c0_39 = arith.constant 0 : index
    %62 = vector.load %arg10[%c0_38, %c0_39] : memref<1x256xf32, #tpu.memory_space<vmem>>, vector<1x256xf32>
    %63 = vector.broadcast %62 : vector<1x256xf32> to vector<16x256xf32>
    %64 = arith.addf %61, %63 : vector<16x256xf32>
    %cst_40 = arith.constant 0.000000e+00 : f32
    %65 = vector.broadcast %cst_40 : f32 to vector<16x256xf32>
    %66 = arith.maximumf %64, %65 : vector<16x256xf32>
    %67 = arith.truncf %66 : vector<16x256xf32> to vector<16x256xbf16>
    %c0_41 = arith.constant 0 : index
    %c0_42 = arith.constant 0 : index
    %68 = vector.load %arg11[%c0_41, %c0_42] : memref<256x128xbf16, #tpu.memory_space<vmem>>, vector<256x128xbf16>
    %cst_43 = arith.constant dense<0.000000e+00> : vector<16x128xf32>
    %69 = tpu.matmul %67, %68, %cst_43 {dimension_numbers = #tpu.dot_dimension_numbers<[1], [0], [0], [1], [0, 0, 1, 1], [], []>} : vector<16x256xbf16>, vector<256x128xbf16>, vector<16x128xf32> -> vector<16x128xf32>
    %c0_44 = arith.constant 0 : index
    %c0_45 = arith.constant 0 : index
    %70 = vector.load %arg12[%c0_44, %c0_45] : memref<1x128xf32, #tpu.memory_space<vmem>>, vector<1x128xf32>
    %71 = vector.broadcast %70 : vector<1x128xf32> to vector<16x128xf32>
    %72 = arith.addf %69, %71 : vector<16x128xf32>
    %73 = vector.shape_cast %72 : vector<16x128xf32> to vector<2x8x128xf32>
    %c0_46 = arith.constant 0 : index
    %c0_47 = arith.constant 0 : index
    %c0_48 = arith.constant 0 : index
    %74 = vector.load %arg13[%c0_46, %c0_47, %c0_48] : memref<2x8x128xf32, #tpu.memory_space<vmem>>, vector<2x8x128xf32>
    tpu.vector_store %arg13[%c0_46, %c0_47, %c0_48], %73 {strides = array<i32>} : memref<2x8x128xf32, #tpu.memory_space<vmem>>, vector<2x8x128xf32>,
    return
  }
  func.func @transform_0(%arg0: i32) -> (i32, i32, i32) {
    %c0_i32 = arith.constant 0 : i32
    %c0_i32_0 = arith.constant 0 : i32
    %c0_i32_1 = arith.constant 0 : i32
    return %c0_i32, %arg0, %c0_i32_0 : i32, i32, i32
  }
  func.func @transform_1(%arg0: i32) -> (i32, i32) {
    %c0_i32 = arith.constant 0 : i32
    %c0_i32_0 = arith.constant 0 : i32
    %c0_i32_1 = arith.constant 0 : i32
    return %c0_i32, %c0_i32_0 : i32, i32
  }
  func.func @transform_2(%arg0: i32) -> (i32, i32) {
    %c0_i32 = arith.constant 0 : i32
    %c0_i32_0 = arith.constant 0 : i32
    %c0_i32_1 = arith.constant 0 : i32
    return %c0_i32, %c0_i32_0 : i32, i32
  }
  func.func @transform_3(%arg0: i32) -> (i32, i32) {
    %c0_i32 = arith.constant 0 : i32
    %c0_i32_0 = arith.constant 0 : i32
    %c0_i32_1 = arith.constant 0 : i32
    return %c0_i32, %c0_i32_0 : i32, i32
  }
  func.func @transform_4(%arg0: i32) -> (i32, i32) {
    %c0_i32 = arith.constant 0 : i32
    %c0_i32_0 = arith.constant 0 : i32
    %c0_i32_1 = arith.constant 0 : i32
    return %c0_i32, %c0_i32_0 : i32, i32
  }
  func.func @transform_5(%arg0: i32) -> (i32, i32) {
    %c0_i32 = arith.constant 0 : i32
    %c0_i32_0 = arith.constant 0 : i32
    %c0_i32_1 = arith.constant 0 : i32
    return %c0_i32, %c0_i32_0 : i32, i32
  }
  func.func @transform_6(%arg0: i32) -> (i32, i32) {
    %c0_i32 = arith.constant 0 : i32
    %c0_i32_0 = arith.constant 0 : i32
    %c0_i32_1 = arith.constant 0 : i32
    return %c0_i32, %c0_i32_0 : i32, i32
  }
  func.func @transform_7(%arg0: i32) -> (i32, i32) {
    %c0_i32 = arith.constant 0 : i32
    %c0_i32_0 = arith.constant 0 : i32
    %c0_i32_1 = arith.constant 0 : i32
    return %c0_i32, %c0_i32_0 : i32, i32
  }
  func.func @transform_8(%arg0: i32) -> (i32, i32) {
    %c0_i32 = arith.constant 0 : i32
    %c0_i32_0 = arith.constant 0 : i32
    %c0_i32_1 = arith.constant 0 : i32
    return %c0_i32, %c0_i32_0 : i32, i32
  }
  func.func @transform_9(%arg0: i32) -> (i32, i32) {
    %c0_i32 = arith.constant 0 : i32
    %c0_i32_0 = arith.constant 0 : i32
    %c0_i32_1 = arith.constant 0 : i32
    return %c0_i32, %c0_i32_0 : i32, i32
  }
  func.func @transform_10(%arg0: i32) -> (i32, i32) {
    %c0_i32 = arith.constant 0 : i32
    %c0_i32_0 = arith.constant 0 : i32
    %c0_i32_1 = arith.constant 0 : i32
    return %c0_i32, %c0_i32_0 : i32, i32
  }
  func.func @transform_11(%arg0: i32) -> (i32, i32) {
    %c0_i32 = arith.constant 0 : i32
    %c0_i32_0 = arith.constant 0 : i32
    %c0_i32_1 = arith.constant 0 : i32
    return %c0_i32, %c0_i32_0 : i32, i32
  }
  func.func @transform_12(%arg0: i32) -> (i32, i32, i32) {
    %c0_i32 = arith.constant 0 : i32
    %c0_i32_0 = arith.constant 0 : i32
    %c0_i32_1 = arith.constant 0 : i32
    return %c0_i32, %arg0, %c0_i32_0 : i32, i32, i32
  }
}

</mosaic_0001>

<bundles_post_ra>
// kernel: genre_attn_forward.1
= control target key start
LH: loop header
LB: loop body
LE: loop exit
PB: predicated region body
PF: predicated region fallthrough
CT: control target
= control target key end

     0   :  { %17 = vsyncpa [#allocation3], 0  ;;  %s7353_s0 = inlined_call_operand.vmem [shape: s32[2,8,1], index: 0, kind: input, shape index: {}]   ;;  %s7354_s1 = inlined_call_operand.hbm [shape: f32[128,128], index: 1, kind: input, shape index: {}]   ;;  %s7355_s2 = inlined_call_operand.hbm [shape: f32[128,128], index: 2, kind: input, shape index: {}]   ;;  %s7356_s3 = inlined_call_operand.vmem [shape: f32[1,128], index: 3, kind: input, shape index: {}]   ;;  %s7357_s4 = inlined_call_operand.hbm [shape: bf16[128,512], index: 4, kind: input, shape index: {}]   ;;  %s7358_s5 = inlined_call_operand.vmem [shape: f32[1,512], index: 5, kind: input, shape index: {}]   ;;  %s7359_s6 = inlined_call_operand.hbm [shape: bf16[512,512], index: 6, kind: input, shape index: {}]   ;;  %s7360_s7 = inlined_call_operand.vmem [shape: f32[1,512], index: 7, kind: input, shape index: {}]   ;;  %s7361_s8 = inlined_call_operand.hbm [shape: bf16[512,256], index: 8, kind: input, shape index: {}]   ;;  %s7362_s9 = inlined_call_operand.vmem [shape: f32[1,256], index: 9, kind: input, shape index: {}]   ;;  %s7363_s10 = inlined_call_operand.hbm [shape: bf16[256,128], index: 10, kind: input, shape index: {}]   ;;  %s7364_s11 = inlined_call_operand.vmem [shape: f32[1,128], index: 11, kind: input, shape index: {}]   ;;  %s7365_s12 = inlined_call_operand.hbm [shape: f32[2,8,128], index: 12, kind: output, shape index: {}]  }
   0x1   :  { %18 = vsyncpa [#allocation6], 0 }
   0x2   :  { %19 = vsyncpa [#allocation9], 0 }
   0x3   :  { %20 = vsyncpa [#allocation12], 0 }
   0x4   :  { %21 = vsyncpa [#allocation4], 0  ;;  %s5811_s21 = smov [#allocation5]   ;;  %s5647_s25 = scalar_lea.hbm %s7355_s2, 2048 }
   0x5   :  { %s41_s22 = sshll.u32 %s5811_s21, 4  ;;  %p5648_p0 = scmp.ne.s32.totalorder %s7355_s2, %s5647_s25  ;;  %s42_s22 = int_to_ptr.vmem [resolvable:$true] %s41_s22 }
   0x6   :  { %p5651_p1 = scmp.lt.u32.totalorder %s5647_s25, %s7355_s2 }
   0x8   :  { %p5653_p2 = pnand %p5651_p1, %p5648_p0 }
   0xa   :  { %5656 = shalt.err (!%p5653_p2)
}
   0xb   :  { %s5657_s30 = scalar_lea.vmem %s42_s22, 2048  ;;  %p5662_p4 = scmp.lt.s32.totalorder %s42_s22, %s42_s22 }
   0xc   :  { %p5658_p3 = scmp.ne.s32.totalorder %s42_s22, %s5657_s30  ;;  %p5663_p5 = scmp.lt.s32.totalorder %s5657_s30, %s5657_s30 }
   0xe   :  { %p5664_p6 = por %p5663_p5, %p5662_p4 }
  0x10   :  { %p5665_p7 = pnand %p5664_p6, %p5658_p3 }
  0x12   :  { %5668 = shalt.err (!%p5665_p7)
}
  0x13   :  { %s5812_s13 = smov 128   ;;  %s5813_s14 = smov 8  }
  0x14   :  { %47 = dma.hbm_to_vmem [thread:$0]  %s7355_s2, 2048, %s42_s22, [#allocation6], %s5812_s13, %s5812_s13, %s5813_s14  }
  0x15   :  { %s5814_s17 = smov [#allocation8]   ;;  %s5815_s19 = smov [#allocation2]  }
  0x16   :  { %s69_s18 = sshll.u32 %s5814_s17, 4  ;;  %s29_s20 = sshll.u32 %s5815_s19, 4  ;;  %s70_s18 = int_to_ptr.vmem [resolvable:$true] %s69_s18  ;;  %s30_s20 = int_to_ptr.vmem [resolvable:$true] %s29_s20 }
  0x17   :  { %s5669_s24 = scalar_lea.hbm %s7359_s6, 16384 }
  0x18   :  { %p5670_p8 = scmp.ne.s32.totalorder %s7359_s6, %s5669_s24  ;;  %p5673_p9 = scmp.lt.u32.totalorder %s5669_s24, %s7359_s6 }
  0x1a   :  { %p5675_p10 = pnand %p5673_p9, %p5670_p8 }
  0x1c   :  { %5678 = shalt.err (!%p5675_p10)
}
  0x1d   :  { %s5679_s2 = scalar_lea.vmem %s70_s18, 16384  ;;  %p5684_p12 = scmp.lt.s32.totalorder %s70_s18, %s70_s18 }
  0x1e   :  { %p5680_p11 = scmp.ne.s32.totalorder %s70_s18, %s5679_s2  ;;  %p5685_p13 = scmp.lt.s32.totalorder %s5679_s2, %s5679_s2 }
  0x20   :  { %p5686_p0 = por %p5685_p13, %p5684_p12 }
  0x22   :  { %p5687_p1 = pnand %p5686_p0, %p5680_p11 }
  0x24   :  { %5690 = shalt.err (!%p5687_p1)
}
  0x25   :  { %s5816_s22 = smov 256   ;;  %s5817_s29 = smov 16  }
  0x26   :  { %75 = dma.hbm_to_vmem [thread:$0]  %s7359_s6, 16384, %s70_s18, [#allocation9], %s5816_s22, %s5816_s22, %s5817_s29  }
  0x27   :  { %s5691_s19 = scalar_lea.hbm %s7354_s1, 2048 }
  0x28   :  { %p5692_p2 = scmp.ne.s32.totalorder %s7354_s1, %s5691_s19  ;;  %p5695_p3 = scmp.lt.u32.totalorder %s5691_s19, %s7354_s1 }
  0x2a   :  { %p5697_p4 = pnand %p5695_p3, %p5692_p2 }
  0x2c   :  { %5700 = shalt.err (!%p5697_p4)
}
  0x2d   :  { %s5701_s26 = scalar_lea.vmem %s30_s20, 2048  ;;  %p5706_p6 = scmp.lt.s32.totalorder %s30_s20, %s30_s20 }
  0x2e   :  { %p5702_p5 = scmp.ne.s32.totalorder %s30_s20, %s5701_s26  ;;  %p5707_p7 = scmp.lt.s32.totalorder %s5701_s26, %s5701_s26 }
  0x30   :  { %p5708_p8 = por %p5707_p7, %p5706_p6 }
  0x32   :  { %p5709_p9 = pnand %p5708_p8, %p5702_p5 }
  0x34   :  { %5712 = shalt.err (!%p5709_p9)
}
  0x35   :  { %35 = dma.hbm_to_vmem [thread:$0]  %s7354_s1, 2048, %s30_s20, [#allocation3], %s5812_s13, %s5812_s13, %s5813_s14  }
  0x36   :  { %s5818_s27 = smov [#allocation7]   ;;  %s5819_s2 = smov [#allocation10]  }
  0x37   :  { %s55_s28 = sshll.u32 %s5818_s27, 4  ;;  %s83_s30 = sshll.u32 %s5819_s2, 4  ;;  %s56_s28 = int_to_ptr.vmem [resolvable:$true] %s55_s28  ;;  %s84_s30 = int_to_ptr.vmem [resolvable:$true] %s83_s30 }
  0x38   :  { %s5713_s17 = scalar_lea.hbm %s7357_s4, 4096 }
  0x39   :  { %p5714_p10 = scmp.ne.s32.totalorder %s7357_s4, %s5713_s17  ;;  %p5717_p11 = scmp.lt.u32.totalorder %s5713_s17, %s7357_s4 }
  0x3b   :  { %p5719_p12 = pnand %p5717_p11, %p5714_p10 }
  0x3d   :  { %5722 = shalt.err (!%p5719_p12)
}
  0x3e   :  { %s5723_s1 = scalar_lea.vmem %s56_s28, 4096  ;;  %p5728_p0 = scmp.lt.s32.totalorder %s56_s28, %s56_s28 }
  0x3f   :  { %p5724_p13 = scmp.ne.s32.totalorder %s56_s28, %s5723_s1  ;;  %p5729_p1 = scmp.lt.s32.totalorder %s5723_s1, %s5723_s1 }
  0x41   :  { %p5730_p2 = por %p5729_p1, %p5728_p0 }
  0x43   :  { %p5731_p3 = pnand %p5730_p2, %p5724_p13 }
  0x45   :  { %5734 = shalt.err (!%p5731_p3)
}
  0x46   :  { %61 = dma.hbm_to_vmem [thread:$0]  %s7357_s4, 4096, %s56_s28, [#allocation6], %s5816_s22, %s5816_s22, %s5817_s29  }
  0x47   :  { %s5735_s18 = scalar_lea.hbm %s7361_s8, 8192 }
  0x48   :  { %p5736_p4 = scmp.ne.s32.totalorder %s7361_s8, %s5735_s18  ;;  %p5739_p5 = scmp.lt.u32.totalorder %s5735_s18, %s7361_s8 }
  0x4a   :  { %p5741_p6 = pnand %p5739_p5, %p5736_p4 }
  0x4c   :  { %5744 = shalt.err (!%p5741_p6)
}
  0x4d   :  { %s5745_s17 = scalar_lea.vmem %s84_s30, 8192  ;;  %p5750_p8 = scmp.lt.s32.totalorder %s84_s30, %s84_s30 }
  0x4e   :  { %p5746_p7 = scmp.ne.s32.totalorder %s84_s30, %s5745_s17  ;;  %p5751_p9 = scmp.lt.s32.totalorder %s5745_s17, %s5745_s17 }
  0x50   :  { %p5752_p10 = por %p5751_p9, %p5750_p8 }
  0x52   :  { %p5753_p11 = pnand %p5752_p10, %p5746_p7 }
  0x54   :  { %5756 = shalt.err (!%p5753_p11)
}
  0x55   :  { %89 = dma.hbm_to_vmem [thread:$0]  %s7361_s8, 8192, %s84_s30, [#allocation9], %s5812_s13, %s5812_s13, %s5813_s14  }
  0x56   :  { %s5820_s29 = smov [#allocation11]   ;;  %s5757_s23 = scalar_lea.hbm %s7363_s10, 2048 }
  0x57   :  { %s97_s28 = sshll.u32 %s5820_s29, 4  ;;  %p5758_p12 = scmp.ne.s32.totalorder %s7363_s10, %s5757_s23  ;;  %s98_s28 = int_to_ptr.vmem [resolvable:$true] %s97_s28 }
  0x58   :  { %p5761_p13 = scmp.lt.u32.totalorder %s5757_s23, %s7363_s10 }
  0x5a   :  { %p5763_p0 = pnand %p5761_p13, %p5758_p12 }
  0x5c   :  { %5766 = shalt.err (!%p5763_p0)
}
  0x5d   :  { %s5767_s26 = scalar_lea.vmem %s98_s28, 2048  ;;  %p5772_p2 = scmp.lt.s32.totalorder %s98_s28, %s98_s28 }
  0x5e   :  { %p5768_p1 = scmp.ne.s32.totalorder %s98_s28, %s5767_s26  ;;  %p5773_p3 = scmp.lt.s32.totalorder %s5767_s26, %s5767_s26 }
  0x60   :  { %p5774_p4 = por %p5773_p3, %p5772_p2 }
  0x62   :  { %p5775_p5 = pnand %p5774_p4, %p5768_p1 }
  0x64   :  { %5778 = shalt.err (!%p5775_p5)
}
  0x65   :  { %s5821_s8 = smov 64   ;;  %s5822_s30 = smov 4  }
  0x66   :  { %103 = dma.hbm_to_vmem [thread:$0]  %s7363_s10, 2048, %s98_s28, [#allocation12], %s5821_s8, %s5821_s8, %s5822_s30  }
  0x67   :  { %5801 = dma.done.wait [#allocation3], 2048  }
  0x68   :  { %5802 = vsyncadd [#allocation3], 4294965248 }
  0x69   :  { %5803 = dma.done.wait [#allocation6], 6144  }
  0x6a   :  { %5804 = vsyncadd [#allocation6], 4294961152 }
  0x6b   :  { %5805 = dma.done.wait [#allocation9], 24576  }
  0x6c   :  { %5806 = vsyncadd [#allocation9], 4294942720 }
  0x6d   :  { %5807 = dma.done.wait [#allocation12], 2048  }
  0x6e   :  { %5808 = vsyncadd [#allocation12], 4294965248  ;;  %v7367_v0 = vmov 0   ;;  %v127_v1 = vld [vmem:[%s7353_s0] sm:$0xff]  ;;  %v128_v2 = vld [vmem:[%s7353_s0 + $0x8] sm:$0xff]  ;;  %s5826_s28 = smov [#allocation13]  }
  0x6f   :  { %5288 = vset.pattern.permute.xlu0 %v7367_v0  ;;  %v141_v3 = vld [vmem:[#allocation2] sm:$0xff]  ;;  %v142_v4 = vld [vmem:[#allocation2 + $0x8] sm:$0xff]  ;;  %v143_v6 = vld [vmem:[#allocation2 + $0x10] sm:$0xff]  ;;  %s3887_s19 = sshll.u32 %s5826_s28, 4  ;;  %s3888_s19 = int_to_ptr.vmem [resolvable:$true] %s3887_s19 }
  0x70   :  { %130 = vperm.xlu0 %5288, %v127_v1   ;;  %v158_v5 = vand.u32 4294901760, %v141_v3  ;;  %v144_v7 = vld [vmem:[#allocation2 + $0x18] sm:$0xff]  ;;  %v161_v8 = vand.u32 4294901760, %v142_v4  ;;  %v164_v9 = vand.u32 4294901760, %v143_v6  ;;  %v145_v11 = vld [vmem:[#allocation2 + $0x20] sm:$0xff]  ;;  %v146_v12 = vld [vmem:[#allocation2 + $0x28] sm:$0xff]  ;;  %p5784_p7 = scmp.lt.s32.totalorder %s3888_s19, %s3888_s19 }
  0x71   :  { %v167_v10 = vand.u32 4294901760, %v144_v7  ;;  %v147_v13 = vld [vmem:[#allocation2 + $0x30] sm:$0xff]  ;;  %v170_v15 = vand.u32 4294901760, %v145_v11  ;;  %v173_v16 = vand.u32 4294901760, %v146_v12  ;;  %v148_v17 = vld [vmem:[#allocation2 + $0x38] sm:$0xff]  ;;  %v149_v31 = vld [vmem:[#allocation2 + $0x40] sm:$0xff] }
  0x72   :  { %v5986_v14 = vsub.f32 %v141_v3, %v158_v5  ;;  %v176_v18 = vand.u32 4294901760, %v147_v13  ;;  %v5988_v19 = vpack.c.bf16 %v161_v8, %v158_v5  ;;  %v5990_v20 = vsub.f32 %v142_v4, %v161_v8  ;;  %v150_v36 = vld [vmem:[#allocation2 + $0x48] sm:$0xff]  ;;  %v151_v41 = vld [vmem:[#allocation2 + $0x50] sm:$0xff]  ;;  %v152_v50 = vld [vmem:[#allocation2 + $0x58] sm:$0xff]  ;;  %s5779_s21 = scalar_lea.vmem %s3888_s19, 256 }
  0x73   :  { %v5992_v21 = vpack.c.bf16 %v167_v10, %v164_v9  ;;  %v5994_v22 = vsub.f32 %v143_v6, %v164_v9  ;;  %v5997_v24 = vsub.f32 %v144_v7, %v167_v10  ;;  %v5999_v25 = vpack.c.bf16 %v173_v16, %v170_v15  ;;  %v153_v51 = vld [vmem:[#allocation2 + $0x60] sm:$0xff]  ;;  %v154_v56 = vld [vmem:[#allocation2 + $0x68] sm:$0xff]  ;;  %v6042_v57 = vld [vmem:[#allocation2 + $0x70] sm:$0xff]  ;;  %p5780_p6 = scmp.ne.s32.totalorder %s3888_s19, %s5779_s21  ;;  %p5785_p8 = scmp.lt.s32.totalorder %s5779_s21, %s5779_s21 }
  0x74   :  { %133 = vperm.xlu0 %5288, %v128_v2   ;;  %v261_v23 = vand.u32 4294901760, %v5986_v14  ;;  %v6001_v26 = vsub.f32 %v145_v11, %v170_v15  ;;  %v268_v27 = vand.u32 4294901760, %v5990_v20  ;;  %v6005_v29 = vsub.f32 %v146_v12, %v173_v16  ;;  %4811 = vmatprep.subr.bf16.mxu1 %v5988_v19  ;;  %v156_v11 = vld [vmem:[#allocation2 + $0x78] sm:$0xff] }
  0x75   :  { %v275_v28 = vand.u32 4294901760, %v5994_v22  ;;  %v179_v30 = vand.u32 4294901760, %v148_v17  ;;  %v282_v33 = vand.u32 4294901760, %v5997_v24  ;;  %4813 = vmatpush3.bf16.msra.mxu1 %v5988_v19  ;;  %v6014_v35 = vsub.f32 %v147_v13, %v176_v18  ;;  %p5786_p9 = por %p5785_p8, %p5784_p7 }
  0x76   :  { %v262_v32 = vsub.f32 %v5986_v14, %v261_v23  ;;  %v289_v34 = vand.u32 4294901760, %v6001_v26  ;;  %v269_v37 = vsub.f32 %v5990_v20, %v268_v27  ;;  %v296_v39 = vand.u32 4294901760, %v6005_v29  ;;  %4815 = vmatprep.subr.bf16.mxu1 %v5992_v21 }
  0x77   :  { %v276_v38 = vsub.f32 %v5994_v22, %v275_v28  ;;  %v6023_v40 = vpack.c.bf16 %v179_v30, %v176_v18  ;;  %v283_v43 = vsub.f32 %v5997_v24, %v282_v33  ;;  %v303_v45 = vand.u32 4294901760, %v6014_v35  ;;  %p5787_p10 = pnand %p5786_p9, %p5780_p6 }
  0x78   :  { %v263_v42 = vand.u32 4294901760, %v262_v32  ;;  %v290_v44 = vsub.f32 %v6001_v26, %v289_v34  ;;  %v270_v46 = vand.u32 4294901760, %v269_v37  ;;  %v297_v48 = vsub.f32 %v6005_v29, %v296_v39 }
  0x79   :  { %v277_v47 = vand.u32 4294901760, %v276_v38  ;;  %v6036_v49 = vsub.f32 %v148_v17, %v179_v30  ;;  %v284_v52 = vand.u32 4294901760, %v283_v43  ;;  %v304_v54 = vsub.f32 %v6014_v35, %v303_v45  ;;  %4817 = vmatpush3.bf16.msra.mxu1 %v5992_v21 }
  0x7a   :  { %v291_v53 = vand.u32 4294901760, %v290_v44  ;;  %v182_v55 = vand.u32 4294901760, %v149_v31  ;;  %v4842_v58 = vpack.c.bf16 %v270_v46, %v263_v42  ;;  %v298_v59 = vand.u32 4294901760, %v297_v48  ;;  %4819 = vmatprep.subr.bf16.mxu1 %v5999_v25 }
  0x7b   :  { %v310_v60 = vand.u32 4294901760, %v6036_v49  ;;  %v185_v61 = vand.u32 4294901760, %v150_v36  ;;  %v4846_v62 = vpack.c.bf16 %v284_v52, %v277_v47  ;;  %v305_v63 = vand.u32 4294901760, %v304_v54 }
  0x7c   :  { %v6046_v1 = vsub.f32 %v149_v31, %v182_v55  ;;  %v188_v2 = vand.u32 4294901760, %v151_v41  ;;  %4843 = vmatprep.subr.bf16.mxu0 %v4842_v58  ;;  %v4850_v3 = vpack.c.bf16 %v298_v59, %v291_v53  ;;  %v191_v8 = vand.u32 4294901760, %v152_v50 }
  0x7d   :  { %v311_v4 = vsub.f32 %v6036_v49, %v310_v60  ;;  %v6051_v5 = vpack.c.bf16 %v185_v61, %v182_v55  ;;  %v6053_v6 = vsub.f32 %v150_v36, %v185_v61  ;;  %4845 = vmatpush3.bf16.msra.mxu0 %v4842_v58  ;;  %4821 = vmatpush3.bf16.msra.mxu1 %v5999_v25  ;;  %v194_v10 = vand.u32 4294901760, %v153_v51 }
  0x7e   :  { %v317_v7 = vand.u32 4294901760, %v6046_v1  ;;  %v6057_v9 = vsub.f32 %v151_v41, %v188_v2  ;;  %4847 = vmatprep.subr.bf16.mxu0 %v4846_v62  ;;  %4823 = vmatprep.subr.bf16.mxu1 %v6023_v40  ;;  %v197_v15 = vand.u32 4294901760, %v154_v56  ;;  %v200_v16 = vand.u32 4294901760, %v6042_v57 }
  0x7f   :  { %v312_v12 = vand.u32 4294901760, %v311_v4  ;;  %v324_v13 = vand.u32 4294901760, %v6053_v6  ;;  %v6066_v30 = vsub.f32 %v152_v50, %v191_v8  ;;  %v6071_v36 = vpack.c.bf16 %v191_v8, %v188_v2 }
  0x80   :  { %v318_v17 = vsub.f32 %v6046_v1, %v317_v7  ;;  %v331_v18 = vand.u32 4294901760, %v6057_v9  ;;  %v6073_v37 = vsub.f32 %v153_v51, %v194_v10  ;;  %v6080_v43 = vsub.f32 %v154_v56, %v197_v15 }
  0x81   :  { %v4854_v31 = vpack.c.bf16 %v312_v12, %v305_v63  ;;  %v325_v32 = vsub.f32 %v6053_v6, %v324_v13  ;;  %4849 = vmatpush3.bf16.msra.mxu0 %v4846_v62  ;;  %v338_v42 = vand.u32 4294901760, %v6066_v30  ;;  %4825 = vmatpush3.bf16.msra.mxu1 %v6023_v40  ;;  %v203_v47 = vand.u32 4294901760, %v156_v11 }
  0x82   :  { %v319_v38 = vand.u32 4294901760, %v318_v17  ;;  %v332_v41 = vsub.f32 %v6057_v9, %v331_v18  ;;  %4851 = vmatprep.subr.bf16.mxu0 %v4850_v3  ;;  %v345_v46 = vand.u32 4294901760, %v6073_v37  ;;  %4827 = vmatprep.subr.bf16.mxu1 %v6051_v5  ;;  %v6085_v48 = vsub.f32 %v6042_v57, %v200_v16 }
  0x83   :  { %v326_v44 = vand.u32 4294901760, %v325_v32  ;;  %v339_v50 = vsub.f32 %v6066_v30, %v338_v42  ;;  %v352_v51 = vand.u32 4294901760, %v6080_v43  ;;  %v6091_v54 = vpack.c.bf16 %v197_v15, %v194_v10 }
  0x84   :  { %v333_v53 = vand.u32 4294901760, %v332_v41  ;;  %v346_v55 = vsub.f32 %v6073_v37, %v345_v46  ;;  %v359_v56 = vand.u32 4294901760, %v6085_v48  ;;  %v6098_v57 = vsub.f32 %v156_v11, %v203_v47 }
  0x85   :  { %v4858_v52 = vpack.c.bf16 %v326_v44, %v319_v38  ;;  %4853 = vmatpush3.bf16.msra.mxu0 %v4850_v3  ;;  %4829 = vmatpush3.bf16.msra.mxu1 %v6051_v5  ;;  %v4878_v58 = vpack.c.bf16 %v5997_v24, %v5994_v22  ;;  %v340_v59 = vand.u32 4294901760, %v339_v50  ;;  %v353_v61 = vsub.f32 %v6080_v43, %v352_v51 }
  0x86   :  { %4855 = vmatprep.subr.bf16.mxu0 %v4854_v31  ;;  %4831 = vmatprep.subr.bf16.mxu1 %v6071_v36  ;;  %v4882_v62 = vpack.c.bf16 %v6005_v29, %v6001_v26  ;;  %v4886_v63 = vpack.c.bf16 %v6036_v49, %v6014_v35  ;;  %v366_v2 = vand.u32 4294901760, %v6098_v57  ;;  %v4890_v3 = vpack.c.bf16 %v6053_v6, %v6046_v1  ;;  %v6219_v35 = vld [vmem:[#allocation5] sm:$0xff]  ;;  %v6228_v1 = vld [vmem:[#allocation5 + $0x18] sm:$0xff] }
  0x87   :  { %v6115_v4 = vpack.c.bf16 %v6066_v30, %v6057_v9  ;;  %v347_v8 = vand.u32 4294901760, %v346_v55  ;;  %v6117_v10 = vpack.c.bf16 %v203_v47, %v200_v16  ;;  %v4898_v11 = vpack.c.bf16 %v6080_v43, %v6073_v37  ;;  %v6233_v9 = vld [vmem:[#allocation5 + $0x28] sm:$0xff]  ;;  %v6259_v43 = vld [vmem:[#allocation5 + $0x30] sm:$0xff] }
  0x88   :  { %v4862_v12 = vpack.c.bf16 %v340_v59, %v333_v53  ;;  %v354_v15 = vand.u32 4294901760, %v353_v61  ;;  %v360_v17 = vsub.f32 %v6085_v48, %v359_v56  ;;  %v367_v32 = vsub.f32 %v6098_v57, %v366_v2 }
  0x89   :  { %4857 = vmatpush3.bf16.msra.mxu0 %v4854_v31  ;;  %4833 = vmatpush3.bf16.msra.mxu1 %v6071_v36  ;;  %v4902_v16 = vpack.c.bf16 %v6098_v57, %v6085_v48  ;;  %v4874_v47 = vpack.c.bf16 %v5990_v20, %v5986_v14  ;;  %v4938_v50 = vpack.c.bf16 %v268_v27, %v261_v23  ;;  %v7366_v53 = vlaneseq  ;;  %v6278_v57 = vld [vmem:[#allocation5 + $0x48] sm:$0xff] }
  0x8a   :  { %4859 = vmatprep.subr.bf16.mxu0 %v4858_v52  ;;  %4835 = vmatprep.subr.bf16.mxu1 %v6091_v54  ;;  %v4866_v31 = vpack.c.bf16 %v354_v15, %v347_v8  ;;  %v361_v38 = vand.u32 4294901760, %v360_v17  ;;  %v368_v41 = vand.u32 4294901760, %v367_v32  ;;  %v5824_v61 = vmov 1.0   ;;  %v853_v32 = vld [vmem:[#allocation5 + $0x60] sm:$0xff] }
  0x8b   :  { %v6147_v55 = vand.u32 127, %v7366_v53  ;;  %v5825_v14 = vmov 0.0   ;;  %v4958_v26 = vpack.c.bf16 %v338_v42, %v331_v18  ;;  %v4962_v29 = vpack.c.bf16 %v352_v51, %v345_v46  ;;  %v6261_v46 = vld [vmem:[#allocation5 + $0x38] sm:$0xff] }
  0x8c   :  { %v4870_v44 = vpack.c.bf16 %v368_v41, %v361_v38  ;;  %v865_v49 = vand.u32 4294901760, %v6219_v35  ;;  %v880_v37 = vand.u32 4294901760, %v6233_v9  ;;  %v883_v48 = vand.u32 4294901760, %v6259_v43 }
  0x8d   :  { %4861 = vmatpush3.bf16.msra.mxu0 %v4858_v52  ;;  %4837 = vmatpush3.bf16.msra.mxu1 %v6091_v54  ;;  %v6144_v52 = vpack.c.bf16 %v282_v33, %v275_v28  ;;  %v886_v51 = vand.u32 4294901760, %v6261_v46 }
  0x8e   :  { %4863 = vmatprep.subr.bf16.mxu0 %v4862_v12  ;;  %4839 = vmatprep.subr.bf16.mxu1 %v6117_v10  ;;  %v6327_v38 = vsub.f32 %v6219_v35, %v865_v49 }
  0x91   :  { %4865 = vmatpush3.bf16.msra.mxu0 %v4862_v12  ;;  %4841 = vmatpush3.bf16.msra.mxu1 %v6117_v10 }
  0x92   :  { %4867 = vmatprep.subr.bf16.mxu0 %v4866_v31 }
  0x95   :  { %4869 = vmatpush3.bf16.msra.mxu0 %v4866_v31 }
  0x96   :  { %4871 = vmatprep.subr.bf16.mxu0 %v4870_v44 }
  0x99   :  { %4873 = vmatpush3.bf16.msra.mxu0 %v4870_v44  ;;  %v855_v44 = vld [vmem:[#allocation5 + $0x70] sm:$0xff] }
  0x9a   :  { %4875 = vmatprep.subr.bf16.mxu0 %v4874_v47 }
  0xef   :  { %v6149_v59 = vpop.permute.xlu0 %130 }
  0xf0   :  { %vm135_vm0 = vcmp.eq.s32.totalorder %v6147_v55, %v6149_v59 }
  0xf1   :  { %4457 = vmatprep.mubr.msk.f32.mxu0 %vm135_vm0, %v5824_v61  ;;  %v3902_v20 = vsel %vm135_vm0, 1.0, %v5825_v14 }
  0xf2   :  { %v239_v22 = vsub.f32 %v3902_v20, %v3902_v20 }
  0xf3   :  { %v6160_v23 = vpop.permute.xlu0 %133 }
  0xf4   :  { %vm136_vm1 = vcmp.eq.s32.totalorder %v6147_v55, %v6160_v23  ;;  %v240_v24 = vand.u32 4294901760, %v239_v22  ;;  %v968_v55 = vand.u32 4294901760, %v6327_v38 }
  0xf5   :  { %v3903_v27 = vsel %vm136_vm1, 1.0, %v5825_v14  ;;  %4458 = vmatmul.mubr.msk.f32.vlgmr.msra.gmra.mrb[0].mxu0 %vm136_vm1, %v5824_v61 }
  0xf6   :  { %v249_v28 = vsub.f32 %v3903_v27, %v3903_v27  ;;  %4877 = vmatpush3.bf16.msra.mxu0 %v4874_v47  ;;  %4492 = vmatprep.mubr.f32.mxu0 %v239_v22  ;;  %v241_v33 = vsub.f32 %v239_v22, %v240_v24  ;;  %v856_v47 = vld [vmem:[#allocation5 + $0x78] sm:$0xff]  ;;  %v969_v14 = vsub.f32 %v6327_v38, %v968_v55 }
  0xf7   :  { %4879 = vmatprep.subr.bf16.mxu0 %v4878_v58 }
  0xf8   :  { %v242_v8 = vand.u32 4294901760, %v241_v33  ;;  %v250_v12 = vand.u32 4294901760, %v249_v28 }
  0xfa   :  { %4881 = vmatpush3.bf16.msra.mxu0 %v4878_v58  ;;  %4422 = vmatprep.mubr.f32.mxu1 %v242_v8  ;;  %v251_v15 = vsub.f32 %v249_v28, %v250_v12  ;;  %v4946_v58 = vpack.c.bf16 %v296_v39, %v289_v34  ;;  %v4966_v34 = vpack.c.bf16 %v366_v2, %v359_v56  ;;  %v6221_v39 = vld [vmem:[#allocation5 + $0x8] sm:$0xff]  ;;  %v6276_v56 = vld [vmem:[#allocation5 + $0x40] sm:$0xff] }
  0xfb   :  { %4883 = vmatprep.subr.bf16.mxu0 %v4882_v62  ;;  %v6287_v2 = vpack.c.bf16 %v886_v51, %v883_v48 }
  0xfc   :  { %v252_v17 = vand.u32 4294901760, %v251_v15 }
  0xfe   :  { %4885 = vmatpush3.bf16.msra.mxu0 %v4882_v62  ;;  %4423 = vmatmul.mubr.f32.vlgmr.msra.gmra.mrb[0].mxu1 %v252_v17  ;;  %v4950_v62 = vpack.c.bf16 %v310_v60, %v303_v45  ;;  %v6223_v45 = vld [vmem:[#allocation5 + $0x10] sm:$0xff]  ;;  %v868_v60 = vand.u32 4294901760, %v6221_v39 }
  0xff   :  { %4887 = vmatprep.subr.bf16.mxu0 %v4886_v63  ;;  %v871_v6 = vand.u32 4294901760, %v6223_v45 }
 0x100   :  { %v6244_v18 = vpack.c.bf16 %v868_v60, %v865_v49  ;;  %v6332_v41 = vsub.f32 %v6221_v39, %v868_v60 }
 0x102   :  { %4889 = vmatpush3.bf16.msra.mxu0 %v4886_v63  ;;  %v4954_v63 = vpack.c.bf16 %v324_v13, %v317_v7  ;;  %v6231_v7 = vld [vmem:[#allocation5 + $0x20] sm:$0xff]  ;;  %v874_v13 = vand.u32 4294901760, %v6228_v1  ;;  %5003 = vmatprep.subr.bf16.mxu1 %v6244_v18  ;;  %v975_v59 = vand.u32 4294901760, %v6332_v41 }
 0x103   :  { %4891 = vmatprep.subr.bf16.mxu0 %v4890_v3  ;;  %v877_v30 = vand.u32 4294901760, %v6231_v7  ;;  %5005 = vmatpush3.bf16.msra.mxu1 %v6244_v18 }
 0x104   :  { %v6257_v42 = vpack.c.bf16 %v874_v13, %v871_v6  ;;  %v976_v20 = vsub.f32 %v6332_v41, %v975_v59 }
 0x106   :  { %4893 = vmatpush3.bf16.msra.mxu0 %v4890_v3  ;;  %5007 = vmatprep.subr.bf16.mxu1 %v6257_v42  ;;  %v889_v3 = vand.u32 4294901760, %v6276_v56  ;;  %v977_v27 = vand.u32 4294901760, %v976_v20 }
 0x107   :  { %4895 = vmatprep.subr.bf16.mxu0 %v6115_v4  ;;  %5009 = vmatpush3.bf16.msra.mxu1 %v6257_v42 }
 0x10a   :  { %4897 = vmatpush3.bf16.msra.mxu0 %v6115_v4 }
 0x10b   :  { %4899 = vmatprep.subr.bf16.mxu0 %v4898_v11 }
 0x10e   :  { %4901 = vmatpush3.bf16.msra.mxu0 %v4898_v11 }
 0x10f   :  { %4903 = vmatprep.subr.bf16.mxu0 %v4902_v16 }
 0x112   :  { %4905 = vmatpush3.bf16.msra.mxu0 %v4902_v16  ;;  %v854_v16 = vld [vmem:[#allocation5 + $0x68] sm:$0xff] }
 0x113   :  { %4907 = vmatprep.subr.bf16.mxu0 %v5988_v19  ;;  %v904_v31 = vand.u32 4294901760, %v854_v16 }
 0x115   :  { %4493 = vmatmul.mubr.f32.vlgmr.msra.gmra.mrb[0].mxu0 %v249_v28 }
 0x116   :  { %4909 = vmatpush3.bf16.msra.mxu0 %v5988_v19  ;;  %4527 = vmatprep.mubr.f32.mxu0 %v240_v24  ;;  %v970_v24 = vand.u32 4294901760, %v969_v14  ;;  %v6395_v14 = vpack.c.bf16 %v6332_v41, %v6327_v38 }
 0x117   :  { %4911 = vmatprep.subr.bf16.mxu0 %v5992_v21 }
 0x118   :  { %v6348_v28 = vpack.c.bf16 %v977_v27, %v970_v24 }
 0x11a   :  { %4913 = vmatpush3.bf16.msra.mxu0 %v5992_v21 }
 0x11b   :  { %4915 = vmatprep.subr.bf16.mxu0 %v5999_v25 }
 0x11e   :  { %4917 = vmatpush3.bf16.msra.mxu0 %v5999_v25 }
 0x11f   :  { %4919 = vmatprep.subr.bf16.mxu0 %v6023_v40 }
 0x122   :  { %4921 = vmatpush3.bf16.msra.mxu0 %v6023_v40 }
 0x123   :  { %4923 = vmatprep.subr.bf16.mxu0 %v6051_v5 }
 0x126   :  { %4925 = vmatpush3.bf16.msra.mxu0 %v6051_v5 }
 0x127   :  { %4927 = vmatprep.subr.bf16.mxu0 %v6071_v36 }
 0x12a   :  { %4929 = vmatpush3.bf16.msra.mxu0 %v6071_v36 }
 0x12b   :  { %4931 = vmatprep.subr.bf16.mxu0 %v6091_v54 }
 0x12e   :  { %4933 = vmatpush3.bf16.msra.mxu0 %v6091_v54 }
 0x12f   :  { %4935 = vmatprep.subr.bf16.mxu0 %v6117_v10 }
 0x132   :  { %4937 = vmatpush3.bf16.msra.mxu0 %v6117_v10 }
 0x133   :  { %4939 = vmatprep.subr.bf16.mxu0 %v4938_v50 }
 0x135   :  { %4528 = vmatmul.mubr.f32.vlgmr.msra.gmra.mrb[0].mxu0 %v250_v12 }
 0x136   :  { %4941 = vmatpush3.bf16.msra.mxu0 %v4938_v50  ;;  %4562 = vmatprep.mubr.msk.f32.mxu0 %vm135_vm0, %v5824_v61  ;;  %v907_v50 = vand.u32 4294901760, %v855_v44 }
 0x137   :  { %4943 = vmatprep.subr.bf16.mxu0 %v6144_v52 }
 0x138   :  { %v6374_v60 = vsub.f32 %v855_v44, %v907_v50 }
 0x13a   :  { %4945 = vmatpush3.bf16.msra.mxu0 %v6144_v52  ;;  %v910_v52 = vand.u32 4294901760, %v856_v47 }
 0x13b   :  { %4947 = vmatprep.subr.bf16.mxu0 %v4946_v58 }
 0x13e   :  { %4949 = vmatpush3.bf16.msra.mxu0 %v4946_v58 }
 0x13f   :  { %4951 = vmatprep.subr.bf16.mxu0 %v4950_v62 }
 0x142   :  { %4953 = vmatpush3.bf16.msra.mxu0 %v4950_v62 }
 0x143   :  { %4955 = vmatprep.subr.bf16.mxu0 %v4954_v63 }
 0x146   :  { %4957 = vmatpush3.bf16.msra.mxu0 %v4954_v63  ;;  %v6365_v63 = vsub.f32 %v854_v16, %v904_v31 }
 0x147   :  { %4959 = vmatprep.subr.bf16.mxu0 %v4958_v26 }
 0x148   :  { %v7370_v35 = vand.u32 4294901760, %v6365_v63 }
 0x14a   :  { %4961 = vmatpush3.bf16.msra.mxu0 %v4958_v26 }
 0x14b   :  { %4963 = vmatprep.subr.bf16.mxu0 %v4962_v29 }
 0x14e   :  { %4965 = vmatpush3.bf16.msra.mxu0 %v4962_v29 }
 0x14f   :  { %4967 = vmatprep.subr.bf16.mxu0 %v4966_v34 }
 0x152   :  { %4969 = vmatpush3.bf16.msra.mxu0 %v4966_v34 }
 0x153   :  { %4971 = vmatprep.subr.bf16.mxu0 %v5988_v19 }
 0x155   :  { %4563 = vmatmul.mubr.msk.f32.vlgmr.msra.gmra.mrb[0].mxu0 %vm136_vm1, %v5824_v61 }
 0x156   :  { %4973 = vmatpush3.bf16.msra.mxu0 %v5988_v19  ;;  %4597 = vmatprep.mubr.msk.f32.mxu0 %vm135_vm0, %v5824_v61  ;;  %v6271_v19 = vpack.c.bf16 %v880_v37, %v877_v30 }
 0x157   :  { %4975 = vmatprep.subr.bf16.mxu0 %v5992_v21 }
 0x158   :  { %5011 = vmatprep.subr.bf16.mxu1 %v6271_v19 }
 0x159   :  { %5013 = vmatpush3.bf16.msra.mxu1 %v6271_v19 }
 0x15a   :  { %4977 = vmatpush3.bf16.msra.mxu0 %v5992_v21  ;;  %v892_v21 = vand.u32 4294901760, %v6278_v57  ;;  %5015 = vmatprep.subr.bf16.mxu1 %v6287_v2 }
 0x15b   :  { %4979 = vmatprep.subr.bf16.mxu0 %v5999_v25 }
 0x15c   :  { %v6299_v4 = vpack.c.bf16 %v892_v21, %v889_v3 }
 0x15d   :  { %5017 = vmatpush3.bf16.msra.mxu1 %v6287_v2 }
 0x15e   :  { %4981 = vmatpush3.bf16.msra.mxu0 %v5999_v25  ;;  %5019 = vmatprep.subr.bf16.mxu1 %v6299_v4  ;;  %v851_v25 = vld [vmem:[#allocation5 + $0x50] sm:$0xff] }
 0x15f   :  { %4983 = vmatprep.subr.bf16.mxu0 %v6023_v40 }
 0x161   :  { %5021 = vmatpush3.bf16.msra.mxu1 %v6299_v4 }
 0x162   :  { %4985 = vmatpush3.bf16.msra.mxu0 %v6023_v40  ;;  %v852_v40 = vld [vmem:[#allocation5 + $0x58] sm:$0xff] }
 0x163   :  { %4987 = vmatprep.subr.bf16.mxu0 %v6051_v5  ;;  %v898_v11 = vand.u32 4294901760, %v852_v40 }
 0x165   :  { %v6353_v8 = vsub.f32 %v852_v40, %v898_v11  ;;  %v1060_v40 = vsub.f32 %v6365_v63, %v7370_v35 }
 0x166   :  { %4989 = vmatpush3.bf16.msra.mxu0 %v6051_v5  ;;  %v895_v5 = vand.u32 4294901760, %v851_v25 }
 0x167   :  { %4991 = vmatprep.subr.bf16.mxu0 %v6071_v36  ;;  %v7372_v15 = vand.u32 4294901760, %v6353_v8  ;;  %v1061_v16 = vand.u32 4294901760, %v1060_v40  ;;  %v6424_v40 = vsub.f32 %v6231_v7, %v877_v30 }
 0x168   :  { %v6351_v33 = vsub.f32 %v851_v25, %v895_v5  ;;  %v6376_v25 = vsub.f32 %v856_v47, %v910_v52 }
 0x169   :  { %v1046_v58 = vsub.f32 %v6353_v8, %v7372_v15 }
 0x16a   :  { %4993 = vmatpush3.bf16.msra.mxu0 %v6071_v36  ;;  %v6318_v36 = vpack.c.bf16 %v898_v11, %v895_v5  ;;  %v7373_v12 = vand.u32 4294901760, %v6351_v33  ;;  %v7369_v11 = vand.u32 4294901760, %v6374_v60  ;;  %v6399_v20 = vpack.c.bf16 %v6353_v8, %v6351_v33 }
 0x16b   :  { %4995 = vmatprep.subr.bf16.mxu0 %v6091_v54  ;;  %v1047_v29 = vand.u32 4294901760, %v1046_v58  ;;  %v6407_v27 = vpack.c.bf16 %v6376_v25, %v6374_v60  ;;  %v6417_v58 = vsub.f32 %v6228_v1, %v874_v13 }
 0x16c   :  { %5023 = vmatprep.subr.bf16.mxu1 %v6318_v36  ;;  %v1039_v17 = vsub.f32 %v6351_v33, %v7373_v12 }
 0x16d   :  { %5025 = vmatpush3.bf16.msra.mxu1 %v6318_v36 }
 0x16e   :  { %4997 = vmatpush3.bf16.msra.mxu0 %v6091_v54  ;;  %v901_v54 = vand.u32 4294901760, %v853_v32  ;;  %v1040_v26 = vand.u32 4294901760, %v1039_v17  ;;  %v6412_v17 = vsub.f32 %v6223_v45, %v871_v6  ;;  %v6429_v45 = vsub.f32 %v6233_v9, %v880_v37 }
 0x16f   :  { %4999 = vmatprep.subr.bf16.mxu0 %v6117_v10  ;;  %v996_v9 = vand.u32 4294901760, %v6424_v40 }
 0x170   :  { %v6363_v62 = vsub.f32 %v853_v32, %v901_v54  ;;  %v6369_v39 = vpack.c.bf16 %v1047_v29, %v1040_v26  ;;  %v7368_v32 = vand.u32 4294901760, %v6376_v25  ;;  %v982_v26 = vand.u32 4294901760, %v6412_v17 }
 0x171   :  { %v989_v29 = vand.u32 4294901760, %v6417_v58  ;;  %v1003_v37 = vand.u32 4294901760, %v6429_v45 }
 0x172   :  { %5001 = vmatpush3.bf16.msra.mxu0 %v6117_v10  ;;  %v6322_v10 = vpack.c.bf16 %v904_v31, %v901_v54  ;;  %v7371_v34 = vand.u32 4294901760, %v6363_v62  ;;  %v1067_v54 = vsub.f32 %v6374_v60, %v7369_v11  ;;  %v1074_v31 = vsub.f32 %v6376_v25, %v7368_v32 }
 0x173   :  { %v6403_v24 = vpack.c.bf16 %v6365_v63, %v6363_v62  ;;  %v990_v7 = vsub.f32 %v6417_v58, %v989_v29  ;;  %v5138_v38 = vpack.c.bf16 %v1003_v37, %v996_v9 }
 0x174   :  { %5027 = vmatprep.subr.bf16.mxu1 %v6322_v10  ;;  %v1053_v49 = vsub.f32 %v6363_v62, %v7371_v34  ;;  %v1068_v47 = vand.u32 4294901760, %v1067_v54  ;;  %v6461_v54 = vsub.f32 %v6261_v46, %v886_v51 }
 0x175   :  { %4598 = vmatmul.mubr.msk.f32.vlgmr.msra.gmra.mrb[0].mxu0 %vm136_vm1, %v5824_v61  ;;  %5029 = vmatpush3.bf16.msra.mxu1 %v6322_v10  ;;  %v6338_v61 = vpack.c.bf16 %v910_v52, %v907_v50  ;;  %v1075_v50 = vand.u32 4294901760, %v1074_v31 }
 0x176   :  { %1808 = vmatprep.mubr.bf16.mxu0 %v7367_v0  ;;  %v1054_v5 = vand.u32 4294901760, %v1053_v49  ;;  %v1017_v53 = vand.u32 4294901760, %v6461_v54 }
 0x177   :  { %5031 = vmatprep.subr.bf16.mxu1 %v6338_v61  ;;  %v6391_v52 = vpack.c.bf16 %v1075_v50, %v1068_v47 }
 0x178   :  { %v6389_v44 = vpack.c.bf16 %v1061_v16, %v1054_v5  ;;  %v983_v16 = vsub.f32 %v6412_v17, %v982_v26 }
 0x179   :  { %5033 = vmatpush3.bf16.msra.mxu1 %v6338_v61 }
 0x17a   :  { %5035 = vmatprep.subr.bf16.mxu1 %v6348_v28  ;;  %v984_v50 = vand.u32 4294901760, %v983_v16  ;;  %v6483_v16 = vsub.f32 %v6276_v56, %v889_v3  ;;  %v1018_v56 = vsub.f32 %v6461_v54, %v1017_v53 }
 0x1d1   :  { %v4424_v22 = vpop.f32.mrb[0].mxu1 }
 0x1d2   :  { %v244_v23 = vpop.f32.mrb[1].mxu1 }
 0x248   :  { %v4599_v49 = vpop.f32.mrb[0].mxu0 }
 0x249   :  { %v6431_v6 = vadd.f32 %v4599_v49, %v4424_v22  ;;  %v831_v5 = vpop.f32.mrb[1].mxu0  ;;  %v6452_v22 = vsub.f32 %v6259_v43, %v883_v48  ;;  %v991_v49 = vand.u32 4294901760, %v990_v7  ;;  %v997_v48 = vsub.f32 %v6424_v40, %v996_v9  ;;  %v5316_v9 = vld [vmem:[#allocation7 + $0x88] ss:$16 sps:$4 sm:$0xff]  }
 0x24a   :  { %v6433_v1 = vadd.f32 %v831_v5, %v244_v23  ;;  %v1004_v5 = vsub.f32 %v6429_v45, %v1003_v37  ;;  %v6488_v7 = vsub.f32 %v6278_v57, %v892_v21  ;;  %v1024_v57 = vand.u32 4294901760, %v6483_v16  ;;  %v5321_v37 = vld [vmem:[#allocation7 + $0xa4] ss:$16 sps:$4 sm:$0xff]  }
 0x24b   :  { %v6436_v13 = vand.u32 4294901760, %v6431_v6  ;;  %v1010_v46 = vand.u32 4294901760, %v6452_v22  ;;  %v5038_v32 = vpack.c.bf16 %v991_v49, %v984_v50  ;;  %v998_v35 = vand.u32 4294901760, %v997_v48 }
 0x24c   :  { %v6445_v30 = vand.u32 4294901760, %v6433_v1  ;;  %v1005_v34 = vand.u32 4294901760, %v1004_v5  ;;  %v1031_v3 = vand.u32 4294901760, %v6488_v7  ;;  %v1019_v50 = vand.u32 4294901760, %v1018_v56  ;;  %v5334_v56 = vld [vmem:[#allocation7 + $0xe8] ss:$16 sps:$4 sm:$0xff]  }
 0x24d   :  { %v6456_v23 = vsub.f32 %v6431_v6, %v6436_v13  ;;  %v1011_v15 = vsub.f32 %v6452_v22, %v1010_v46  ;;  %v1025_v49 = vsub.f32 %v6483_v16, %v1024_v57  ;;  %v5142_v41 = vpack.c.bf16 %v1017_v53, %v1010_v46  ;;  %v5328_v46 = vld [vmem:[#allocation7 + $0xc8] ss:$16 sps:$4 sm:$0xff]  }
 0x24e   :  { %v6465_v31 = vsub.f32 %v6433_v1, %v6445_v30  ;;  %v1032_v48 = vsub.f32 %v6488_v7, %v1031_v3  ;;  %v7553_v53 = vand.u32 4294901760, %v6365_v63  ;;  %v5301_v63 = vld [vmem:[#allocation7 + $0x40] ss:$16 sps:$4 sm:$0xff]  }
 0x24f   :  { %v957_v47 = vand.u32 4294901760, %v6456_v23  ;;  %v1012_v21 = vand.u32 4294901760, %v1011_v15  ;;  %v5070_v15 = vpack.c.bf16 %v6417_v58, %v6412_v17  ;;  %v7555_v17 = vand.u32 4294901760, %v6376_v25  ;;  %v5309_v25 = vld [vmem:[#allocation7 + $0x64] ss:$16 sps:$4 sm:$0xff]  }
 0x250   :  { %v947_v43 = vand.u32 4294901760, %v6465_v31  ;;  %v1033_v5 = vand.u32 4294901760, %v1032_v48 }
 0x251   :  { %v958_v51 = vsub.f32 %v6456_v23, %v957_v47 }
 0x252   :  { %v948_v0 = vsub.f32 %v6465_v31, %v947_v43 }
 0x253   :  { %v959_v12 = vand.u32 4294901760, %v958_v51  ;;  %v5333_v51 = vld [vmem:[#allocation7 + $0xe4] ss:$16 sps:$4 sm:$0xff]  }
 0x254   :  { %v949_v11 = vand.u32 4294901760, %v948_v0  ;;  %v5042_v0 = vpack.c.bf16 %v1005_v34, %v998_v35  ;;  %v5074_v34 = vpack.c.bf16 %v6429_v45, %v6424_v40  ;;  %v5078_v35 = vpack.c.bf16 %v6461_v54, %v6452_v22  ;;  %v5310_v40 = vld [vmem:[#allocation7 + $0x68] ss:$16 sps:$4 sm:$0xff]   ;;  %v5315_v45 = vld [vmem:[#allocation7 + $0x84] ss:$16 sps:$4 sm:$0xff]  }
 0x255   :  { %v5324_v22 = vld [vmem:[#allocation7 + $0xac] ss:$16 sps:$4 sm:$0xff]   ;;  %v5322_v54 = vld [vmem:[#allocation7 + $0xa8] ss:$16 sps:$4 sm:$0xff]  }
 0x256   :  { %4632 = vmatprep.mubr.f32.mxu1 %v949_v11  ;;  %v5046_v11 = vpack.c.bf16 %v1019_v50, %v1012_v21 }
 0x257   :  { %4633 = vmatmul.mubr.f32.vlgmr.msra.gmra.mrb[2].mxu1 %v959_v12  ;;  %v1026_v12 = vand.u32 4294901760, %v1025_v49 }
 0x258   :  { %5037 = vmatpush3.bf16.msra.mxu1 %v6348_v28  ;;  %4667 = vmatprep.mubr.f32.mxu1 %v6445_v30 }
 0x259   :  { %5039 = vmatprep.subr.bf16.mxu1 %v5038_v32  ;;  %v5050_v28 = vpack.c.bf16 %v1033_v5, %v1026_v12 }
 0x25c   :  { %5041 = vmatpush3.bf16.msra.mxu1 %v5038_v32  ;;  %v5130_v32 = vpack.c.bf16 %v975_v59, %v968_v55  ;;  %v5146_v55 = vpack.c.bf16 %v1031_v3, %v1024_v57  ;;  %v7550_v59 = vand.u32 4294901760, %v6351_v33  ;;  %v5300_v33 = vld [vmem:[#allocation7 + $0x2c] ss:$16 sps:$4 sm:$0xff]   ;;  %v6607_v57 = vld [vmem:[#allocation8 + $0x4] ss:$16 sps:$4 sm:$0xff]  }
 0x25d   :  { %5043 = vmatprep.subr.bf16.mxu1 %v5042_v0  ;;  %v6609_v3 = vld [vmem:[#allocation8 + $0xc] ss:$16 sps:$4 sm:$0xff]  }
 0x260   :  { %5045 = vmatpush3.bf16.msra.mxu1 %v5042_v0  ;;  %v3910_v0 = vld [vmem:[%s7356_s3] ss:$0 sm:$0xff] }
 0x261   :  { %5047 = vmatprep.subr.bf16.mxu1 %v5046_v11 }
 0x264   :  { %5049 = vmatpush3.bf16.msra.mxu1 %v5046_v11 }
 0x265   :  { %5051 = vmatprep.subr.bf16.mxu1 %v5050_v28 }
 0x268   :  { %5053 = vmatpush3.bf16.msra.mxu1 %v5050_v28 }
 0x269   :  { %5055 = vmatprep.subr.bf16.mxu1 %v6369_v39 }
 0x26c   :  { %5057 = vmatpush3.bf16.msra.mxu1 %v6369_v39  ;;  %v5082_v39 = vpack.c.bf16 %v6488_v7, %v6483_v16  ;;  %v5336_v16 = vld [vmem:[#allocation7 + $0xec] ss:$16 sps:$4 sm:$0xff]   ;;  %v5331_v7 = vld [vmem:[#allocation7 + $0xe0] ss:$16 sps:$4 sm:$0xff]  }
 0x26d   :  { %5059 = vmatprep.subr.bf16.mxu1 %v6389_v44 }
 0x270   :  { %5061 = vmatpush3.bf16.msra.mxu1 %v6389_v44  ;;  %v5134_v44 = vpack.c.bf16 %v989_v29, %v982_v26  ;;  %v5312_v26 = vld [vmem:[#allocation7 + $0x6c] ss:$16 sps:$4 sm:$0xff]   ;;  %v5307_v29 = vld [vmem:[#allocation7 + $0x60] ss:$16 sps:$4 sm:$0xff]  }
 0x271   :  { %5063 = vmatprep.subr.bf16.mxu1 %v6391_v52 }
 0x274   :  { %5065 = vmatpush3.bf16.msra.mxu1 %v6391_v52  ;;  %v7551_v52 = vand.u32 4294901760, %v6353_v8  ;;  %v5295_v8 = vld [vmem:[#allocation7 + $0x20] ss:$16 sps:$4 sm:$0xff]  }
 0x275   :  { %5067 = vmatprep.subr.bf16.mxu1 %v6395_v14 }
 0x277   :  { %4668 = vmatmul.mubr.f32.vlgmr.msra.gmra.mrb[2].mxu1 %v6436_v13 }
 0x278   :  { %5069 = vmatpush3.bf16.msra.mxu1 %v6395_v14  ;;  %4702 = vmatprep.mubr.f32.mxu1 %v6465_v31  ;;  %v5150_v14 = vpack.c.bf16 %v7551_v52, %v7550_v59  ;;  %v5327_v31 = vld [vmem:[#allocation7 + $0xc4] ss:$16 sps:$4 sm:$0xff]   ;;  %v6618_v59 = vld [vmem:[#allocation8] ss:$16 sps:$4 sm:$0xff]   ;;  %v6620_v52 = vld [vmem:[#allocation8 + $0x8] ss:$16 sps:$4 sm:$0xff]  }
 0x279   :  { %5071 = vmatprep.subr.bf16.mxu1 %v5070_v15 }
 0x27c   :  { %5073 = vmatpush3.bf16.msra.mxu1 %v5070_v15 }
 0x27d   :  { %5075 = vmatprep.subr.bf16.mxu1 %v5074_v34 }
 0x280   :  { %5077 = vmatpush3.bf16.msra.mxu1 %v5074_v34 }
 0x281   :  { %5079 = vmatprep.subr.bf16.mxu1 %v5078_v35 }
 0x284   :  { %5081 = vmatpush3.bf16.msra.mxu1 %v5078_v35 }
 0x285   :  { %5083 = vmatprep.subr.bf16.mxu1 %v5082_v39 }
 0x288   :  { %5085 = vmatpush3.bf16.msra.mxu1 %v5082_v39 }
 0x289   :  { %5087 = vmatprep.subr.bf16.mxu1 %v6399_v20 }
 0x28c   :  { %5089 = vmatpush3.bf16.msra.mxu1 %v6399_v20  ;;  %v7552_v20 = vand.u32 4294901760, %v6363_v62  ;;  %v5306_v62 = vld [vmem:[#allocation7 + $0x4c] ss:$16 sps:$4 sm:$0xff]  }
 0x28d   :  { %5091 = vmatprep.subr.bf16.mxu1 %v6403_v24 }
 0x290   :  { %5093 = vmatpush3.bf16.msra.mxu1 %v6403_v24  ;;  %v5154_v24 = vpack.c.bf16 %v7553_v53, %v7552_v20  ;;  %v6622_v20 = vld [vmem:[#allocation8 + $0x24] ss:$16 sps:$4 sm:$0xff]   ;;  %v6624_v53 = vld [vmem:[#allocation8 + $0x2c] ss:$16 sps:$4 sm:$0xff]  }
 0x291   :  { %5095 = vmatprep.subr.bf16.mxu1 %v6407_v27 }
 0x294   :  { %5097 = vmatpush3.bf16.msra.mxu1 %v6407_v27  ;;  %v7554_v27 = vand.u32 4294901760, %v6374_v60  ;;  %v5304_v60 = vld [vmem:[#allocation7 + $0x48] ss:$16 sps:$4 sm:$0xff]  }
 0x295   :  { %5099 = vmatprep.subr.bf16.mxu1 %v6244_v18 }
 0x296   :  { %v5158_v58 = vpack.c.bf16 %v7555_v17, %v7554_v27  ;;  %v6636_v27 = vld [vmem:[#allocation8 + $0x4c] ss:$16 sps:$4 sm:$0xff]   ;;  %v6640_v17 = vld [vmem:[#allocation8 + $0x40] ss:$16 sps:$4 sm:$0xff]  }
 0x297   :  { %4703 = vmatmul.mubr.f32.vlgmr.msra.gmra.mrb[2].mxu1 %v6456_v23  ;;  %v5319_v23 = vld [vmem:[#allocation7 + $0xa0] ss:$16 sps:$4 sm:$0xff]   ;;  %7557 = vst [vmem:[#allocation19_spill] sm:$0xff] %v6640_v17 }
 0x298   :  { %5101 = vmatpush3.bf16.msra.mxu1 %v6244_v18  ;;  %4737 = vmatprep.mubr.f32.mxu1 %v947_v43  ;;  %v5325_v43 = vld [vmem:[#allocation7 + $0xc0] ss:$16 sps:$4 sm:$0xff]  }
 0x299   :  { %5103 = vmatprep.subr.bf16.mxu1 %v6257_v42 }
 0x29c   :  { %5105 = vmatpush3.bf16.msra.mxu1 %v6257_v42 }
 0x29d   :  { %5107 = vmatprep.subr.bf16.mxu1 %v6271_v19 }
 0x2a0   :  { %5109 = vmatpush3.bf16.msra.mxu1 %v6271_v19 }
 0x2a1   :  { %5111 = vmatprep.subr.bf16.mxu1 %v6287_v2 }
 0x2a4   :  { %5113 = vmatpush3.bf16.msra.mxu1 %v6287_v2 }
 0x2a5   :  { %5115 = vmatprep.subr.bf16.mxu1 %v6299_v4 }
 0x2a8   :  { %5117 = vmatpush3.bf16.msra.mxu1 %v6299_v4 }
 0x2a9   :  { %5119 = vmatprep.subr.bf16.mxu1 %v6318_v36 }
 0x2ac   :  { %5121 = vmatpush3.bf16.msra.mxu1 %v6318_v36 }
 0x2ad   :  { %5123 = vmatprep.subr.bf16.mxu1 %v6322_v10 }
 0x2b0   :  { %5125 = vmatpush3.bf16.msra.mxu1 %v6322_v10 }
 0x2b1   :  { %5127 = vmatprep.subr.bf16.mxu1 %v6338_v61 }
 0x2b4   :  { %5129 = vmatpush3.bf16.msra.mxu1 %v6338_v61 }
 0x2b5   :  { %5131 = vmatprep.subr.bf16.mxu1 %v5130_v32 }
 0x2b7   :  { %4738 = vmatmul.mubr.f32.vlgmr.msra.gmra.mrb[2].mxu1 %v957_v47  ;;  %v5330_v47 = vld [vmem:[#allocation7 + $0xcc] ss:$16 sps:$4 sm:$0xff]  }
 0x2b8   :  { %5133 = vmatpush3.bf16.msra.mxu1 %v5130_v32  ;;  %4772 = vmatprep.mubr.f32.mxu1 %v6445_v30 }
 0x2b9   :  { %5135 = vmatprep.subr.bf16.mxu1 %v5134_v44 }
 0x2bc   :  { %5137 = vmatpush3.bf16.msra.mxu1 %v5134_v44 }
 0x2bd   :  { %5139 = vmatprep.subr.bf16.mxu1 %v5138_v38 }
 0x2c0   :  { %5141 = vmatpush3.bf16.msra.mxu1 %v5138_v38 }
 0x2c1   :  { %5143 = vmatprep.subr.bf16.mxu1 %v5142_v41 }
 0x2c4   :  { %5145 = vmatpush3.bf16.msra.mxu1 %v5142_v41 }
 0x2c5   :  { %5147 = vmatprep.subr.bf16.mxu1 %v5146_v55 }
 0x2c8   :  { %5149 = vmatpush3.bf16.msra.mxu1 %v5146_v55 }
 0x2c9   :  { %5151 = vmatprep.subr.bf16.mxu1 %v5150_v14 }
 0x2cc   :  { %5153 = vmatpush3.bf16.msra.mxu1 %v5150_v14 }
 0x2cd   :  { %5155 = vmatprep.subr.bf16.mxu1 %v5154_v24 }
 0x2d0   :  { %5157 = vmatpush3.bf16.msra.mxu1 %v5154_v24  ;;  %v6628_v24 = vld [vmem:[#allocation8 + $0x20] ss:$16 sps:$4 sm:$0xff]  }
 0x2d1   :  { %5159 = vmatprep.subr.bf16.mxu1 %v5158_v58 }
 0x2d4   :  { %5161 = vmatpush3.bf16.msra.mxu1 %v5158_v58  ;;  %v6642_v58 = vld [vmem:[#allocation8 + $0x48] ss:$16 sps:$4 sm:$0xff]  }
 0x2d5   :  { %5163 = vmatprep.subr.bf16.mxu1 %v6244_v18  ;;  %7558 = vst [vmem:[#allocation20_spill] sm:$0xff] %v6642_v58 }
 0x2d7   :  { %4773 = vmatmul.mubr.f32.vlgmr.msra.gmra.mrb[2].mxu1 %v6436_v13 }
 0x2d8   :  { %5165 = vmatpush3.bf16.msra.mxu1 %v6244_v18  ;;  %4807 = vmatprep.mubr.f32.mxu1 %v6445_v30  ;;  %v7556_v18 = vmov 0   ;;  %v5313_v30 = vld [vmem:[#allocation7 + $0x80] ss:$16 sps:$4 sm:$0xff]  }
 0x2d9   :  { %5167 = vmatprep.subr.bf16.mxu1 %v6257_v42 }
 0x2dc   :  { %5169 = vmatpush3.bf16.msra.mxu1 %v6257_v42  ;;  %v5291_v42 = vld [vmem:[#allocation7 + $0x4] ss:$16 sps:$4 sm:$0xff]  }
 0x2dd   :  { %5171 = vmatprep.subr.bf16.mxu1 %v6271_v19  ;;  %1776 = vmatprep.subr.bf16.mxu0 %v5291_v42  ;;  %v6648_v42 = vld [vmem:[#allocation8 + $0x6c] ss:$16 sps:$4 sm:$0xff]  }
 0x2de   :  { %7560 = vst [vmem:[#allocation22_spill] sm:$0xff] %v6648_v42 }
 0x2e0   :  { %5173 = vmatpush3.bf16.msra.mxu1 %v6271_v19  ;;  %v5294_v19 = vld [vmem:[#allocation7 + $0xc] ss:$16 sps:$4 sm:$0xff]  }
 0x2e1   :  { %5175 = vmatprep.subr.bf16.mxu1 %v6287_v2 }
 0x2e4   :  { %5177 = vmatpush3.bf16.msra.mxu1 %v6287_v2  ;;  %v5289_v2 = vld [vmem:[#allocation7] ss:$16 sps:$4 sm:$0xff]  }
 0x2e5   :  { %5179 = vmatprep.subr.bf16.mxu1 %v6299_v4  ;;  %1777 = vmatpush1.bf16.msra.mxu0 %v5289_v2  ;;  %v6654_v2 = vld [vmem:[#allocation8 + $0x68] ss:$16 sps:$4 sm:$0xff]  }
 0x2e6   :  { %7562 = vst [vmem:[#allocation24_spill] sm:$0xff] %v6654_v2 }
 0x2e8   :  { %5181 = vmatpush3.bf16.msra.mxu1 %v6299_v4  ;;  %v5292_v4 = vld [vmem:[#allocation7 + $0x8] ss:$16 sps:$4 sm:$0xff]  }
 0x2e9   :  { %5183 = vmatprep.subr.bf16.mxu1 %v6318_v36 }
 0x2ec   :  { %5185 = vmatpush3.bf16.msra.mxu1 %v6318_v36  ;;  %v5297_v36 = vld [vmem:[#allocation7 + $0x24] ss:$16 sps:$4 sm:$0xff]  }
 0x2ed   :  { %5187 = vmatprep.subr.bf16.mxu1 %v6322_v10  ;;  %1778 = vmatprep.subr.bf16.mxu0 %v5297_v36  ;;  %v6660_v36 = vld [vmem:[#allocation8 + $0x8c] ss:$16 sps:$4 sm:$0xff]  }
 0x2ee   :  { %1779 = vmatpush1.bf16.msra.mxu0 %v5295_v8  ;;  %7564 = vst [vmem:[#allocation26_spill] sm:$0xff] %v6660_v36  ;;  %v6666_v8 = vld [vmem:[#allocation8 + $0x88] ss:$16 sps:$4 sm:$0xff]  }
 0x2ef   :  { %7566 = vst [vmem:[#allocation28_spill] sm:$0xff] %v6666_v8 }
 0x2f0   :  { %5189 = vmatpush3.bf16.msra.mxu1 %v6322_v10  ;;  %v5298_v10 = vld [vmem:[#allocation7 + $0x28] ss:$16 sps:$4 sm:$0xff]  }
 0x2f1   :  { %5191 = vmatprep.subr.bf16.mxu1 %v6338_v61 }
 0x2f4   :  { %5193 = vmatpush3.bf16.msra.mxu1 %v6338_v61  ;;  %v5303_v61 = vld [vmem:[#allocation7 + $0x44] ss:$16 sps:$4 sm:$0xff]  }
 0x2f5   :  { %1819 = vmatprep.subr.bf16.mxu1 %v5294_v19  ;;  %1780 = vmatprep.subr.bf16.mxu0 %v5303_v61  ;;  %v6652_v19 = vld [vmem:[#allocation8 + $0x60] ss:$16 sps:$4 sm:$0xff]   ;;  %v6672_v61 = vld [vmem:[#allocation8 + $0xac] ss:$16 sps:$4 sm:$0xff]  }
 0x2f6   :  { %1781 = vmatpush1.bf16.msra.mxu0 %v5301_v63  ;;  %7561 = vst [vmem:[#allocation23_spill] sm:$0xff] %v6652_v19  ;;  %7568 = vst [vmem:[#allocation30_spill] sm:$0xff] %v6672_v61  ;;  %v6678_v63 = vld [vmem:[#allocation8 + $0xa8] ss:$16 sps:$4 sm:$0xff]  }
 0x2f7   :  { %4808 = vmatmul.mubr.f32.vlgmr.msra.gmra.mrb[2].mxu1 %v6436_v13  ;;  %1782 = vmatprep.subr.bf16.mxu0 %v5309_v25  ;;  %v5318_v13 = vld [vmem:[#allocation7 + $0x8c] ss:$16 sps:$4 sm:$0xff]   ;;  %7570 = vst [vmem:[#allocation32_spill] sm:$0xff] %v6678_v63 }
 0x2f8   :  { %1851 = vmatprep.mubr.bf16.mxu1 %v7556_v18  ;;  %1820 = vmatpush1.bf16.msra.mxu1 %v5292_v4  ;;  %v6646_v18 = vld [vmem:[#allocation8 + $0x64] ss:$16 sps:$4 sm:$0xff]   ;;  %v6684_v25 = vld [vmem:[#allocation8 + $0xcc] ss:$16 sps:$4 sm:$0xff]  }
 0x2f9   :  { %1821 = vmatprep.subr.bf16.mxu1 %v5300_v33  ;;  %7559 = vst [vmem:[#allocation21_spill] sm:$0xff] %v6646_v18  ;;  %v6658_v4 = vld [vmem:[#allocation8 + $0x84] ss:$16 sps:$4 sm:$0xff]   ;;  %v6664_v33 = vld [vmem:[#allocation8 + $0x80] ss:$16 sps:$4 sm:$0xff]   ;;  %7572 = vst [vmem:[#allocation34_spill] sm:$0xff] %v6684_v25 }
 0x2fa   :  { %1783 = vmatpush1.bf16.msra.mxu0 %v5307_v29  ;;  %7563 = vst [vmem:[#allocation25_spill] sm:$0xff] %v6658_v4  ;;  %7565 = vst [vmem:[#allocation27_spill] sm:$0xff] %v6664_v33  ;;  %v6690_v29 = vld [vmem:[#allocation8 + $0xc8] ss:$16 sps:$4 sm:$0xff]  }
 0x2fb   :  { %1784 = vmatprep.subr.bf16.mxu0 %v5315_v45  ;;  %7574 = vst [vmem:[#allocation36_spill] sm:$0xff] %v6690_v29  ;;  %v6696_v45 = vld [vmem:[#allocation8 + $0xec] ss:$16 sps:$4 sm:$0xff]  }
 0x2fc   :  { %1822 = vmatpush1.bf16.msra.mxu1 %v5298_v10  ;;  %v6670_v10 = vld [vmem:[#allocation8 + $0xa4] ss:$16 sps:$4 sm:$0xff]   ;;  %7576 = vst [vmem:[#allocation38_spill] sm:$0xff] %v6696_v45 }
 0x2fd   :  { %1823 = vmatprep.subr.bf16.mxu1 %v5306_v62  ;;  %7567 = vst [vmem:[#allocation29_spill] sm:$0xff] %v6670_v10  ;;  %v6676_v62 = vld [vmem:[#allocation8 + $0xa0] ss:$16 sps:$4 sm:$0xff]  }
 0x2fe   :  { %1785 = vmatpush1.bf16.msra.mxu0 %v5313_v30  ;;  %7569 = vst [vmem:[#allocation31_spill] sm:$0xff] %v6676_v62  ;;  %v6702_v30 = vld [vmem:[#allocation8 + $0xe8] ss:$16 sps:$4 sm:$0xff]  }
 0x2ff   :  { %1786 = vmatprep.subr.bf16.mxu0 %v5321_v37  ;;  %7578 = vst [vmem:[#allocation40_spill] sm:$0xff] %v6702_v30  ;;  %v6708_v37 = vld [vmem:[#allocation8 + $0x10c] ss:$16 sps:$4 sm:$0xff]  }
 0x300   :  { %1824 = vmatpush1.bf16.msra.mxu1 %v5304_v60  ;;  %v6682_v60 = vld [vmem:[#allocation8 + $0xc4] ss:$16 sps:$4 sm:$0xff]   ;;  %7580 = vst [vmem:[#allocation42_spill] sm:$0xff] %v6708_v37 }
 0x301   :  { %1825 = vmatprep.subr.bf16.mxu1 %v5312_v26  ;;  %7571 = vst [vmem:[#allocation33_spill] sm:$0xff] %v6682_v60  ;;  %v6688_v26 = vld [vmem:[#allocation8 + $0xc0] ss:$16 sps:$4 sm:$0xff]  }
 0x302   :  { %1787 = vmatpush1.bf16.msra.mxu0 %v5319_v23  ;;  %7573 = vst [vmem:[#allocation35_spill] sm:$0xff] %v6688_v26  ;;  %v6714_v23 = vld [vmem:[#allocation8 + $0x108] ss:$16 sps:$4 sm:$0xff]  }
 0x303   :  { %1788 = vmatprep.subr.bf16.mxu0 %v5327_v31  ;;  %7582 = vst [vmem:[#allocation44_spill] sm:$0xff] %v6714_v23  ;;  %v6720_v31 = vld [vmem:[#allocation8 + $0x12c] ss:$16 sps:$4 sm:$0xff]  }
 0x304   :  { %1826 = vmatpush1.bf16.msra.mxu1 %v5310_v40  ;;  %v6694_v40 = vld [vmem:[#allocation8 + $0xe4] ss:$16 sps:$4 sm:$0xff]   ;;  %7584 = vst [vmem:[#allocation46_spill] sm:$0xff] %v6720_v31 }
 0x305   :  { %1827 = vmatprep.subr.bf16.mxu1 %v5318_v13  ;;  %7575 = vst [vmem:[#allocation37_spill] sm:$0xff] %v6694_v40  ;;  %v6700_v13 = vld [vmem:[#allocation8 + $0xe0] ss:$16 sps:$4 sm:$0xff]  }
 0x306   :  { %1789 = vmatpush1.bf16.msra.mxu0 %v5325_v43  ;;  %7577 = vst [vmem:[#allocation39_spill] sm:$0xff] %v6700_v13  ;;  %v6726_v43 = vld [vmem:[#allocation8 + $0x128] ss:$16 sps:$4 sm:$0xff]  }
 0x307   :  { %1790 = vmatprep.subr.bf16.mxu0 %v5333_v51  ;;  %7586 = vst [vmem:[#allocation48_spill] sm:$0xff] %v6726_v43  ;;  %v6732_v51 = vld [vmem:[#allocation8 + $0x14c] ss:$16 sps:$4 sm:$0xff]  }
 0x308   :  { %1828 = vmatpush1.bf16.msra.mxu1 %v5316_v9  ;;  %v6706_v9 = vld [vmem:[#allocation8 + $0x104] ss:$16 sps:$4 sm:$0xff]   ;;  %7588 = vst [vmem:[#allocation50_spill] sm:$0xff] %v6732_v51 }
 0x309   :  { %1829 = vmatprep.subr.bf16.mxu1 %v5324_v22  ;;  %7579 = vst [vmem:[#allocation41_spill] sm:$0xff] %v6706_v9  ;;  %v6712_v22 = vld [vmem:[#allocation8 + $0x100] ss:$16 sps:$4 sm:$0xff]  }
 0x30a   :  { %1791 = vmatpush1.bf16.msra.mxu0 %v5331_v7  ;;  %7581 = vst [vmem:[#allocation43_spill] sm:$0xff] %v6712_v22  ;;  %v6738_v7 = vld [vmem:[#allocation8 + $0x148] ss:$16 sps:$4 sm:$0xff]  }
 0x30b   :  { %2664 = vmatprep.subr.bf16.mxu0 %v6607_v57  ;;  %7590 = vst [vmem:[#allocation52_spill] sm:$0xff] %v6738_v7 }
 0x30c   :  { %1830 = vmatpush1.bf16.msra.mxu1 %v5322_v54  ;;  %v6718_v54 = vld [vmem:[#allocation8 + $0x124] ss:$16 sps:$4 sm:$0xff]  }
 0x30d   :  { %1831 = vmatprep.subr.bf16.mxu1 %v5330_v47  ;;  %7583 = vst [vmem:[#allocation45_spill] sm:$0xff] %v6718_v54  ;;  %v6724_v47 = vld [vmem:[#allocation8 + $0x120] ss:$16 sps:$4 sm:$0xff]  }
 0x30e   :  { %7585 = vst [vmem:[#allocation47_spill] sm:$0xff] %v6724_v47 }
 0x310   :  { %1832 = vmatpush1.bf16.msra.mxu1 %v5328_v46  ;;  %v6730_v46 = vld [vmem:[#allocation8 + $0x144] ss:$16 sps:$4 sm:$0xff]  }
 0x311   :  { %1833 = vmatprep.subr.bf16.mxu1 %v5336_v16  ;;  %7587 = vst [vmem:[#allocation49_spill] sm:$0xff] %v6730_v46  ;;  %v6736_v16 = vld [vmem:[#allocation8 + $0x140] ss:$16 sps:$4 sm:$0xff]  }
 0x312   :  { %7589 = vst [vmem:[#allocation51_spill] sm:$0xff] %v6736_v16 }
 0x314   :  { %1834 = vmatpush1.bf16.msra.mxu1 %v5334_v56  ;;  %v6742_v56 = vld [vmem:[#allocation8 + $0x164] ss:$16 sps:$4 sm:$0xff]  }
 0x315   :  { %2750 = vmatprep.subr.bf16.mxu1 %v6609_v3  ;;  %7591 = vst [vmem:[#allocation53_spill] sm:$0xff] %v6742_v56 }
 0x3ca   :  { %v4809_v21 = vpop.f32.mrb[2].mxu1 }
 0x3cb   :  { %v5196_v50 = vadd.f32 %v4809_v21, %v3910_v0  ;;  %v1538_v49 = vpop.f32.mrb[3].mxu1  ;;  %v6748_v21 = vld [vmem:[#allocation8 + $0x160] ss:$16 sps:$4 sm:$0xff]  }
 0x3cc   :  { %v5197_v48 = vadd.f32 %v3910_v0, %v1538_v49  ;;  %v6744_v0 = vld [vmem:[#allocation8 + $0x16c] ss:$16 sps:$4 sm:$0xff]   ;;  %7593 = vst [vmem:[#allocation55_spill] sm:$0xff] %v6748_v21  ;;  %v6754_v49 = vld [vmem:[#allocation8 + $0x184] ss:$16 sps:$4 sm:$0xff]  }
 0x3cd   :  { %7592 = vst [vmem:[#allocation54_spill] sm:$0xff] %v6744_v0  ;;  %7595 = vst [vmem:[#allocation57_spill] sm:$0xff] %v6754_v49 }
 0x3ce   :  { %v1548_v11 = vmax.f32 %v5197_v48, %v5196_v50 }
 0x3d0   :  { %v1549_v12 = vsub.f32 %v5197_v48, %v1548_v11  ;;  %v1550_v5 = vsub.f32 %v5196_v50, %v1548_v11  ;;  %v6750_v50 = vld [vmem:[#allocation8 + $0x168] ss:$16 sps:$4 sm:$0xff]   ;;  %v6756_v48 = vld [vmem:[#allocation8 + $0x18c] ss:$16 sps:$4 sm:$0xff]   ;;  %v6760_v11 = vld [vmem:[#allocation8 + $0x180] ss:$16 sps:$4 sm:$0xff]  }
 0x3d1   :  { %7594 = vst [vmem:[#allocation56_spill] sm:$0xff] %v6750_v50  ;;  %7596 = vst [vmem:[#allocation58_spill] sm:$0xff] %v6756_v48 }
 0x3d2   :  { %v1551_v28 = vmul.f32 1.442695, %v1549_v12  ;;  %v1553_v15 = vmul.f32 1.442695, %v1550_v5  ;;  %7597 = vst [vmem:[#allocation59_spill] sm:$0xff] %v6760_v11 }
 0x3d3   :  { %v6762_v12 = vld [vmem:[#allocation8 + $0x188] ss:$16 sps:$4 sm:$0xff]   ;;  %v6766_v5 = vld [vmem:[#allocation8 + $0x1a4] ss:$16 sps:$4 sm:$0xff]  }
 0x3d4   :  { %5641 = vpow2.f32 %v1551_v28  ;;  %7598 = vst [vmem:[#allocation60_spill] sm:$0xff] %v6762_v12  ;;  %7599 = vst [vmem:[#allocation61_spill] sm:$0xff] %v6766_v5  ;;  %v6768_v28 = vld [vmem:[#allocation8 + $0x1ac] ss:$16 sps:$4 sm:$0xff]  }
 0x3d5   :  { %5643 = vpow2.f32 %v1553_v15  ;;  %7600 = vst [vmem:[#allocation62_spill] sm:$0xff] %v6768_v28  ;;  %v6772_v15 = vld [vmem:[#allocation8 + $0x1a0] ss:$16 sps:$4 sm:$0xff]  }
 0x3d6   :  { %7601 = vst [vmem:[#allocation63_spill] sm:$0xff] %v6772_v15 }
 0x3de   :  { %v5642_v34 = vpop.eup %5641 }
 0x3df   :  { %v5644_v35 = vpop.eup %5643 }
 0x3e0   :  { %v1555_v39 = vadd.f32 %v5644_v35, %v5642_v34 }
 0x3e2   :  { %5645 = vrcp.f32 %v1555_v39 }
 0x3ec   :  { %v5646_v32 = vpop.eup %5645 }
 0x3ed   :  { %v1557_v44 = vmul.f32 %v5646_v32, %v5642_v34  ;;  %v1558_v38 = vmul.f32 %v5646_v32, %v5644_v35  ;;  %v6774_v34 = vld [vmem:[#allocation8 + $0x1a8] ss:$16 sps:$4 sm:$0xff]   ;;  %v7603_v35 = vlaneseq  ;;  %v6783_v32 = vld [vmem:[#allocation8 + $0x1c4] ss:$16 sps:$4 sm:$0xff]  }
 0x3ee   :  { %7602 = vst [vmem:[#allocation64_spill] sm:$0xff] %v6774_v34  ;;  %7605 = vst [vmem:[#allocation66_spill] sm:$0xff] %v6783_v32 }
 0x3ef   :  { %v1559_v41 = vmul.f32 %v6433_v1, %v1557_v44  ;;  %v1560_v55 = vmul.f32 %v6431_v6, %v1558_v38  ;;  %v6630_v1 = vld [vmem:[#allocation8 + $0x28] ss:$16 sps:$4 sm:$0xff]   ;;  %v6634_v6 = vld [vmem:[#allocation8 + $0x44] ss:$16 sps:$4 sm:$0xff]   ;;  %v6781_v39 = vshrl.u32 %v7603_v35, 7 }
 0x3f0   :  { %v6785_v44 = vld [vmem:[#allocation8 + $0x1cc] ss:$16 sps:$4 sm:$0xff]   ;;  %v6787_v38 = vld [vmem:[#allocation8 + $0x1c0] ss:$16 sps:$4 sm:$0xff]  }
 0x3f1   :  { %v1561_v14 = vpack.c.bf16 %v1560_v55, %v1559_v41  ;;  %7604 = vst [vmem:[#allocation65_spill] sm:$0xff] %v6781_v39  ;;  %7606 = vst [vmem:[#allocation67_spill] sm:$0xff] %v6785_v44  ;;  %v6789_v41 = vld [vmem:[#allocation8 + $0x1c8] ss:$16 sps:$4 sm:$0xff]   ;;  %v1606_v55 = vsub.s32 2, %v6781_v39 }
 0x3f2   :  { %7607 = vst [vmem:[#allocation68_spill] sm:$0xff] %v6787_v38  ;;  %7608 = vst [vmem:[#allocation69_spill] sm:$0xff] %v6789_v41 }
 0x3f3   :  { %1809 = vmatmul.mubr.bf16.vlgmr.msra.gmra.mrb[4].mxu0 %v1561_v14  ;;  %1852 = vmatmul.mubr.bf16.vlgmr.msra.gmra.mrb[4].mxu1 %v1561_v14  ;;  %v6797_v14 = vld [vmem:[%s7360_s7] sm:$0xf] }
 0x3f4   :  { %2665 = vmatpush1.bf16.msra.mxu0 %v6618_v59  ;;  %2751 = vmatpush1.bf16.msra.mxu1 %v6620_v52  ;;  %7609 = vst [vmem:[#allocation70_spill] sm:$0xff] %v6797_v14  ;;  %v6802_v35 = vrot.slane %v6797_v14, %v1606_v55  ;;  %v6818_v14 = vld [vmem:[#allocation8 + $0x20c] ss:$16 sps:$4 sm:$0xff]  }
 0x3f5   :  { %2666 = vmatprep.subr.bf16.mxu0 %v6622_v20  ;;  %2752 = vmatprep.subr.bf16.mxu1 %v6624_v53  ;;  %7616 = vst [vmem:[#allocation77_spill] sm:$0xff] %v6818_v14 }
 0x3f6   :  { %7610 = vst [vmem:[#allocation71_spill] sm:$0xff] %v6802_v35  ;;  %v6823_v35 = vsub.s32 0, %v6781_v39 }
 0x3f8   :  { %2667 = vmatpush1.bf16.msra.mxu0 %v6628_v24  ;;  %2753 = vmatpush1.bf16.msra.mxu1 %v6630_v1  ;;  %7617 = vst [vmem:[#allocation78_spill] sm:$0xff] %v6823_v35 }
 0x3f9   :  { %2668 = vmatprep.subr.bf16.mxu0 %v6634_v6  ;;  %2754 = vmatprep.subr.bf16.mxu1 %v6636_v27 }
 0x3fc   :  { %2669 = vmatpush1.bf16.msra.mxu0 %v6640_v17  ;;  %2755 = vmatpush1.bf16.msra.mxu1 %v6642_v58 }
 0x3fd   :  { %2670 = vmatprep.subr.bf16.mxu0 %v6646_v18  ;;  %2756 = vmatprep.subr.bf16.mxu1 %v6648_v42 }
 0x400   :  { %2671 = vmatpush1.bf16.msra.mxu0 %v6652_v19  ;;  %2757 = vmatpush1.bf16.msra.mxu1 %v6654_v2 }
 0x401   :  { %2672 = vmatprep.subr.bf16.mxu0 %v6658_v4  ;;  %2758 = vmatprep.subr.bf16.mxu1 %v6660_v36 }
 0x404   :  { %2673 = vmatpush1.bf16.msra.mxu0 %v6664_v33  ;;  %2759 = vmatpush1.bf16.msra.mxu1 %v6666_v8 }
 0x405   :  { %2674 = vmatprep.subr.bf16.mxu0 %v6670_v10  ;;  %2760 = vmatprep.subr.bf16.mxu1 %v6672_v61 }
 0x408   :  { %2675 = vmatpush1.bf16.msra.mxu0 %v6676_v62  ;;  %2761 = vmatpush1.bf16.msra.mxu1 %v6678_v63 }
 0x409   :  { %2676 = vmatprep.subr.bf16.mxu0 %v6682_v60  ;;  %2762 = vmatprep.subr.bf16.mxu1 %v6684_v25 }
 0x40c   :  { %2677 = vmatpush1.bf16.msra.mxu0 %v6688_v26  ;;  %2763 = vmatpush1.bf16.msra.mxu1 %v6690_v29 }
 0x40d   :  { %2678 = vmatprep.subr.bf16.mxu0 %v6694_v40  ;;  %2764 = vmatprep.subr.bf16.mxu1 %v6696_v45 }
 0x410   :  { %2679 = vmatpush1.bf16.msra.mxu0 %v6700_v13  ;;  %2765 = vmatpush1.bf16.msra.mxu1 %v6702_v30 }
 0x411   :  { %2680 = vmatprep.subr.bf16.mxu0 %v6706_v9  ;;  %2766 = vmatprep.subr.bf16.mxu1 %v6708_v37 }
 0x414   :  { %2681 = vmatpush1.bf16.msra.mxu0 %v6712_v22  ;;  %2767 = vmatpush1.bf16.msra.mxu1 %v6714_v23  ;;  %v6838_v23 = vld [vmem:[#allocation8 + $0x200] ss:$16 sps:$4 sm:$0xff]  }
 0x415   :  { %2682 = vmatprep.subr.bf16.mxu0 %v6718_v54  ;;  %2768 = vmatprep.subr.bf16.mxu1 %v6720_v31 }
 0x418   :  { %2683 = vmatpush1.bf16.msra.mxu0 %v6724_v47  ;;  %2769 = vmatpush1.bf16.msra.mxu1 %v6726_v43 }
 0x419   :  { %2684 = vmatprep.subr.bf16.mxu0 %v6730_v46  ;;  %2770 = vmatprep.subr.bf16.mxu1 %v6732_v51 }
 0x41c   :  { %2685 = vmatpush1.bf16.msra.mxu0 %v6736_v16  ;;  %2771 = vmatpush1.bf16.msra.mxu1 %v6738_v7 }
 0x41d   :  { %2686 = vmatprep.subr.bf16.mxu0 %v6742_v56  ;;  %2772 = vmatprep.subr.bf16.mxu1 %v6744_v0 }
 0x420   :  { %2687 = vmatpush1.bf16.msra.mxu0 %v6748_v21  ;;  %2773 = vmatpush1.bf16.msra.mxu1 %v6750_v50 }
 0x421   :  { %2688 = vmatprep.subr.bf16.mxu0 %v6754_v49  ;;  %2774 = vmatprep.subr.bf16.mxu1 %v6756_v48 }
 0x424   :  { %2689 = vmatpush1.bf16.msra.mxu0 %v6760_v11  ;;  %2775 = vmatpush1.bf16.msra.mxu1 %v6762_v12 }
 0x425   :  { %2690 = vmatprep.subr.bf16.mxu0 %v6766_v5  ;;  %2776 = vmatprep.subr.bf16.mxu1 %v6768_v28  ;;  %v6808_v28 = vld [vmem:[#allocation8 + $0x1e0] ss:$16 sps:$4 sm:$0xff]  }
 0x426   :  { %7613 = vst [vmem:[#allocation74_spill] sm:$0xff] %v6808_v28 }
 0x428   :  { %2691 = vmatpush1.bf16.msra.mxu0 %v6772_v15  ;;  %2777 = vmatpush1.bf16.msra.mxu1 %v6774_v34  ;;  %v6804_v34 = vld [vmem:[#allocation8 + $0x1e4] ss:$16 sps:$4 sm:$0xff]   ;;  %v6806_v15 = vld [vmem:[#allocation8 + $0x1ec] ss:$16 sps:$4 sm:$0xff]  }
 0x429   :  { %2692 = vmatprep.subr.bf16.mxu0 %v6783_v32  ;;  %2778 = vmatprep.subr.bf16.mxu1 %v6785_v44  ;;  %7611 = vst [vmem:[#allocation72_spill] sm:$0xff] %v6804_v34  ;;  %7612 = vst [vmem:[#allocation73_spill] sm:$0xff] %v6806_v15  ;;  %v6810_v32 = vld [vmem:[#allocation8 + $0x1e8] ss:$16 sps:$4 sm:$0xff]  }
 0x42a   :  { %7614 = vst [vmem:[#allocation75_spill] sm:$0xff] %v6810_v32 }
 0x42c   :  { %2693 = vmatpush1.bf16.msra.mxu0 %v6787_v38  ;;  %2779 = vmatpush1.bf16.msra.mxu1 %v6789_v41  ;;  %v6816_v41 = vld [vmem:[#allocation8 + $0x204] ss:$16 sps:$4 sm:$0xff]  }
 0x42d   :  { %2694 = vmatprep.subr.bf16.mxu0 %v6804_v34  ;;  %2780 = vmatprep.subr.bf16.mxu1 %v6806_v15  ;;  %7615 = vst [vmem:[#allocation76_spill] sm:$0xff] %v6816_v41  ;;  %v1594_v34 = vld [vmem:[%s7358_s5] sm:$0xf]  ;;  %v6829_v15 = vsub.s32 1, %v6781_v39 }
 0x42e   :  { %v1607_v38 = vrot.slane %v1594_v34, %v1606_v55 }
 0x42f   :  { %7618 = vst [vmem:[#allocation79_spill] sm:$0xff] %v6829_v15  ;;  %v1603_v44 = vrot.slane %v1594_v34, %v6829_v15 }
 0x430   :  { %2695 = vmatpush1.bf16.msra.mxu0 %v6808_v28  ;;  %2781 = vmatpush1.bf16.msra.mxu1 %v6810_v32  ;;  %v7436_v32 = vsub.s32 3, %v6781_v39  ;;  %v1599_v28 = vrot.slane %v1594_v34, %v6823_v35 }
 0x431   :  { %2707 = vmatprep.subr.bf16.mxu0 %v6816_v41  ;;  %2793 = vmatprep.subr.bf16.mxu1 %v6818_v14 }
 0x432   :  { %v1611_v14 = vrot.slane %v1594_v34, %v7436_v32 }
 0x4c6   :  { %v1810_v41 = vpop.f32.mrb[4].mxu0  ;;  %v1853_v5 = vpop.f32.mrb[4].mxu1 }
 0x4c7   :  { %v1811_v12 = vadd.f32 %v1810_v41, %v1599_v28  ;;  %v1854_v11 = vadd.f32 %v1853_v5, %v1607_v38  ;;  %v1812_v48 = vpop.f32.mrb[5].mxu0  ;;  %v1855_v49 = vpop.f32.mrb[5].mxu1 }
 0x4c8   :  { %v1813_v50 = vadd.f32 %v1812_v48, %v1603_v44  ;;  %v1856_v21 = vadd.f32 %v1855_v49, %v1611_v14  ;;  %v1814_v0 = vpop.f32.mrb[6].mxu0  ;;  %v1857_v56 = vpop.f32.mrb[6].mxu1 }
 0x4c9   :  { %v1815_v7 = vadd.f32 %v1814_v0, %v1599_v28  ;;  %v1858_v16 = vadd.f32 %v1857_v56, %v1607_v38  ;;  %v1816_v51 = vpop.f32.mrb[7].mxu0  ;;  %v1859_v35 = vpop.f32.mrb[7].mxu1  ;;  %v1862_v15 = vmax.f32 %v1811_v12, 0.0  ;;  %v1864_v43 = vmax.f32 %v1854_v11, 0.0  ;;  %v6840_v56 = vld [vmem:[#allocation8 + $0x208] ss:$16 sps:$4 sm:$0xff]  }
 0x4ca   :  { %v1817_v55 = vadd.f32 %v1816_v51, %v1603_v44  ;;  %v1860_v46 = vadd.f32 %v1859_v35, %v1611_v14  ;;  %v1863_v32 = vmax.f32 %v1813_v50, 0.0  ;;  %v1865_v47 = vmax.f32 %v1856_v21, 0.0  ;;  %v6842_v51 = vld [vmem:[#allocation8 + $0x224] ss:$16 sps:$4 sm:$0xff]   ;;  %v6844_v0 = vld [vmem:[#allocation8 + $0x22c] ss:$16 sps:$4 sm:$0xff]  }
 0x4cb   :  { %v1866_v39 = vmax.f32 %v1815_v7, 0.0  ;;  %v1868_v34 = vmax.f32 %v1858_v16, 0.0  ;;  %v6854_v16 = vld [vmem:[#allocation8 + $0x24c] ss:$16 sps:$4 sm:$0xff]   ;;  %v6862_v7 = vld [vmem:[#allocation8 + $0x248] ss:$16 sps:$4 sm:$0xff]  }
 0x4cc   :  { %v1867_v41 = vmax.f32 %v1817_v55, 0.0  ;;  %v1869_v5 = vmax.f32 %v1860_v46, 0.0  ;;  %v6850_v46 = vld [vmem:[#allocation8 + $0x228] ss:$16 sps:$4 sm:$0xff]   ;;  %v6866_v21 = vld [vmem:[#allocation8 + $0x264] ss:$16 sps:$4 sm:$0xff]  }
 0x4cd   :  { %v1870_v31 = vpack.c.bf16 %v1866_v39, %v1862_v15  ;;  %v6836_v54 = vpack.c.bf16 %v1868_v34, %v1864_v43  ;;  %v6848_v43 = vld [vmem:[#allocation8 + $0x220] ss:$16 sps:$4 sm:$0xff]   ;;  %v6868_v50 = vld [vmem:[#allocation8 + $0x26c] ss:$16 sps:$4 sm:$0xff]   ;;  %v6874_v12 = vld [vmem:[#allocation8 + $0x268] ss:$16 sps:$4 sm:$0xff]  }
 0x4ce   :  { %v1871_v49 = vpack.c.bf16 %v1867_v41, %v1863_v32  ;;  %v1873_v48 = vpack.c.bf16 %v1869_v5, %v1865_v47  ;;  %v6852_v47 = vld [vmem:[#allocation8 + $0x244] ss:$16 sps:$4 sm:$0xff]   ;;  %v6872_v11 = vld [vmem:[#allocation8 + $0x260] ss:$16 sps:$4 sm:$0xff]   ;;  %v6880_v15 = vld [vmem:[#allocation8 + $0x28c] ss:$16 sps:$4 sm:$0xff]  }
 0x4cf   :  { %v6878_v28 = vld [vmem:[#allocation8 + $0x284] ss:$16 sps:$4 sm:$0xff]   ;;  %v6884_v39 = vld [vmem:[#allocation8 + $0x280] ss:$16 sps:$4 sm:$0xff]   ;;  %v6886_v32 = vld [vmem:[#allocation8 + $0x288] ss:$16 sps:$4 sm:$0xff]  }
 0x4d0   :  { %2696 = vmatprep.mubr.bf16.mxu0 %v1871_v49  ;;  %2782 = vmatprep.mubr.bf16.mxu1 %v1871_v49  ;;  %v6890_v44 = vld [vmem:[#allocation8 + $0x2a4] ss:$16 sps:$4 sm:$0xff]   ;;  %v6892_v38 = vld [vmem:[#allocation8 + $0x2ac] ss:$16 sps:$4 sm:$0xff]   ;;  %v6896_v14 = vld [vmem:[#allocation8 + $0x2a0] ss:$16 sps:$4 sm:$0xff]  }
 0x4d1   :  { %2697 = vmatmul.mubr.bf16.vlgmr.msra.gmra.mrb[8].mxu0 %v1870_v31  ;;  %2783 = vmatmul.mubr.bf16.vlgmr.msra.gmra.mrb[8].mxu1 %v1870_v31  ;;  %v6860_v31 = vld [vmem:[#allocation8 + $0x240] ss:$16 sps:$4 sm:$0xff]   ;;  %7619 = vst [vmem:[#allocation80_spill] sm:$0xff] %v6892_v38  ;;  %7620 = vst [vmem:[#allocation81_spill] sm:$0xff] %v6896_v14  ;;  %v6898_v35 = vld [vmem:[#allocation8 + $0x2a8] ss:$16 sps:$4 sm:$0xff]  }
 0x4d2   :  { %2708 = vmatpush1.bf16.msra.mxu0 %v6838_v23  ;;  %2794 = vmatpush1.bf16.msra.mxu1 %v6840_v56  ;;  %7621 = vst [vmem:[#allocation82_spill] sm:$0xff] %v6898_v35  ;;  %v6902_v55 = vld [vmem:[#allocation8 + $0x2c4] ss:$16 sps:$4 sm:$0xff]   ;;  %v6904_v34 = vld [vmem:[#allocation8 + $0x2cc] ss:$16 sps:$4 sm:$0xff]  }
 0x4d3   :  { %2739 = vmatprep.mubr.bf16.mxu0 %v1873_v48  ;;  %2825 = vmatprep.mubr.bf16.mxu1 %v1873_v48  ;;  %7622 = vst [vmem:[#allocation83_spill] sm:$0xff] %v6902_v55  ;;  %7623 = vst [vmem:[#allocation84_spill] sm:$0xff] %v6904_v34  ;;  %v6908_v41 = vld [vmem:[#allocation8 + $0x2c0] ss:$16 sps:$4 sm:$0xff]   ;;  %v6910_v5 = vld [vmem:[#allocation8 + $0x2c8] ss:$16 sps:$4 sm:$0xff]  }
 0x4d4   :  { %2709 = vmatprep.subr.bf16.mxu0 %v6842_v51  ;;  %2795 = vmatprep.subr.bf16.mxu1 %v6844_v0  ;;  %7624 = vst [vmem:[#allocation85_spill] sm:$0xff] %v6908_v41  ;;  %7625 = vst [vmem:[#allocation86_spill] sm:$0xff] %v6910_v5  ;;  %v6914_v49 = vld [vmem:[#allocation8 + $0x2e4] ss:$16 sps:$4 sm:$0xff]   ;;  %v6916_v48 = vld [vmem:[#allocation8 + $0x2ec] ss:$16 sps:$4 sm:$0xff]  }
 0x4d5   :  { %7626 = vst [vmem:[#allocation87_spill] sm:$0xff] %v6914_v49  ;;  %7627 = vst [vmem:[#allocation88_spill] sm:$0xff] %v6916_v48 }
 0x4d6   :  { %2710 = vmatpush1.bf16.msra.mxu0 %v6848_v43  ;;  %2796 = vmatpush1.bf16.msra.mxu1 %v6850_v46 }
 0x4d7   :  { %2711 = vmatprep.subr.bf16.mxu0 %v6852_v47  ;;  %2797 = vmatprep.subr.bf16.mxu1 %v6854_v16 }
 0x4da   :  { %2712 = vmatpush1.bf16.msra.mxu0 %v6860_v31  ;;  %2798 = vmatpush1.bf16.msra.mxu1 %v6862_v7 }
 0x4db   :  { %2713 = vmatprep.subr.bf16.mxu0 %v6866_v21  ;;  %2799 = vmatprep.subr.bf16.mxu1 %v6868_v50 }
 0x4de   :  { %2714 = vmatpush1.bf16.msra.mxu0 %v6872_v11  ;;  %2800 = vmatpush1.bf16.msra.mxu1 %v6874_v12 }
 0x4df   :  { %2715 = vmatprep.subr.bf16.mxu0 %v6878_v28  ;;  %2801 = vmatprep.subr.bf16.mxu1 %v6880_v15 }
 0x4e2   :  { %2716 = vmatpush1.bf16.msra.mxu0 %v6884_v39  ;;  %2802 = vmatpush1.bf16.msra.mxu1 %v6886_v32 }
 0x4e3   :  { %2717 = vmatprep.subr.bf16.mxu0 %v6890_v44  ;;  %2803 = vmatprep.subr.bf16.mxu1 %v6892_v38  ;;  %v6920_v38 = vld [vmem:[#allocation8 + $0x2e0] ss:$16 sps:$4 sm:$0xff]  }
 0x4e4   :  { %7628 = vst [vmem:[#allocation89_spill] sm:$0xff] %v6920_v38 }
 0x4e6   :  { %2718 = vmatpush1.bf16.msra.mxu0 %v6896_v14  ;;  %2804 = vmatpush1.bf16.msra.mxu1 %v6898_v35  ;;  %v6922_v14 = vld [vmem:[#allocation8 + $0x2e8] ss:$16 sps:$4 sm:$0xff]   ;;  %v6926_v35 = vld [vmem:[#allocation8 + $0x304] ss:$16 sps:$4 sm:$0xff]  }
 0x4e7   :  { %2719 = vmatprep.subr.bf16.mxu0 %v6902_v55  ;;  %2805 = vmatprep.subr.bf16.mxu1 %v6904_v34  ;;  %7629 = vst [vmem:[#allocation90_spill] sm:$0xff] %v6922_v14  ;;  %7630 = vst [vmem:[#allocation91_spill] sm:$0xff] %v6926_v35  ;;  %v6928_v55 = vld [vmem:[#allocation8 + $0x30c] ss:$16 sps:$4 sm:$0xff]   ;;  %v6932_v34 = vld [vmem:[#allocation8 + $0x300] ss:$16 sps:$4 sm:$0xff]  }
 0x4e8   :  { %7631 = vst [vmem:[#allocation92_spill] sm:$0xff] %v6928_v55  ;;  %7632 = vst [vmem:[#allocation93_spill] sm:$0xff] %v6932_v34 }
 0x4ea   :  { %2720 = vmatpush1.bf16.msra.mxu0 %v6908_v41  ;;  %2806 = vmatpush1.bf16.msra.mxu1 %v6910_v5  ;;  %v6934_v41 = vld [vmem:[#allocation8 + $0x308] ss:$16 sps:$4 sm:$0xff]   ;;  %v6938_v5 = vld [vmem:[#allocation8 + $0x324] ss:$16 sps:$4 sm:$0xff]  }
 0x4eb   :  { %2721 = vmatprep.subr.bf16.mxu0 %v6914_v49  ;;  %2807 = vmatprep.subr.bf16.mxu1 %v6916_v48  ;;  %7633 = vst [vmem:[#allocation94_spill] sm:$0xff] %v6934_v41  ;;  %7634 = vst [vmem:[#allocation95_spill] sm:$0xff] %v6938_v5  ;;  %v6940_v49 = vld [vmem:[#allocation8 + $0x32c] ss:$16 sps:$4 sm:$0xff]   ;;  %v6944_v48 = vld [vmem:[#allocation8 + $0x320] ss:$16 sps:$4 sm:$0xff]  }
 0x4ec   :  { %7635 = vst [vmem:[#allocation96_spill] sm:$0xff] %v6940_v49  ;;  %7636 = vst [vmem:[#allocation97_spill] sm:$0xff] %v6944_v48 }
 0x4ee   :  { %2722 = vmatpush1.bf16.msra.mxu0 %v6920_v38  ;;  %2808 = vmatpush1.bf16.msra.mxu1 %v6922_v14  ;;  %v6946_v38 = vld [vmem:[#allocation8 + $0x328] ss:$16 sps:$4 sm:$0xff]   ;;  %v6950_v14 = vld [vmem:[#allocation8 + $0x344] ss:$16 sps:$4 sm:$0xff]  }
 0x4ef   :  { %2723 = vmatprep.subr.bf16.mxu0 %v6926_v35  ;;  %2809 = vmatprep.subr.bf16.mxu1 %v6928_v55  ;;  %7637 = vst [vmem:[#allocation98_spill] sm:$0xff] %v6946_v38  ;;  %7638 = vst [vmem:[#allocation99_spill] sm:$0xff] %v6950_v14  ;;  %v6952_v35 = vld [vmem:[#allocation8 + $0x34c] ss:$16 sps:$4 sm:$0xff]   ;;  %v6956_v55 = vld [vmem:[#allocation8 + $0x340] ss:$16 sps:$4 sm:$0xff]  }
 0x4f0   :  { %7639 = vst [vmem:[#allocation100_spill] sm:$0xff] %v6952_v35  ;;  %7640 = vst [vmem:[#allocation101_spill] sm:$0xff] %v6956_v55 }
 0x4f2   :  { %2724 = vmatpush1.bf16.msra.mxu0 %v6932_v34  ;;  %2810 = vmatpush1.bf16.msra.mxu1 %v6934_v41  ;;  %v6958_v34 = vld [vmem:[#allocation8 + $0x348] ss:$16 sps:$4 sm:$0xff]   ;;  %v6962_v41 = vld [vmem:[#allocation8 + $0x364] ss:$16 sps:$4 sm:$0xff]  }
 0x4f3   :  { %2725 = vmatprep.subr.bf16.mxu0 %v6938_v5  ;;  %2811 = vmatprep.subr.bf16.mxu1 %v6940_v49  ;;  %7641 = vst [vmem:[#allocation102_spill] sm:$0xff] %v6958_v34  ;;  %7642 = vst [vmem:[#allocation103_spill] sm:$0xff] %v6962_v41  ;;  %v6964_v5 = vld [vmem:[#allocation8 + $0x36c] ss:$16 sps:$4 sm:$0xff]   ;;  %v6968_v49 = vld [vmem:[#allocation8 + $0x360] ss:$16 sps:$4 sm:$0xff]  }
 0x4f4   :  { %7643 = vst [vmem:[#allocation104_spill] sm:$0xff] %v6964_v5  ;;  %7644 = vst [vmem:[#allocation105_spill] sm:$0xff] %v6968_v49 }
 0x4f6   :  { %2726 = vmatpush1.bf16.msra.mxu0 %v6944_v48  ;;  %2812 = vmatpush1.bf16.msra.mxu1 %v6946_v38  ;;  %v6970_v48 = vld [vmem:[#allocation8 + $0x368] ss:$16 sps:$4 sm:$0xff]   ;;  %v6974_v38 = vld [vmem:[#allocation8 + $0x384] ss:$16 sps:$4 sm:$0xff]  }
 0x4f7   :  { %2727 = vmatprep.subr.bf16.mxu0 %v6950_v14  ;;  %2813 = vmatprep.subr.bf16.mxu1 %v6952_v35  ;;  %7645 = vst [vmem:[#allocation106_spill] sm:$0xff] %v6970_v48  ;;  %7646 = vst [vmem:[#allocation107_spill] sm:$0xff] %v6974_v38  ;;  %v6976_v14 = vld [vmem:[#allocation8 + $0x38c] ss:$16 sps:$4 sm:$0xff]   ;;  %v6980_v35 = vld [vmem:[#allocation8 + $0x380] ss:$16 sps:$4 sm:$0xff]  }
 0x4f8   :  { %7647 = vst [vmem:[#allocation108_spill] sm:$0xff] %v6976_v14  ;;  %7648 = vst [vmem:[#allocation109_spill] sm:$0xff] %v6980_v35 }
 0x4fa   :  { %2728 = vmatpush1.bf16.msra.mxu0 %v6956_v55  ;;  %2814 = vmatpush1.bf16.msra.mxu1 %v6958_v34  ;;  %v6982_v55 = vld [vmem:[#allocation8 + $0x388] ss:$16 sps:$4 sm:$0xff]   ;;  %v6986_v34 = vld [vmem:[#allocation8 + $0x3a4] ss:$16 sps:$4 sm:$0xff]  }
 0x4fb   :  { %2729 = vmatprep.subr.bf16.mxu0 %v6962_v41  ;;  %2815 = vmatprep.subr.bf16.mxu1 %v6964_v5  ;;  %7649 = vst [vmem:[#allocation110_spill] sm:$0xff] %v6982_v55  ;;  %7650 = vst [vmem:[#allocation111_spill] sm:$0xff] %v6986_v34  ;;  %v6988_v41 = vld [vmem:[#allocation8 + $0x3ac] ss:$16 sps:$4 sm:$0xff]   ;;  %v6992_v5 = vld [vmem:[#allocation8 + $0x3a0] ss:$16 sps:$4 sm:$0xff]  }
 0x4fc   :  { %7651 = vst [vmem:[#allocation112_spill] sm:$0xff] %v6988_v41  ;;  %7652 = vst [vmem:[#allocation113_spill] sm:$0xff] %v6992_v5 }
 0x4fe   :  { %2730 = vmatpush1.bf16.msra.mxu0 %v6968_v49  ;;  %2816 = vmatpush1.bf16.msra.mxu1 %v6970_v48  ;;  %v6994_v49 = vld [vmem:[#allocation8 + $0x3a8] ss:$16 sps:$4 sm:$0xff]   ;;  %v6998_v48 = vld [vmem:[#allocation8 + $0x3c4] ss:$16 sps:$4 sm:$0xff]  }
 0x4ff   :  { %2731 = vmatprep.subr.bf16.mxu0 %v6974_v38  ;;  %2817 = vmatprep.subr.bf16.mxu1 %v6976_v14  ;;  %7653 = vst [vmem:[#allocation114_spill] sm:$0xff] %v6994_v49  ;;  %7654 = vst [vmem:[#allocation115_spill] sm:$0xff] %v6998_v48  ;;  %v7000_v38 = vld [vmem:[#allocation8 + $0x3cc] ss:$16 sps:$4 sm:$0xff]   ;;  %v7004_v14 = vld [vmem:[#allocation8 + $0x3c0] ss:$16 sps:$4 sm:$0xff]  }
 0x500   :  { %7655 = vst [vmem:[#allocation116_spill] sm:$0xff] %v7000_v38  ;;  %7656 = vst [vmem:[#allocation117_spill] sm:$0xff] %v7004_v14 }
 0x502   :  { %2732 = vmatpush1.bf16.msra.mxu0 %v6980_v35  ;;  %2818 = vmatpush1.bf16.msra.mxu1 %v6982_v55  ;;  %v7006_v35 = vld [vmem:[#allocation8 + $0x3c8] ss:$16 sps:$4 sm:$0xff]   ;;  %v7010_v55 = vld [vmem:[#allocation8 + $0x3e4] ss:$16 sps:$4 sm:$0xff]  }
 0x503   :  { %2733 = vmatprep.subr.bf16.mxu0 %v6986_v34  ;;  %2819 = vmatprep.subr.bf16.mxu1 %v6988_v41  ;;  %7657 = vst [vmem:[#allocation118_spill] sm:$0xff] %v7006_v35  ;;  %7658 = vst [vmem:[#allocation119_spill] sm:$0xff] %v7010_v55  ;;  %v7012_v34 = vld [vmem:[#allocation8 + $0x3ec] ss:$16 sps:$4 sm:$0xff]   ;;  %v7016_v41 = vld [vmem:[#allocation8 + $0x3e0] ss:$16 sps:$4 sm:$0xff]  }
 0x504   :  { %7659 = vst [vmem:[#allocation120_spill] sm:$0xff] %v7012_v34  ;;  %7660 = vst [vmem:[#allocation121_spill] sm:$0xff] %v7016_v41 }
 0x506   :  { %2734 = vmatpush1.bf16.msra.mxu0 %v6992_v5  ;;  %2820 = vmatpush1.bf16.msra.mxu1 %v6994_v49  ;;  %v7018_v5 = vld [vmem:[#allocation8 + $0x3e8] ss:$16 sps:$4 sm:$0xff]  }
 0x507   :  { %2735 = vmatprep.subr.bf16.mxu0 %v6998_v48  ;;  %2821 = vmatprep.subr.bf16.mxu1 %v7000_v38  ;;  %7661 = vst [vmem:[#allocation122_spill] sm:$0xff] %v7018_v5 }
 0x50a   :  { %2736 = vmatpush1.bf16.msra.mxu0 %v7004_v14  ;;  %2822 = vmatpush1.bf16.msra.mxu1 %v7006_v35 }
 0x50b   :  { %2737 = vmatprep.subr.bf16.mxu0 %v7010_v55  ;;  %2823 = vmatprep.subr.bf16.mxu1 %v7012_v34 }
 0x50e   :  { %2738 = vmatpush1.bf16.msra.mxu0 %v7016_v41  ;;  %2824 = vmatpush1.bf16.msra.mxu1 %v7018_v5 }
 0x50f   :  { %2848 = vmatprep.subr.bf16.mxu0 %v6607_v57  ;;  %2934 = vmatprep.subr.bf16.mxu1 %v6609_v3 }
 0x511   :  { %2740 = vmatmul.mubr.bf16.vlgmr.msra.gmra.mrb[8].mxu0 %v6836_v54  ;;  %2826 = vmatmul.mubr.bf16.vlgmr.msra.gmra.mrb[8].mxu1 %v6836_v54  ;;  %v7662_v54 = vld [vmem:[#allocation44_spill] sm:$0xff] }
 0x512   :  { %2849 = vmatpush1.bf16.msra.mxu0 %v6618_v59  ;;  %2935 = vmatpush1.bf16.msra.mxu1 %v6620_v52 }
 0x513   :  { %2850 = vmatprep.subr.bf16.mxu0 %v6622_v20  ;;  %2936 = vmatprep.subr.bf16.mxu1 %v6624_v53 }
 0x516   :  { %2851 = vmatpush1.bf16.msra.mxu0 %v6628_v24  ;;  %2937 = vmatpush1.bf16.msra.mxu1 %v6630_v1 }
 0x517   :  { %2852 = vmatprep.subr.bf16.mxu0 %v6634_v6  ;;  %2938 = vmatprep.subr.bf16.mxu1 %v6636_v27 }
 0x51a   :  { %2853 = vmatpush1.bf16.msra.mxu0 %v6640_v17  ;;  %2939 = vmatpush1.bf16.msra.mxu1 %v6642_v58 }
 0x51b   :  { %2854 = vmatprep.subr.bf16.mxu0 %v6646_v18  ;;  %2940 = vmatprep.subr.bf16.mxu1 %v6648_v42 }
 0x51e   :  { %2855 = vmatpush1.bf16.msra.mxu0 %v6652_v19  ;;  %2941 = vmatpush1.bf16.msra.mxu1 %v6654_v2 }
 0x51f   :  { %2856 = vmatprep.subr.bf16.mxu0 %v6658_v4  ;;  %2942 = vmatprep.subr.bf16.mxu1 %v6660_v36 }
 0x522   :  { %2857 = vmatpush1.bf16.msra.mxu0 %v6664_v33  ;;  %2943 = vmatpush1.bf16.msra.mxu1 %v6666_v8 }
 0x523   :  { %2858 = vmatprep.subr.bf16.mxu0 %v6670_v10  ;;  %2944 = vmatprep.subr.bf16.mxu1 %v6672_v61 }
 0x526   :  { %2859 = vmatpush1.bf16.msra.mxu0 %v6676_v62  ;;  %2945 = vmatpush1.bf16.msra.mxu1 %v6678_v63 }
 0x527   :  { %2860 = vmatprep.subr.bf16.mxu0 %v6682_v60  ;;  %2946 = vmatprep.subr.bf16.mxu1 %v6684_v25  ;;  %v7663_v25 = vld [vmem:[#allocation45_spill] sm:$0xff] }
 0x52a   :  { %2861 = vmatpush1.bf16.msra.mxu0 %v6688_v26  ;;  %2947 = vmatpush1.bf16.msra.mxu1 %v6690_v29  ;;  %v7664_v26 = vld [vmem:[#allocation46_spill] sm:$0xff]  ;;  %v7665_v29 = vld [vmem:[#allocation47_spill] sm:$0xff] }
 0x52b   :  { %2862 = vmatprep.subr.bf16.mxu0 %v6694_v40  ;;  %2948 = vmatprep.subr.bf16.mxu1 %v6696_v45  ;;  %v7666_v40 = vld [vmem:[#allocation48_spill] sm:$0xff]  ;;  %v7667_v45 = vld [vmem:[#allocation49_spill] sm:$0xff] }
 0x52e   :  { %2863 = vmatpush1.bf16.msra.mxu0 %v6700_v13  ;;  %2949 = vmatpush1.bf16.msra.mxu1 %v6702_v30  ;;  %v7668_v13 = vld [vmem:[#allocation50_spill] sm:$0xff]  ;;  %v7669_v30 = vld [vmem:[#allocation51_spill] sm:$0xff] }
 0x52f   :  { %2864 = vmatprep.subr.bf16.mxu0 %v6706_v9  ;;  %2950 = vmatprep.subr.bf16.mxu1 %v6708_v37  ;;  %v7670_v9 = vld [vmem:[#allocation52_spill] sm:$0xff]  ;;  %v7671_v37 = vld [vmem:[#allocation53_spill] sm:$0xff] }
 0x532   :  { %2865 = vmatpush1.bf16.msra.mxu0 %v6712_v22  ;;  %2951 = vmatpush1.bf16.msra.mxu1 %v7662_v54  ;;  %v7672_v22 = vld [vmem:[#allocation54_spill] sm:$0xff]  ;;  %v7673_v54 = vld [vmem:[#allocation55_spill] sm:$0xff] }
 0x533   :  { %2866 = vmatprep.subr.bf16.mxu0 %v7663_v25  ;;  %2952 = vmatprep.subr.bf16.mxu1 %v7664_v26  ;;  %v7674_v25 = vld [vmem:[#allocation56_spill] sm:$0xff]  ;;  %v7675_v26 = vld [vmem:[#allocation57_spill] sm:$0xff] }
 0x536   :  { %2867 = vmatpush1.bf16.msra.mxu0 %v7665_v29  ;;  %2953 = vmatpush1.bf16.msra.mxu1 %v7666_v40  ;;  %v7676_v29 = vld [vmem:[#allocation58_spill] sm:$0xff]  ;;  %v7677_v40 = vld [vmem:[#allocation59_spill] sm:$0xff] }
 0x537   :  { %2868 = vmatprep.subr.bf16.mxu0 %v7667_v45  ;;  %2954 = vmatprep.subr.bf16.mxu1 %v7668_v13  ;;  %v7678_v45 = vld [vmem:[#allocation60_spill] sm:$0xff]  ;;  %v7679_v13 = vld [vmem:[#allocation61_spill] sm:$0xff] }
 0x53a   :  { %2869 = vmatpush1.bf16.msra.mxu0 %v7669_v30  ;;  %2955 = vmatpush1.bf16.msra.mxu1 %v7670_v9  ;;  %v7680_v30 = vld [vmem:[#allocation62_spill] sm:$0xff]  ;;  %v7681_v9 = vld [vmem:[#allocation63_spill] sm:$0xff] }
 0x53b   :  { %2870 = vmatprep.subr.bf16.mxu0 %v7671_v37  ;;  %2956 = vmatprep.subr.bf16.mxu1 %v7672_v22  ;;  %v7682_v37 = vld [vmem:[#allocation64_spill] sm:$0xff]  ;;  %v7683_v22 = vld [vmem:[#allocation66_spill] sm:$0xff] }
 0x53e   :  { %2871 = vmatpush1.bf16.msra.mxu0 %v7673_v54  ;;  %2957 = vmatpush1.bf16.msra.mxu1 %v7674_v25  ;;  %v7684_v54 = vld [vmem:[#allocation67_spill] sm:$0xff]  ;;  %v7685_v25 = vld [vmem:[#allocation68_spill] sm:$0xff] }
 0x53f   :  { %2872 = vmatprep.subr.bf16.mxu0 %v7675_v26  ;;  %2958 = vmatprep.subr.bf16.mxu1 %v7676_v29  ;;  %v7686_v26 = vld [vmem:[#allocation69_spill] sm:$0xff]  ;;  %v7687_v29 = vld [vmem:[#allocation72_spill] sm:$0xff] }
 0x542   :  { %2873 = vmatpush1.bf16.msra.mxu0 %v7677_v40  ;;  %2959 = vmatpush1.bf16.msra.mxu1 %v7678_v45  ;;  %v7688_v40 = vld [vmem:[#allocation73_spill] sm:$0xff]  ;;  %v7689_v45 = vld [vmem:[#allocation74_spill] sm:$0xff] }
 0x543   :  { %2874 = vmatprep.subr.bf16.mxu0 %v7679_v13  ;;  %2960 = vmatprep.subr.bf16.mxu1 %v7680_v30  ;;  %v7690_v13 = vld [vmem:[#allocation75_spill] sm:$0xff]  ;;  %v7691_v30 = vld [vmem:[#allocation76_spill] sm:$0xff] }
 0x546   :  { %2875 = vmatpush1.bf16.msra.mxu0 %v7681_v9  ;;  %2961 = vmatpush1.bf16.msra.mxu1 %v7682_v37  ;;  %v7692_v9 = vld [vmem:[#allocation77_spill] sm:$0xff]  ;;  %v7693_v37 = vld [vmem:[#allocation78_spill] sm:$0xff] }
 0x547   :  { %2876 = vmatprep.subr.bf16.mxu0 %v7683_v22  ;;  %2962 = vmatprep.subr.bf16.mxu1 %v7684_v54  ;;  %v7694_v22 = vld [vmem:[#allocation70_spill] sm:$0xff]  ;;  %v7696_v54 = vld [vmem:[#allocation79_spill] sm:$0xff] }
 0x548   :  { %v7094_v60 = vrot.slane %v7694_v22, %v7693_v37 }
 0x54a   :  { %2877 = vmatpush1.bf16.msra.mxu0 %v7685_v25  ;;  %2963 = vmatpush1.bf16.msra.mxu1 %v7686_v26  ;;  %7695 = vst [vmem:[#allocation70_spill] sm:$0xff] %v7094_v60  ;;  %v7098_v25 = vrot.slane %v7694_v22, %v7696_v54  ;;  %v7697_v26 = vld [vmem:[#allocation65_spill] sm:$0xff] }
 0x54b   :  { %2878 = vmatprep.subr.bf16.mxu0 %v7687_v29  ;;  %2964 = vmatprep.subr.bf16.mxu1 %v7688_v40  ;;  %v7698_v29 = vsub.s32 3, %v7697_v26 }
 0x54d   :  { %v7103_v40 = vrot.slane %v7694_v22, %v7698_v29 }
 0x54e   :  { %2879 = vmatpush1.bf16.msra.mxu0 %v7689_v45  ;;  %2965 = vmatpush1.bf16.msra.mxu1 %v7690_v13 }
 0x54f   :  { %2891 = vmatprep.subr.bf16.mxu0 %v7691_v30  ;;  %2977 = vmatprep.subr.bf16.mxu1 %v7692_v9  ;;  %v7699_v30 = vld [vmem:[#allocation71_spill] sm:$0xff] }
 0x5e4   :  { %v2741_v45 = vpop.f32.mrb[8].mxu0  ;;  %v2827_v63 = vpop.f32.mrb[8].mxu1 }
 0x5e5   :  { %v5198_v13 = vadd.f32 %v2741_v45, %v7094_v60  ;;  %v5202_v62 = vadd.f32 %v2827_v63, %v7699_v30  ;;  %v2743_v9 = vpop.f32.mrb[9].mxu0  ;;  %v2829_v61 = vpop.f32.mrb[9].mxu1 }
 0x5e6   :  { %v5199_v37 = vadd.f32 %v2743_v9, %v7098_v25  ;;  %v5203_v10 = vadd.f32 %v2829_v61, %v7103_v40  ;;  %v2745_v8 = vpop.f32.mrb[10].mxu0  ;;  %v2831_v54 = vpop.f32.mrb[10].mxu1 }
 0x5e7   :  { %v5200_v33 = vadd.f32 %v2745_v8, %v7094_v60  ;;  %v5204_v26 = vadd.f32 %v2831_v54, %v7699_v30  ;;  %v2747_v29 = vpop.f32.mrb[11].mxu0  ;;  %v2833_v22 = vpop.f32.mrb[11].mxu1  ;;  %v2836_v4 = vmax.f32 %v5198_v13, 0.0  ;;  %v2838_v63 = vmax.f32 %v5202_v62, 0.0  ;;  %v7709_v62 = vld [vmem:[#allocation89_spill] sm:$0xff]  ;;  %v7711_v13 = vld [vmem:[#allocation91_spill] sm:$0xff] }
 0x5e8   :  { %v5201_v36 = vadd.f32 %v2747_v29, %v7098_v25  ;;  %v5205_v45 = vadd.f32 %v2833_v22, %v7103_v40  ;;  %v2837_v42 = vmax.f32 %v5199_v37, 0.0  ;;  %v2839_v9 = vmax.f32 %v5203_v10, 0.0  ;;  %v7708_v10 = vld [vmem:[#allocation88_spill] sm:$0xff]  ;;  %v7713_v54 = vld [vmem:[#allocation93_spill] sm:$0xff]  ;;  %v7715_v29 = vld [vmem:[#allocation95_spill] sm:$0xff] }
 0x5e9   :  { %v2840_v2 = vmax.f32 %v5200_v33, 0.0  ;;  %v2842_v19 = vmax.f32 %v5204_v26, 0.0  ;;  %v7707_v33 = vld [vmem:[#allocation87_spill] sm:$0xff]  ;;  %v7712_v37 = vld [vmem:[#allocation92_spill] sm:$0xff]  ;;  %v7714_v26 = vld [vmem:[#allocation94_spill] sm:$0xff] }
 0x5ea   :  { %v2841_v18 = vmax.f32 %v5201_v36, 0.0  ;;  %v2843_v61 = vmax.f32 %v5205_v45, 0.0  ;;  %v7706_v36 = vld [vmem:[#allocation86_spill] sm:$0xff]  ;;  %v7716_v22 = vld [vmem:[#allocation96_spill] sm:$0xff]  ;;  %v7717_v45 = vld [vmem:[#allocation97_spill] sm:$0xff] }
 0x5eb   :  { %v2844_v58 = vpack.c.bf16 %v2840_v2, %v2836_v4  ;;  %v7113_v17 = vpack.c.bf16 %v2842_v19, %v2838_v63  ;;  %v7703_v19 = vld [vmem:[#allocation83_spill] sm:$0xff]  ;;  %v7704_v2 = vld [vmem:[#allocation84_spill] sm:$0xff]  ;;  %v7705_v4 = vld [vmem:[#allocation85_spill] sm:$0xff] }
 0x5ec   :  { %v2845_v8 = vpack.c.bf16 %v2841_v18, %v2837_v42  ;;  %v2847_v60 = vpack.c.bf16 %v2843_v61, %v2839_v9  ;;  %v7701_v18 = vld [vmem:[#allocation81_spill] sm:$0xff]  ;;  %v7702_v42 = vld [vmem:[#allocation82_spill] sm:$0xff]  ;;  %v7719_v9 = vld [vmem:[#allocation99_spill] sm:$0xff] }
 0x5ed   :  { %v7718_v63 = vld [vmem:[#allocation98_spill] sm:$0xff]  ;;  %v7720_v61 = vld [vmem:[#allocation100_spill] sm:$0xff] }
 0x5ee   :  { %2880 = vmatprep.mubr.bf16.mxu0 %v2845_v8  ;;  %2966 = vmatprep.mubr.bf16.mxu1 %v2845_v8  ;;  %v7721_v8 = vld [vmem:[#allocation101_spill] sm:$0xff] }
 0x5ef   :  { %2881 = vmatmul.mubr.bf16.vlgmr.msra.gmra.mrb[12].mxu0 %v2844_v58  ;;  %2967 = vmatmul.mubr.bf16.vlgmr.msra.gmra.mrb[12].mxu1 %v2844_v58  ;;  %v7700_v58 = vld [vmem:[#allocation80_spill] sm:$0xff] }
 0x5f0   :  { %2892 = vmatpush1.bf16.msra.mxu0 %v6838_v23  ;;  %2978 = vmatpush1.bf16.msra.mxu1 %v6840_v56 }
 0x5f1   :  { %2923 = vmatprep.mubr.bf16.mxu0 %v2847_v60  ;;  %3009 = vmatprep.mubr.bf16.mxu1 %v2847_v60  ;;  %v7710_v60 = vld [vmem:[#allocation90_spill] sm:$0xff] }
 0x5f2   :  { %2893 = vmatprep.subr.bf16.mxu0 %v6842_v51  ;;  %2979 = vmatprep.subr.bf16.mxu1 %v6844_v0 }
 0x5f4   :  { %2894 = vmatpush1.bf16.msra.mxu0 %v6848_v43  ;;  %2980 = vmatpush1.bf16.msra.mxu1 %v6850_v46 }
 0x5f5   :  { %2895 = vmatprep.subr.bf16.mxu0 %v6852_v47  ;;  %2981 = vmatprep.subr.bf16.mxu1 %v6854_v16 }
 0x5f8   :  { %2896 = vmatpush1.bf16.msra.mxu0 %v6860_v31  ;;  %2982 = vmatpush1.bf16.msra.mxu1 %v6862_v7 }
 0x5f9   :  { %2897 = vmatprep.subr.bf16.mxu0 %v6866_v21  ;;  %2983 = vmatprep.subr.bf16.mxu1 %v6868_v50 }
 0x5fc   :  { %2898 = vmatpush1.bf16.msra.mxu0 %v6872_v11  ;;  %2984 = vmatpush1.bf16.msra.mxu1 %v6874_v12 }
 0x5fd   :  { %2899 = vmatprep.subr.bf16.mxu0 %v6878_v28  ;;  %2985 = vmatprep.subr.bf16.mxu1 %v6880_v15 }
 0x600   :  { %2900 = vmatpush1.bf16.msra.mxu0 %v6884_v39  ;;  %2986 = vmatpush1.bf16.msra.mxu1 %v6886_v32 }
 0x601   :  { %2901 = vmatprep.subr.bf16.mxu0 %v6890_v44  ;;  %2987 = vmatprep.subr.bf16.mxu1 %v7700_v58 }
 0x604   :  { %2902 = vmatpush1.bf16.msra.mxu0 %v7701_v18  ;;  %2988 = vmatpush1.bf16.msra.mxu1 %v7702_v42 }
 0x605   :  { %2903 = vmatprep.subr.bf16.mxu0 %v7703_v19  ;;  %2989 = vmatprep.subr.bf16.mxu1 %v7704_v2 }
 0x608   :  { %2904 = vmatpush1.bf16.msra.mxu0 %v7705_v4  ;;  %2990 = vmatpush1.bf16.msra.mxu1 %v7706_v36 }
 0x609   :  { %2905 = vmatprep.subr.bf16.mxu0 %v7707_v33  ;;  %2991 = vmatprep.subr.bf16.mxu1 %v7708_v10 }
 0x60c   :  { %2906 = vmatpush1.bf16.msra.mxu0 %v7709_v62  ;;  %2992 = vmatpush1.bf16.msra.mxu1 %v7710_v60 }
 0x60d   :  { %2907 = vmatprep.subr.bf16.mxu0 %v7711_v13  ;;  %2993 = vmatprep.subr.bf16.mxu1 %v7712_v37  ;;  %v7722_v13 = vld [vmem:[#allocation102_spill] sm:$0xff]  ;;  %v7723_v37 = vld [vmem:[#allocation103_spill] sm:$0xff] }
 0x610   :  { %2908 = vmatpush1.bf16.msra.mxu0 %v7713_v54  ;;  %2994 = vmatpush1.bf16.msra.mxu1 %v7714_v26  ;;  %v7724_v54 = vld [vmem:[#allocation104_spill] sm:$0xff]  ;;  %v7725_v26 = vld [vmem:[#allocation105_spill] sm:$0xff] }
 0x611   :  { %2909 = vmatprep.subr.bf16.mxu0 %v7715_v29  ;;  %2995 = vmatprep.subr.bf16.mxu1 %v7716_v22  ;;  %v7726_v29 = vld [vmem:[#allocation106_spill] sm:$0xff]  ;;  %v7727_v22 = vld [vmem:[#allocation107_spill] sm:$0xff] }
 0x614   :  { %2910 = vmatpush1.bf16.msra.mxu0 %v7717_v45  ;;  %2996 = vmatpush1.bf16.msra.mxu1 %v7718_v63  ;;  %v7728_v45 = vld [vmem:[#allocation108_spill] sm:$0xff]  ;;  %v7729_v63 = vld [vmem:[#allocation109_spill] sm:$0xff] }
 0x615   :  { %2911 = vmatprep.subr.bf16.mxu0 %v7719_v9  ;;  %2997 = vmatprep.subr.bf16.mxu1 %v7720_v61  ;;  %v7730_v9 = vld [vmem:[#allocation110_spill] sm:$0xff]  ;;  %v7731_v61 = vld [vmem:[#allocation111_spill] sm:$0xff] }
 0x618   :  { %2912 = vmatpush1.bf16.msra.mxu0 %v7721_v8  ;;  %2998 = vmatpush1.bf16.msra.mxu1 %v7722_v13  ;;  %v7732_v8 = vld [vmem:[#allocation112_spill] sm:$0xff]  ;;  %v7733_v13 = vld [vmem:[#allocation113_spill] sm:$0xff] }
 0x619   :  { %2913 = vmatprep.subr.bf16.mxu0 %v7723_v37  ;;  %2999 = vmatprep.subr.bf16.mxu1 %v7724_v54 }
 0x61c   :  { %2914 = vmatpush1.bf16.msra.mxu0 %v7725_v26  ;;  %3000 = vmatpush1.bf16.msra.mxu1 %v7726_v29 }
 0x61d   :  { %2915 = vmatprep.subr.bf16.mxu0 %v7727_v22  ;;  %3001 = vmatprep.subr.bf16.mxu1 %v7728_v45 }
 0x620   :  { %2916 = vmatpush1.bf16.msra.mxu0 %v7729_v63  ;;  %3002 = vmatpush1.bf16.msra.mxu1 %v7730_v9 }
 0x621   :  { %2917 = vmatprep.subr.bf16.mxu0 %v7731_v61  ;;  %3003 = vmatprep.subr.bf16.mxu1 %v7732_v8 }
 0x624   :  { %2918 = vmatpush1.bf16.msra.mxu0 %v7733_v13  ;;  %3004 = vmatpush1.bf16.msra.mxu1 %v6994_v49 }
 0x625   :  { %2919 = vmatprep.subr.bf16.mxu0 %v6998_v48  ;;  %3005 = vmatprep.subr.bf16.mxu1 %v7000_v38 }
 0x628   :  { %2920 = vmatpush1.bf16.msra.mxu0 %v7004_v14  ;;  %3006 = vmatpush1.bf16.msra.mxu1 %v7006_v35 }
 0x629   :  { %2921 = vmatprep.subr.bf16.mxu0 %v7010_v55  ;;  %3007 = vmatprep.subr.bf16.mxu1 %v7012_v34 }
 0x62c   :  { %2922 = vmatpush1.bf16.msra.mxu0 %v7016_v41  ;;  %3008 = vmatpush1.bf16.msra.mxu1 %v7018_v5  ;;  %v7790_v5 = vld [vmem:[#allocation70_spill] sm:$0xff] }
 0x62d   :  { %3032 = vmatprep.subr.bf16.mxu0 %v6607_v57  ;;  %3118 = vmatprep.subr.bf16.mxu1 %v6609_v3  ;;  %v7734_v57 = vld [vmem:[#allocation19_spill] sm:$0xff]  ;;  %v7735_v3 = vld [vmem:[#allocation20_spill] sm:$0xff] }
 0x62f   :  { %2924 = vmatmul.mubr.bf16.vlgmr.msra.gmra.mrb[12].mxu0 %v7113_v17  ;;  %3010 = vmatmul.mubr.bf16.vlgmr.msra.gmra.mrb[12].mxu1 %v7113_v17  ;;  %v7736_v17 = vld [vmem:[#allocation21_spill] sm:$0xff] }
 0x630   :  { %3033 = vmatpush1.bf16.msra.mxu0 %v6618_v59  ;;  %3119 = vmatpush1.bf16.msra.mxu1 %v6620_v52  ;;  %v7737_v59 = vld [vmem:[#allocation22_spill] sm:$0xff]  ;;  %v7738_v52 = vld [vmem:[#allocation23_spill] sm:$0xff] }
 0x631   :  { %3034 = vmatprep.subr.bf16.mxu0 %v6622_v20  ;;  %3120 = vmatprep.subr.bf16.mxu1 %v6624_v53  ;;  %v7739_v20 = vld [vmem:[#allocation24_spill] sm:$0xff]  ;;  %v7740_v53 = vld [vmem:[#allocation25_spill] sm:$0xff] }
 0x634   :  { %3035 = vmatpush1.bf16.msra.mxu0 %v6628_v24  ;;  %3121 = vmatpush1.bf16.msra.mxu1 %v6630_v1  ;;  %v7741_v24 = vld [vmem:[#allocation26_spill] sm:$0xff]  ;;  %v7742_v1 = vld [vmem:[#allocation27_spill] sm:$0xff] }
 0x635   :  { %3036 = vmatprep.subr.bf16.mxu0 %v6634_v6  ;;  %3122 = vmatprep.subr.bf16.mxu1 %v6636_v27  ;;  %v7743_v6 = vld [vmem:[#allocation28_spill] sm:$0xff]  ;;  %v7744_v27 = vld [vmem:[#allocation29_spill] sm:$0xff] }
 0x638   :  { %3037 = vmatpush1.bf16.msra.mxu0 %v7734_v57  ;;  %3123 = vmatpush1.bf16.msra.mxu1 %v7735_v3  ;;  %v7745_v57 = vld [vmem:[#allocation30_spill] sm:$0xff]  ;;  %v7746_v3 = vld [vmem:[#allocation31_spill] sm:$0xff] }
 0x639   :  { %3038 = vmatprep.subr.bf16.mxu0 %v7736_v17  ;;  %3124 = vmatprep.subr.bf16.mxu1 %v7737_v59  ;;  %v7747_v17 = vld [vmem:[#allocation32_spill] sm:$0xff]  ;;  %v7748_v59 = vld [vmem:[#allocation33_spill] sm:$0xff] }
 0x63c   :  { %3039 = vmatpush1.bf16.msra.mxu0 %v7738_v52  ;;  %3125 = vmatpush1.bf16.msra.mxu1 %v7739_v20  ;;  %v7749_v52 = vld [vmem:[#allocation34_spill] sm:$0xff]  ;;  %v7750_v20 = vld [vmem:[#allocation35_spill] sm:$0xff] }
 0x63d   :  { %3040 = vmatprep.subr.bf16.mxu0 %v7740_v53  ;;  %3126 = vmatprep.subr.bf16.mxu1 %v7741_v24  ;;  %v7751_v53 = vld [vmem:[#allocation36_spill] sm:$0xff]  ;;  %v7752_v24 = vld [vmem:[#allocation37_spill] sm:$0xff] }
 0x640   :  { %3041 = vmatpush1.bf16.msra.mxu0 %v7742_v1  ;;  %3127 = vmatpush1.bf16.msra.mxu1 %v7743_v6  ;;  %v7753_v1 = vld [vmem:[#allocation38_spill] sm:$0xff]  ;;  %v7754_v6 = vld [vmem:[#allocation39_spill] sm:$0xff] }
 0x641   :  { %3042 = vmatprep.subr.bf16.mxu0 %v7744_v27  ;;  %3128 = vmatprep.subr.bf16.mxu1 %v7745_v57  ;;  %v7755_v27 = vld [vmem:[#allocation40_spill] sm:$0xff]  ;;  %v7756_v57 = vld [vmem:[#allocation41_spill] sm:$0xff] }
 0x644   :  { %3043 = vmatpush1.bf16.msra.mxu0 %v7746_v3  ;;  %3129 = vmatpush1.bf16.msra.mxu1 %v7747_v17  ;;  %v7757_v3 = vld [vmem:[#allocation42_spill] sm:$0xff]  ;;  %v7758_v17 = vld [vmem:[#allocation43_spill] sm:$0xff] }
 0x645   :  { %3044 = vmatprep.subr.bf16.mxu0 %v7748_v59  ;;  %3130 = vmatprep.subr.bf16.mxu1 %v7749_v52  ;;  %v7759_v59 = vld [vmem:[#allocation44_spill] sm:$0xff]  ;;  %v7760_v52 = vld [vmem:[#allocation45_spill] sm:$0xff] }
 0x648   :  { %3045 = vmatpush1.bf16.msra.mxu0 %v7750_v20  ;;  %3131 = vmatpush1.bf16.msra.mxu1 %v7751_v53  ;;  %v7761_v20 = vld [vmem:[#allocation46_spill] sm:$0xff]  ;;  %v7762_v53 = vld [vmem:[#allocation47_spill] sm:$0xff] }
 0x649   :  { %3046 = vmatprep.subr.bf16.mxu0 %v7752_v24  ;;  %3132 = vmatprep.subr.bf16.mxu1 %v7753_v1  ;;  %v7763_v24 = vld [vmem:[#allocation48_spill] sm:$0xff]  ;;  %v7764_v1 = vld [vmem:[#allocation49_spill] sm:$0xff] }
 0x64c   :  { %3047 = vmatpush1.bf16.msra.mxu0 %v7754_v6  ;;  %3133 = vmatpush1.bf16.msra.mxu1 %v7755_v27  ;;  %v7765_v6 = vld [vmem:[#allocation50_spill] sm:$0xff]  ;;  %v7766_v27 = vld [vmem:[#allocation51_spill] sm:$0xff] }
 0x64d   :  { %3048 = vmatprep.subr.bf16.mxu0 %v7756_v57  ;;  %3134 = vmatprep.subr.bf16.mxu1 %v7757_v3  ;;  %v7767_v57 = vld [vmem:[#allocation52_spill] sm:$0xff]  ;;  %v7768_v3 = vld [vmem:[#allocation53_spill] sm:$0xff] }
 0x650   :  { %3049 = vmatpush1.bf16.msra.mxu0 %v7758_v17  ;;  %3135 = vmatpush1.bf16.msra.mxu1 %v7759_v59  ;;  %v7769_v17 = vld [vmem:[#allocation54_spill] sm:$0xff]  ;;  %v7770_v59 = vld [vmem:[#allocation55_spill] sm:$0xff] }
 0x651   :  { %3050 = vmatprep.subr.bf16.mxu0 %v7760_v52  ;;  %3136 = vmatprep.subr.bf16.mxu1 %v7761_v20  ;;  %v7771_v52 = vld [vmem:[#allocation56_spill] sm:$0xff]  ;;  %v7772_v20 = vld [vmem:[#allocation57_spill] sm:$0xff] }
 0x654   :  { %3051 = vmatpush1.bf16.msra.mxu0 %v7762_v53  ;;  %3137 = vmatpush1.bf16.msra.mxu1 %v7763_v24  ;;  %v7773_v53 = vld [vmem:[#allocation58_spill] sm:$0xff]  ;;  %v7774_v24 = vld [vmem:[#allocation59_spill] sm:$0xff] }
 0x655   :  { %3052 = vmatprep.subr.bf16.mxu0 %v7764_v1  ;;  %3138 = vmatprep.subr.bf16.mxu1 %v7765_v6  ;;  %v7775_v1 = vld [vmem:[#allocation60_spill] sm:$0xff]  ;;  %v7776_v6 = vld [vmem:[#allocation61_spill] sm:$0xff] }
 0x658   :  { %3053 = vmatpush1.bf16.msra.mxu0 %v7766_v27  ;;  %3139 = vmatpush1.bf16.msra.mxu1 %v7767_v57  ;;  %v7777_v27 = vld [vmem:[#allocation62_spill] sm:$0xff]  ;;  %v7778_v57 = vld [vmem:[#allocation63_spill] sm:$0xff] }
 0x659   :  { %3054 = vmatprep.subr.bf16.mxu0 %v7768_v3  ;;  %3140 = vmatprep.subr.bf16.mxu1 %v7769_v17  ;;  %v7779_v3 = vld [vmem:[#allocation64_spill] sm:$0xff]  ;;  %v7780_v17 = vld [vmem:[#allocation66_spill] sm:$0xff] }
 0x65c   :  { %3055 = vmatpush1.bf16.msra.mxu0 %v7770_v59  ;;  %3141 = vmatpush1.bf16.msra.mxu1 %v7771_v52  ;;  %v7781_v59 = vld [vmem:[#allocation67_spill] sm:$0xff]  ;;  %v7782_v52 = vld [vmem:[#allocation68_spill] sm:$0xff] }
 0x65d   :  { %3056 = vmatprep.subr.bf16.mxu0 %v7772_v20  ;;  %3142 = vmatprep.subr.bf16.mxu1 %v7773_v53  ;;  %v7783_v20 = vld [vmem:[#allocation69_spill] sm:$0xff]  ;;  %v7784_v53 = vld [vmem:[#allocation72_spill] sm:$0xff] }
 0x660   :  { %3057 = vmatpush1.bf16.msra.mxu0 %v7774_v24  ;;  %3143 = vmatpush1.bf16.msra.mxu1 %v7775_v1  ;;  %v7785_v24 = vld [vmem:[#allocation73_spill] sm:$0xff]  ;;  %v7786_v1 = vld [vmem:[#allocation74_spill] sm:$0xff] }
 0x661   :  { %3058 = vmatprep.subr.bf16.mxu0 %v7776_v6  ;;  %3144 = vmatprep.subr.bf16.mxu1 %v7777_v27  ;;  %v7787_v6 = vld [vmem:[#allocation75_spill] sm:$0xff]  ;;  %v7788_v27 = vld [vmem:[#allocation76_spill] sm:$0xff] }
 0x664   :  { %3059 = vmatpush1.bf16.msra.mxu0 %v7778_v57  ;;  %3145 = vmatpush1.bf16.msra.mxu1 %v7779_v3  ;;  %v7789_v57 = vld [vmem:[#allocation77_spill] sm:$0xff] }
 0x665   :  { %3060 = vmatprep.subr.bf16.mxu0 %v7780_v17  ;;  %3146 = vmatprep.subr.bf16.mxu1 %v7781_v59 }
 0x668   :  { %3061 = vmatpush1.bf16.msra.mxu0 %v7782_v52  ;;  %3147 = vmatpush1.bf16.msra.mxu1 %v7783_v20 }
 0x669   :  { %3062 = vmatprep.subr.bf16.mxu0 %v7784_v53  ;;  %3148 = vmatprep.subr.bf16.mxu1 %v7785_v24 }
 0x66c   :  { %3063 = vmatpush1.bf16.msra.mxu0 %v7786_v1  ;;  %3149 = vmatpush1.bf16.msra.mxu1 %v7787_v6 }
 0x66d   :  { %3075 = vmatprep.subr.bf16.mxu0 %v7788_v27  ;;  %3161 = vmatprep.subr.bf16.mxu1 %v7789_v57 }
 0x702   :  { %v2925_v3 = vpop.f32.mrb[12].mxu0  ;;  %v3011_v17 = vpop.f32.mrb[12].mxu1 }
 0x703   :  { %v5206_v59 = vadd.f32 %v2925_v3, %v7790_v5  ;;  %v5210_v52 = vadd.f32 %v3011_v17, %v7699_v30  ;;  %v2927_v41 = vpop.f32.mrb[13].mxu0  ;;  %v3013_v20 = vpop.f32.mrb[13].mxu1 }
 0x704   :  { %v5207_v53 = vadd.f32 %v2927_v41, %v7098_v25  ;;  %v5211_v24 = vadd.f32 %v3013_v20, %v7103_v40  ;;  %v2929_v34 = vpop.f32.mrb[14].mxu0  ;;  %v3015_v1 = vpop.f32.mrb[14].mxu1 }
 0x705   :  { %v5208_v6 = vadd.f32 %v2929_v34, %v7790_v5  ;;  %v5212_v27 = vadd.f32 %v3015_v1, %v7699_v30  ;;  %v2931_v55 = vpop.f32.mrb[15].mxu0  ;;  %v3017_v57 = vpop.f32.mrb[15].mxu1  ;;  %v3020_v14 = vmax.f32 %v5206_v59, 0.0  ;;  %v3022_v17 = vmax.f32 %v5210_v52, 0.0  ;;  %v5567_v59 = vld [vmem:[#allocation10 + $0xc4] ss:$8 sps:$4 sm:$0xff]  }
 0x706   :  { %v5209_v35 = vadd.f32 %v2931_v55, %v7098_v25  ;;  %v5213_v3 = vadd.f32 %v3017_v57, %v7103_v40  ;;  %v3021_v49 = vmax.f32 %v5207_v53, 0.0  ;;  %v3023_v41 = vmax.f32 %v5211_v24, 0.0  ;;  %v5531_v55 = vld [vmem:[#allocation10 + $0x4] ss:$8 sps:$4 sm:$0xff]   ;;  %v5565_v52 = vld [vmem:[#allocation10 + $0xc0] ss:$8 sps:$4 sm:$0xff]  }
 0x707   :  { %v3024_v38 = vmax.f32 %v5208_v6, 0.0  ;;  %v3026_v48 = vmax.f32 %v5212_v27, 0.0  ;;  %v5570_v53 = vld [vmem:[#allocation10 + $0xd4] ss:$8 sps:$4 sm:$0xff]   ;;  %v5568_v24 = vld [vmem:[#allocation10 + $0xd0] ss:$8 sps:$4 sm:$0xff]  }
 0x708   :  { %v3025_v13 = vmax.f32 %v5209_v35, 0.0  ;;  %v3027_v20 = vmax.f32 %v5213_v3, 0.0  ;;  %v7812_v35 = vld [vmem:[#allocation120_spill] sm:$0xff]  ;;  %v5573_v1 = vld [vmem:[#allocation10 + $0xe4] ss:$8 sps:$4 sm:$0xff]  }
 0x709   :  { %v3028_v8 = vpack.c.bf16 %v3024_v38, %v3020_v14  ;;  %v7253_v61 = vpack.c.bf16 %v3026_v48, %v3022_v17  ;;  %v7810_v38 = vld [vmem:[#allocation118_spill] sm:$0xff]  ;;  %v7811_v14 = vld [vmem:[#allocation119_spill] sm:$0xff]  ;;  %v5625_v17 = vld [vmem:[#allocation11 + $0x40] sm:$0xff]  }
 0x70a   :  { %v3029_v34 = vpack.c.bf16 %v3025_v13, %v3021_v49  ;;  %v3031_v5 = vpack.c.bf16 %v3027_v20, %v3023_v41  ;;  %v7814_v49 = vld [vmem:[#allocation122_spill] sm:$0xff]  ;;  %v5576_v27 = vld [vmem:[#allocation10 + $0xf4] ss:$8 sps:$4 sm:$0xff]   ;;  %v5574_v57 = vld [vmem:[#allocation10 + $0xf0] ss:$8 sps:$4 sm:$0xff]  }
 0x70b   :  { %v5529_v48 = vld [vmem:[#allocation10] ss:$8 sps:$4 sm:$0xff]   ;;  %v5579_v3 = vld [vmem:[#allocation10 + $0x104] ss:$8 sps:$4 sm:$0xff]  }
 0x70c   :  { %3064 = vmatprep.mubr.bf16.mxu0 %v3029_v34  ;;  %3150 = vmatprep.mubr.bf16.mxu1 %v3029_v34  ;;  %v5547_v13 = vld [vmem:[#allocation10 + $0x60] ss:$8 sps:$4 sm:$0xff]  }
 0x70d   :  { %3065 = vmatmul.mubr.bf16.vlgmr.msra.gmra.mrb[16].mxu0 %v3028_v8  ;;  %3151 = vmatmul.mubr.bf16.vlgmr.msra.gmra.mrb[16].mxu1 %v3028_v8  ;;  %v5562_v8 = vld [vmem:[#allocation10 + $0xb0] ss:$8 sps:$4 sm:$0xff]   ;;  %v5571_v6 = vld [vmem:[#allocation10 + $0xe0] ss:$8 sps:$4 sm:$0xff]  }
 0x70e   :  { %3076 = vmatpush1.bf16.msra.mxu0 %v6838_v23  ;;  %3162 = vmatpush1.bf16.msra.mxu1 %v6840_v56  ;;  %v7791_v23 = vld [vmem:[#allocation91_spill] sm:$0xff]  ;;  %v7792_v56 = vld [vmem:[#allocation92_spill] sm:$0xff]  ;;  %v5626_v41 = vld [vmem:[#allocation11] sm:$0xff]  }
 0x70f   :  { %3107 = vmatprep.mubr.bf16.mxu0 %v3031_v5  ;;  %3193 = vmatprep.mubr.bf16.mxu1 %v3031_v5  ;;  %v7813_v5 = vld [vmem:[#allocation121_spill] sm:$0xff]  ;;  %v5627_v20 = vld [vmem:[#allocation11 + $0x48] sm:$0xff]  }
 0x710   :  { %3077 = vmatprep.subr.bf16.mxu0 %v6842_v51  ;;  %3163 = vmatprep.subr.bf16.mxu1 %v6844_v0  ;;  %v7793_v51 = vld [vmem:[#allocation93_spill] sm:$0xff]  ;;  %v7794_v0 = vld [vmem:[#allocation94_spill] sm:$0xff] }
 0x711   :  { %v5628_v34 = vld [vmem:[#allocation11 + $0x8] sm:$0xff]  }
 0x712   :  { %3078 = vmatpush1.bf16.msra.mxu0 %v6848_v43  ;;  %3164 = vmatpush1.bf16.msra.mxu1 %v6850_v46  ;;  %v7795_v43 = vld [vmem:[#allocation95_spill] sm:$0xff]  ;;  %v7796_v46 = vld [vmem:[#allocation96_spill] sm:$0xff] }
 0x713   :  { %3079 = vmatprep.subr.bf16.mxu0 %v6852_v47  ;;  %3165 = vmatprep.subr.bf16.mxu1 %v6854_v16  ;;  %v7797_v47 = vld [vmem:[#allocation97_spill] sm:$0xff]  ;;  %v7798_v16 = vld [vmem:[#allocation98_spill] sm:$0xff] }
 0x716   :  { %3080 = vmatpush1.bf16.msra.mxu0 %v6860_v31  ;;  %3166 = vmatpush1.bf16.msra.mxu1 %v6862_v7  ;;  %v7799_v31 = vld [vmem:[#allocation99_spill] sm:$0xff]  ;;  %v7800_v7 = vld [vmem:[#allocation100_spill] sm:$0xff] }
 0x717   :  { %3081 = vmatprep.subr.bf16.mxu0 %v6866_v21  ;;  %3167 = vmatprep.subr.bf16.mxu1 %v6868_v50  ;;  %v7801_v21 = vld [vmem:[#allocation101_spill] sm:$0xff]  ;;  %v7802_v50 = vld [vmem:[#allocation102_spill] sm:$0xff] }
 0x71a   :  { %3082 = vmatpush1.bf16.msra.mxu0 %v6872_v11  ;;  %3168 = vmatpush1.bf16.msra.mxu1 %v6874_v12  ;;  %v7803_v11 = vld [vmem:[#allocation111_spill] sm:$0xff]  ;;  %v7804_v12 = vld [vmem:[#allocation112_spill] sm:$0xff] }
 0x71b   :  { %3083 = vmatprep.subr.bf16.mxu0 %v6878_v28  ;;  %3169 = vmatprep.subr.bf16.mxu1 %v6880_v15  ;;  %v7805_v28 = vld [vmem:[#allocation113_spill] sm:$0xff]  ;;  %v7806_v15 = vld [vmem:[#allocation114_spill] sm:$0xff] }
 0x71e   :  { %3084 = vmatpush1.bf16.msra.mxu0 %v6884_v39  ;;  %3170 = vmatpush1.bf16.msra.mxu1 %v6886_v32  ;;  %v7807_v39 = vld [vmem:[#allocation115_spill] sm:$0xff]  ;;  %v7808_v32 = vld [vmem:[#allocation116_spill] sm:$0xff] }
 0x71f   :  { %3085 = vmatprep.subr.bf16.mxu0 %v6890_v44  ;;  %3171 = vmatprep.subr.bf16.mxu1 %v7700_v58  ;;  %v7809_v44 = vld [vmem:[#allocation117_spill] sm:$0xff]  ;;  %v5534_v58 = vld [vmem:[#allocation10 + $0x14] ss:$8 sps:$4 sm:$0xff]  }
 0x722   :  { %3086 = vmatpush1.bf16.msra.mxu0 %v7701_v18  ;;  %3172 = vmatpush1.bf16.msra.mxu1 %v7702_v42  ;;  %v5532_v18 = vld [vmem:[#allocation10 + $0x10] ss:$8 sps:$4 sm:$0xff]   ;;  %v5537_v42 = vld [vmem:[#allocation10 + $0x24] ss:$8 sps:$4 sm:$0xff]  }
 0x723   :  { %3087 = vmatprep.subr.bf16.mxu0 %v7703_v19  ;;  %3173 = vmatprep.subr.bf16.mxu1 %v7704_v2  ;;  %v5535_v19 = vld [vmem:[#allocation10 + $0x20] ss:$8 sps:$4 sm:$0xff]   ;;  %v5540_v2 = vld [vmem:[#allocation10 + $0x34] ss:$8 sps:$4 sm:$0xff]  }
 0x726   :  { %3088 = vmatpush1.bf16.msra.mxu0 %v7705_v4  ;;  %3174 = vmatpush1.bf16.msra.mxu1 %v7706_v36  ;;  %v5538_v4 = vld [vmem:[#allocation10 + $0x30] ss:$8 sps:$4 sm:$0xff]   ;;  %v5543_v36 = vld [vmem:[#allocation10 + $0x44] ss:$8 sps:$4 sm:$0xff]  }
 0x727   :  { %3089 = vmatprep.subr.bf16.mxu0 %v7707_v33  ;;  %3175 = vmatprep.subr.bf16.mxu1 %v7708_v10  ;;  %v5541_v33 = vld [vmem:[#allocation10 + $0x40] ss:$8 sps:$4 sm:$0xff]   ;;  %v5546_v10 = vld [vmem:[#allocation10 + $0x54] ss:$8 sps:$4 sm:$0xff]  }
 0x72a   :  { %3090 = vmatpush1.bf16.msra.mxu0 %v7709_v62  ;;  %3176 = vmatpush1.bf16.msra.mxu1 %v7710_v60  ;;  %v5544_v62 = vld [vmem:[#allocation10 + $0x50] ss:$8 sps:$4 sm:$0xff]   ;;  %v5549_v60 = vld [vmem:[#allocation10 + $0x64] ss:$8 sps:$4 sm:$0xff]  }
 0x72b   :  { %3091 = vmatprep.subr.bf16.mxu0 %v7791_v23  ;;  %3177 = vmatprep.subr.bf16.mxu1 %v7792_v56  ;;  %v5629_v23 = vld [vmem:[#allocation11 + $0x50] sm:$0xff]  }
 0x72c   :  { %v5630_v56 = vld [vmem:[#allocation11 + $0x10] sm:$0xff]  }
 0x72e   :  { %3092 = vmatpush1.bf16.msra.mxu0 %v7793_v51  ;;  %3178 = vmatpush1.bf16.msra.mxu1 %v7794_v0  ;;  %v5631_v51 = vld [vmem:[#allocation11 + $0x58] sm:$0xff]  }
 0x72f   :  { %3093 = vmatprep.subr.bf16.mxu0 %v7795_v43  ;;  %3179 = vmatprep.subr.bf16.mxu1 %v7796_v46  ;;  %v5632_v0 = vld [vmem:[#allocation11 + $0x18] sm:$0xff]   ;;  %v5633_v43 = vld [vmem:[#allocation11 + $0x60] sm:$0xff]  }
 0x730   :  { %v5634_v46 = vld [vmem:[#allocation11 + $0x20] sm:$0xff]  }
 0x732   :  { %3094 = vmatpush1.bf16.msra.mxu0 %v7797_v47  ;;  %3180 = vmatpush1.bf16.msra.mxu1 %v7798_v16  ;;  %v5635_v47 = vld [vmem:[#allocation11 + $0x68] sm:$0xff]  }
 0x733   :  { %3095 = vmatprep.subr.bf16.mxu0 %v7799_v31  ;;  %3181 = vmatprep.subr.bf16.mxu1 %v7800_v7  ;;  %v7815_v7 = vld [vmem:[#allocation70_spill] sm:$0xff] }
 0x736   :  { %3096 = vmatpush1.bf16.msra.mxu0 %v7801_v21  ;;  %3182 = vmatpush1.bf16.msra.mxu1 %v7802_v50 }
 0x737   :  { %3097 = vmatprep.subr.bf16.mxu0 %v7723_v37  ;;  %3183 = vmatprep.subr.bf16.mxu1 %v7724_v54  ;;  %v5552_v37 = vld [vmem:[#allocation10 + $0x74] ss:$8 sps:$4 sm:$0xff]   ;;  %v5550_v54 = vld [vmem:[#allocation10 + $0x70] ss:$8 sps:$4 sm:$0xff]  }
 0x73a   :  { %3098 = vmatpush1.bf16.msra.mxu0 %v7725_v26  ;;  %3184 = vmatpush1.bf16.msra.mxu1 %v7726_v29  ;;  %v5555_v26 = vld [vmem:[#allocation10 + $0x84] ss:$8 sps:$4 sm:$0xff]   ;;  %v5553_v29 = vld [vmem:[#allocation10 + $0x80] ss:$8 sps:$4 sm:$0xff]  }
 0x73b   :  { %3099 = vmatprep.subr.bf16.mxu0 %v7727_v22  ;;  %3185 = vmatprep.subr.bf16.mxu1 %v7728_v45  ;;  %v5558_v22 = vld [vmem:[#allocation10 + $0x94] ss:$8 sps:$4 sm:$0xff]   ;;  %v5556_v45 = vld [vmem:[#allocation10 + $0x90] ss:$8 sps:$4 sm:$0xff]  }
 0x73e   :  { %3100 = vmatpush1.bf16.msra.mxu0 %v7729_v63  ;;  %3186 = vmatpush1.bf16.msra.mxu1 %v7730_v9  ;;  %v5561_v63 = vld [vmem:[#allocation10 + $0xa4] ss:$8 sps:$4 sm:$0xff]   ;;  %v5559_v9 = vld [vmem:[#allocation10 + $0xa0] ss:$8 sps:$4 sm:$0xff]  }
 0x73f   :  { %3101 = vmatprep.subr.bf16.mxu0 %v7803_v11  ;;  %3187 = vmatprep.subr.bf16.mxu1 %v7804_v12 }
 0x742   :  { %3102 = vmatpush1.bf16.msra.mxu0 %v7805_v28  ;;  %3188 = vmatpush1.bf16.msra.mxu1 %v7806_v15 }
 0x743   :  { %3103 = vmatprep.subr.bf16.mxu0 %v7807_v39  ;;  %3189 = vmatprep.subr.bf16.mxu1 %v7808_v32 }
 0x746   :  { %3104 = vmatpush1.bf16.msra.mxu0 %v7809_v44  ;;  %3190 = vmatpush1.bf16.msra.mxu1 %v7810_v38 }
 0x747   :  { %3105 = vmatprep.subr.bf16.mxu0 %v7811_v14  ;;  %3191 = vmatprep.subr.bf16.mxu1 %v7812_v35 }
 0x74a   :  { %3106 = vmatpush1.bf16.msra.mxu0 %v7813_v5  ;;  %3192 = vmatpush1.bf16.msra.mxu1 %v7814_v49 }
 0x74b   :  { %3612 = vmatprep.subr.bf16.mxu0 %v5531_v55  ;;  %4368 = vmatprep.subr.bf16.mxu1 %v5625_v17  ;;  %v5613_v17 = vld [vmem:[#allocation10 + $0x1c0] ss:$8 sps:$4 sm:$0xff]  }
 0x74d   :  { %3108 = vmatmul.mubr.bf16.vlgmr.msra.gmra.mrb[16].mxu0 %v7253_v61  ;;  %3194 = vmatmul.mubr.bf16.vlgmr.msra.gmra.mrb[16].mxu1 %v7253_v61  ;;  %v5564_v61 = vld [vmem:[#allocation10 + $0xb4] ss:$8 sps:$4 sm:$0xff]  }
 0x74e   :  { %3613 = vmatpush1.bf16.msra.mxu0 %v5529_v48  ;;  %4369 = vmatpush3.bf16.msra.mxu1 %v5626_v41  ;;  %v5618_v41 = vld [vmem:[#allocation10 + $0x1d4] ss:$8 sps:$4 sm:$0xff]  }
 0x74f   :  { %3614 = vmatprep.subr.bf16.mxu0 %v5534_v58  ;;  %4370 = vmatprep.subr.bf16.mxu1 %v5627_v20  ;;  %v5616_v20 = vld [vmem:[#allocation10 + $0x1d0] ss:$8 sps:$4 sm:$0xff]  }
 0x752   :  { %3615 = vmatpush1.bf16.msra.mxu0 %v5532_v18  ;;  %4371 = vmatpush3.bf16.msra.mxu1 %v5628_v34  ;;  %v5621_v34 = vld [vmem:[#allocation10 + $0x1e4] ss:$8 sps:$4 sm:$0xff]  }
 0x753   :  { %3616 = vmatprep.subr.bf16.mxu0 %v5537_v42  ;;  %4372 = vmatprep.subr.bf16.mxu1 %v5629_v23  ;;  %v5619_v23 = vld [vmem:[#allocation10 + $0x1e0] ss:$8 sps:$4 sm:$0xff]  }
 0x756   :  { %3617 = vmatpush1.bf16.msra.mxu0 %v5535_v19  ;;  %4373 = vmatpush3.bf16.msra.mxu1 %v5630_v56  ;;  %v5624_v56 = vld [vmem:[#allocation10 + $0x1f4] ss:$8 sps:$4 sm:$0xff]  }
 0x757   :  { %3618 = vmatprep.subr.bf16.mxu0 %v5540_v2  ;;  %4374 = vmatprep.subr.bf16.mxu1 %v5631_v51  ;;  %v5622_v51 = vld [vmem:[#allocation10 + $0x1f0] ss:$8 sps:$4 sm:$0xff]  }
 0x75a   :  { %3619 = vmatpush1.bf16.msra.mxu0 %v5538_v4  ;;  %4375 = vmatpush3.bf16.msra.mxu1 %v5632_v0  ;;  %v5636_v0 = vld [vmem:[#allocation11 + $0x28] sm:$0xff]  }
 0x75b   :  { %3620 = vmatprep.subr.bf16.mxu0 %v5543_v36  ;;  %4376 = vmatprep.subr.bf16.mxu1 %v5633_v43  ;;  %v5637_v43 = vld [vmem:[#allocation11 + $0x70] sm:$0xff]  }
 0x75e   :  { %3621 = vmatpush1.bf16.msra.mxu0 %v5541_v33  ;;  %4377 = vmatpush3.bf16.msra.mxu1 %v5634_v46  ;;  %v5638_v46 = vld [vmem:[#allocation11 + $0x30] sm:$0xff]  }
 0x75f   :  { %3622 = vmatprep.subr.bf16.mxu0 %v5546_v10  ;;  %4378 = vmatprep.subr.bf16.mxu1 %v5635_v47  ;;  %v5639_v47 = vld [vmem:[#allocation11 + $0x78] sm:$0xff]  }
 0x762   :  { %3623 = vmatpush1.bf16.msra.mxu0 %v5544_v62  ;;  %4379 = vmatpush3.bf16.msra.mxu1 %v5636_v0 }
 0x763   :  { %3624 = vmatprep.subr.bf16.mxu0 %v5549_v60  ;;  %v5582_v60 = vld [vmem:[#allocation10 + $0x114] ss:$8 sps:$4 sm:$0xff]   ;;  %4380 = vmatprep.subr.bf16.mxu1 %v5637_v43 }
 0x766   :  { %3625 = vmatpush1.bf16.msra.mxu0 %v5547_v13  ;;  %v5583_v13 = vld [vmem:[#allocation10 + $0x120] ss:$8 sps:$4 sm:$0xff]   ;;  %4381 = vmatpush3.bf16.msra.mxu1 %v5638_v46 }
 0x767   :  { %3626 = vmatprep.subr.bf16.mxu0 %v5552_v37  ;;  %v5588_v37 = vld [vmem:[#allocation10 + $0x134] ss:$8 sps:$4 sm:$0xff]   ;;  %4382 = vmatprep.subr.bf16.mxu1 %v5639_v47 }
 0x76a   :  { %3627 = vmatpush1.bf16.msra.mxu0 %v5550_v54  ;;  %v5586_v54 = vld [vmem:[#allocation10 + $0x130] ss:$8 sps:$4 sm:$0xff]  }
 0x76b   :  { %3628 = vmatprep.subr.bf16.mxu0 %v5555_v26  ;;  %v5591_v26 = vld [vmem:[#allocation10 + $0x144] ss:$8 sps:$4 sm:$0xff]  }
 0x76e   :  { %3629 = vmatpush1.bf16.msra.mxu0 %v5553_v29  ;;  %v5589_v29 = vld [vmem:[#allocation10 + $0x140] ss:$8 sps:$4 sm:$0xff]  }
 0x76f   :  { %3630 = vmatprep.subr.bf16.mxu0 %v5558_v22  ;;  %v5594_v22 = vld [vmem:[#allocation10 + $0x154] ss:$8 sps:$4 sm:$0xff]  }
 0x772   :  { %3631 = vmatpush1.bf16.msra.mxu0 %v5556_v45  ;;  %v5592_v45 = vld [vmem:[#allocation10 + $0x150] ss:$8 sps:$4 sm:$0xff]  }
 0x773   :  { %3632 = vmatprep.subr.bf16.mxu0 %v5561_v63  ;;  %v5597_v63 = vld [vmem:[#allocation10 + $0x164] ss:$8 sps:$4 sm:$0xff]  }
 0x776   :  { %3633 = vmatpush1.bf16.msra.mxu0 %v5559_v9  ;;  %v5595_v9 = vld [vmem:[#allocation10 + $0x160] ss:$8 sps:$4 sm:$0xff]  }
 0x777   :  { %3634 = vmatprep.subr.bf16.mxu0 %v5564_v61  ;;  %v5600_v61 = vld [vmem:[#allocation10 + $0x174] ss:$8 sps:$4 sm:$0xff]  }
 0x77a   :  { %3635 = vmatpush1.bf16.msra.mxu0 %v5562_v8  ;;  %v5598_v8 = vld [vmem:[#allocation10 + $0x170] ss:$8 sps:$4 sm:$0xff]  }
 0x77b   :  { %3636 = vmatprep.subr.bf16.mxu0 %v5567_v59  ;;  %v5603_v59 = vld [vmem:[#allocation10 + $0x184] ss:$8 sps:$4 sm:$0xff]  }
 0x77e   :  { %3637 = vmatpush1.bf16.msra.mxu0 %v5565_v52  ;;  %v5601_v52 = vld [vmem:[#allocation10 + $0x180] ss:$8 sps:$4 sm:$0xff]  }
 0x77f   :  { %3638 = vmatprep.subr.bf16.mxu0 %v5570_v53  ;;  %v5606_v53 = vld [vmem:[#allocation10 + $0x194] ss:$8 sps:$4 sm:$0xff]  }
 0x782   :  { %3639 = vmatpush1.bf16.msra.mxu0 %v5568_v24  ;;  %v5604_v24 = vld [vmem:[#allocation10 + $0x190] ss:$8 sps:$4 sm:$0xff]  }
 0x783   :  { %3640 = vmatprep.subr.bf16.mxu0 %v5573_v1  ;;  %v5609_v1 = vld [vmem:[#allocation10 + $0x1a4] ss:$8 sps:$4 sm:$0xff]  }
 0x786   :  { %3641 = vmatpush1.bf16.msra.mxu0 %v5571_v6  ;;  %v5607_v6 = vld [vmem:[#allocation10 + $0x1a0] ss:$8 sps:$4 sm:$0xff]  }
 0x787   :  { %3642 = vmatprep.subr.bf16.mxu0 %v5576_v27  ;;  %v5612_v27 = vld [vmem:[#allocation10 + $0x1b4] ss:$8 sps:$4 sm:$0xff]  }
 0x78a   :  { %3643 = vmatpush1.bf16.msra.mxu0 %v5574_v57  ;;  %v5610_v57 = vld [vmem:[#allocation10 + $0x1b0] ss:$8 sps:$4 sm:$0xff]  }
 0x78b   :  { %3655 = vmatprep.subr.bf16.mxu0 %v5579_v3  ;;  %v5615_v3 = vld [vmem:[#allocation10 + $0x1c4] ss:$8 sps:$4 sm:$0xff]  }
 0x820   :  { %v3109_v16 = vpop.f32.mrb[16].mxu0  ;;  %v3195_v31 = vpop.f32.mrb[16].mxu1 }
 0x821   :  { %v5214_v21 = vadd.f32 %v3109_v16, %v7815_v7  ;;  %v5218_v50 = vadd.f32 %v3195_v31, %v7699_v30  ;;  %v3111_v11 = vpop.f32.mrb[17].mxu0  ;;  %v3197_v12 = vpop.f32.mrb[17].mxu1  ;;  %v5640_v16 = vld [vmem:[#allocation11 + $0x38] sm:$0xff]   ;;  %v3280_v31 = vld [vmem:[%s7362_s9] sm:$0x3] }
 0x822   :  { %v5215_v28 = vadd.f32 %v3111_v11, %v7098_v25  ;;  %v5219_v15 = vadd.f32 %v3197_v12, %v7103_v40  ;;  %v3113_v39 = vpop.f32.mrb[18].mxu0  ;;  %v3199_v32 = vpop.f32.mrb[18].mxu1  ;;  %4383 = vmatpush3.bf16.msra.mxu1 %v5640_v16 }
 0x823   :  { %v5216_v44 = vadd.f32 %v3113_v39, %v7815_v7  ;;  %v5220_v38 = vadd.f32 %v3199_v32, %v7699_v30  ;;  %v3115_v14 = vpop.f32.mrb[19].mxu0  ;;  %v3201_v35 = vpop.f32.mrb[19].mxu1  ;;  %v3204_v49 = vmax.f32 %v5214_v21, 0.0  ;;  %v3206_v48 = vmax.f32 %v5218_v50, 0.0  ;;  %v5577_v30 = vld [vmem:[#allocation10 + $0x100] ss:$8 sps:$4 sm:$0xff]  }
 0x824   :  { %v5217_v55 = vadd.f32 %v3115_v14, %v7098_v25  ;;  %v5221_v5 = vadd.f32 %v3201_v35, %v7103_v40  ;;  %v3205_v42 = vmax.f32 %v5215_v28, 0.0  ;;  %v3207_v19 = vmax.f32 %v5219_v15, 0.0  ;;  %v5580_v25 = vld [vmem:[#allocation10 + $0x110] ss:$8 sps:$4 sm:$0xff]   ;;  %v5585_v40 = vld [vmem:[#allocation10 + $0x124] ss:$8 sps:$4 sm:$0xff]  }
 0x825   :  { %v3208_v58 = vmax.f32 %v5216_v44, 0.0  ;;  %v3210_v18 = vmax.f32 %v5220_v38, 0.0  ;;  %v7816_v7 = vld [vmem:[#allocation78_spill] sm:$0xff]  ;;  %v7817_v50 = vld [vmem:[#allocation79_spill] sm:$0xff] }
 0x826   :  { %v3209_v2 = vmax.f32 %v5217_v55, 0.0  ;;  %v3211_v4 = vmax.f32 %v5221_v5, 0.0  ;;  %v3285_v21 = vrot.slane %v3280_v31, %v7816_v7  ;;  %v3289_v11 = vrot.slane %v3280_v31, %v7817_v50 }
 0x827   :  { %v3212_v36 = vpack.c.bf16 %v3208_v58, %v3204_v49  ;;  %v7327_v33 = vpack.c.bf16 %v3210_v18, %v3206_v48 }
 0x828   :  { %v3213_v10 = vpack.c.bf16 %v3209_v2, %v3205_v42  ;;  %v3215_v62 = vpack.c.bf16 %v3211_v4, %v3207_v19  ;;  %v4135_v42 = vld [vmem:[%s7364_s11] ss:$0 sm:$0xff] }
 0x82a   :  { %3644 = vmatprep.mubr.bf16.mxu0 %v3213_v10 }
 0x82b   :  { %3645 = vmatmul.mubr.bf16.vlgmr.msra.gmra.mrb[20].mxu0 %v3212_v36 }
 0x82c   :  { %3656 = vmatpush1.bf16.msra.mxu0 %v5577_v30  ;;  %3687 = vmatprep.mubr.bf16.mxu0 %v3215_v62 }
 0x82d   :  { %3657 = vmatprep.subr.bf16.mxu0 %v5582_v60 }
 0x830   :  { %3658 = vmatpush1.bf16.msra.mxu0 %v5580_v25 }
 0x831   :  { %3659 = vmatprep.subr.bf16.mxu0 %v5585_v40 }
 0x834   :  { %3660 = vmatpush1.bf16.msra.mxu0 %v5583_v13 }
 0x835   :  { %3661 = vmatprep.subr.bf16.mxu0 %v5588_v37 }
 0x838   :  { %3662 = vmatpush1.bf16.msra.mxu0 %v5586_v54 }
 0x839   :  { %3663 = vmatprep.subr.bf16.mxu0 %v5591_v26 }
 0x83c   :  { %3664 = vmatpush1.bf16.msra.mxu0 %v5589_v29 }
 0x83d   :  { %3665 = vmatprep.subr.bf16.mxu0 %v5594_v22 }
 0x840   :  { %3666 = vmatpush1.bf16.msra.mxu0 %v5592_v45 }
 0x841   :  { %3667 = vmatprep.subr.bf16.mxu0 %v5597_v63 }
 0x844   :  { %3668 = vmatpush1.bf16.msra.mxu0 %v5595_v9 }
 0x845   :  { %3669 = vmatprep.subr.bf16.mxu0 %v5600_v61 }
 0x848   :  { %3670 = vmatpush1.bf16.msra.mxu0 %v5598_v8 }
 0x849   :  { %3671 = vmatprep.subr.bf16.mxu0 %v5603_v59 }
 0x84c   :  { %3672 = vmatpush1.bf16.msra.mxu0 %v5601_v52 }
 0x84d   :  { %3673 = vmatprep.subr.bf16.mxu0 %v5606_v53 }
 0x850   :  { %3674 = vmatpush1.bf16.msra.mxu0 %v5604_v24 }
 0x851   :  { %3675 = vmatprep.subr.bf16.mxu0 %v5609_v1 }
 0x854   :  { %3676 = vmatpush1.bf16.msra.mxu0 %v5607_v6 }
 0x855   :  { %3677 = vmatprep.subr.bf16.mxu0 %v5612_v27 }
 0x858   :  { %3678 = vmatpush1.bf16.msra.mxu0 %v5610_v57 }
 0x859   :  { %3679 = vmatprep.subr.bf16.mxu0 %v5615_v3 }
 0x85c   :  { %3680 = vmatpush1.bf16.msra.mxu0 %v5613_v17 }
 0x85d   :  { %3681 = vmatprep.subr.bf16.mxu0 %v5618_v41 }
 0x860   :  { %3682 = vmatpush1.bf16.msra.mxu0 %v5616_v20 }
 0x861   :  { %3683 = vmatprep.subr.bf16.mxu0 %v5621_v34 }
 0x864   :  { %3684 = vmatpush1.bf16.msra.mxu0 %v5619_v23 }
 0x865   :  { %3685 = vmatprep.subr.bf16.mxu0 %v5624_v56 }
 0x868   :  { %3686 = vmatpush1.bf16.msra.mxu0 %v5622_v51 }
 0x86b   :  { %3688 = vmatmul.mubr.bf16.vlgmr.msra.gmra.mrb[20].mxu0 %v7327_v33 }
 0x93e   :  { %v3689_v12 = vpop.f32.mrb[20].mxu0 }
 0x93f   :  { %v5222_v28 = vadd.f32 %v3689_v12, %v3285_v21  ;;  %v3691_v15 = vpop.f32.mrb[21].mxu0 }
 0x940   :  { %v5223_v39 = vadd.f32 %v3691_v15, %v3289_v11  ;;  %v3693_v32 = vpop.f32.mrb[22].mxu0 }
 0x941   :  { %v5224_v44 = vadd.f32 %v3693_v32, %v3285_v21  ;;  %v3695_v38 = vpop.f32.mrb[23].mxu0  ;;  %v3698_v35 = vmax.f32 %v5222_v28, 0.0 }
 0x942   :  { %v5225_v14 = vadd.f32 %v3695_v38, %v3289_v11  ;;  %v3699_v5 = vmax.f32 %v5223_v39, 0.0 }
 0x943   :  { %v3700_v55 = vmax.f32 %v5224_v44, 0.0 }
 0x944   :  { %v3701_v49 = vmax.f32 %v5225_v14, 0.0 }
 0x945   :  { %v3702_v48 = vpack.c.bf16 %v3700_v55, %v3698_v35 }
 0x946   :  { %v3703_v58 = vpack.c.bf16 %v3701_v49, %v3699_v5 }
 0x948   :  { %3871 = vmatprep.mubr.bf16.mxu1 %v3703_v58 }
 0x949   :  { %3872 = vmatmul.mubr.bf16.vlgmr.msra.gmra.mrb[20].mxu1 %v3702_v48 }
 0xa1c   :  { %v4384_v18 = vpop.f32.mrb[20].mxu1 }
 0xa1d   :  { %v4385_v19 = vpop.f32.mrb[21].mxu1 }
 0xa1e   :  { %v4386_v2 = vadd.f32 %v4385_v19, %v4384_v18  ;;  %v4387_v4 = vpop.f32.mrb[22].mxu1 }
 0xa1f   :  { %v4388_v36 = vpop.f32.mrb[23].mxu1 }
 0xa20   :  { %v3874_v33 = vadd.f32 %v4386_v2, %v4135_v42  ;;  %v4389_v10 = vadd.f32 %v4388_v36, %v4387_v4 }
 0xa22   :  { %3880 = vst [vmem:[#allocation13] sm:$0xff] %v3874_v33  ;;  %v3877_v62 = vadd.f32 %v4389_v10, %v4135_v42 }
 0xa24   :  { %3881 = vst [vmem:[#allocation13 + $0x8] sm:$0xff] %v3877_v62 }
 0xa25   :  { %5790 = shalt.err (!%p5787_p10)
}
 0xa26   :  { %s5791_s24 = scalar_lea.hbm %s7365_s12, 256 }
 0xa27   :  { %p5792_p11 = scmp.ne.s32.totalorder %s7365_s12, %s5791_s24  ;;  %p5795_p12 = scmp.lt.u32.totalorder %s5791_s24, %s7365_s12 }
 0xa29   :  { %p5797_p13 = pnand %p5795_p12, %p5792_p11 }
 0xa2b   :  { %5800 = shalt.err (!%p5797_p13)
}
 0xa2c   :  { %3893 = dma.vmem_to_hbm [thread:$0]  %s3888_s19, 256, %s7365_s12, [#allocation4], %s5812_s13, %s5812_s13, %s5813_s14  }
 0xa2d   :  { %5809 = dma.done.wait [#allocation4], 256  }
 0xa2e   :  { %5810 = vsyncadd [#allocation4], 4294967040 }
 0xa2f   :  { %3897 = vsyncpa [#allocation3], 1 }
 0xa30   :  { %3898 = vsyncpa [#allocation6], 1 }
 0xa31   :  { %3899 = vsyncpa [#allocation9], 1 }
 0xa32   :  { %3900 = vsyncpa [#allocation12], 1 }
 0xa33   :  { %3901 = vsyncpa [#allocation4], 1 }

</bundles_post_ra>
